<compile_context>
chip_gen: v7x
topology: tpu7x:2x2x1
jax: 0.10.0
libtpu: 0.0.40
codegen_flags: <defaults>
</compile_context>

<pallas_src>
import functools

import jax
import jax.numpy as jnp
import numpy as np
from jax import lax
from jax.experimental import pallas as pl
from jax.experimental.pallas import tpu as pltpu

NEG_SLOPE = 0.2
HALO = 13            # 1 + 3 + 9: receptive-field halo of the fused 3-block stack


def _leaky(x):
    return jnp.where(x > 0, x, NEG_SLOPE * x)


def _round_up(n, m):
    return (n + m - 1) // m * m


def _pick_tile(L, tile_l):
    """Largest multiple-of-8 tile <= tile_l whose last tile keeps either 0
    (divisible) or >= HALO valid rows, so only the last tile ever touches the
    right reflection boundary."""
    hi = min(_round_up(max(tile_l, 16), 8), _round_up(L, 8))
    for t in range(hi, 15, -8):
        r = L % t
        if r == 0 or r >= HALO:
            return t
    return _round_up(L, 8)        # single tile; always valid for L >= 14


def _vmem_limit_bytes(T, Cp):
    """Scoped-VMEM limit from the actual working set (+50% headroom)."""
    E = T + 2 * HALO
    weights = 15 * Cp * Cp * 2 + 6 * Cp * 4              # single-buffered bf16 + f32 bias
    scratch = 3 * E * Cp * 2                             # xw / y0 / y1 bf16
    io = 2 * (2 * T * Cp * 2) + 2 * (2 * HALO * Cp * 2)  # double-buffered tiles + halos
    transient = 6 * T * Cp * 4                           # f32 accumulators / temps
    need = weights + scratch + io + transient
    return int(min(max(need * 3 // 2, 32 * 1024 * 1024), 96 * 1024 * 1024))


# ---------------------------------------------------------------------------
# Fused kernel.  Frame convention: local row q  <->  global g = j*T - 13 + q.
# ---------------------------------------------------------------------------
def _make_kernel(T, v_last):
    E = T + 2 * HALO
    q_star = v_last + HALO - 1          # frame of the last VALID output row on the last tile

    def kernel(xm_ref, xh_ref, w1_ref, b1_ref, ws_ref, w2_ref, bo_ref,
               out_ref, xw_ref, y0_ref, y1_ref):
        j = pl.program_id(1)
        last = pl.num_programs(1) - 1

        # ---- assemble bf16 source window: [left halo | main tile | right halo]
        xw_ref[0:HALO] = xh_ref[0:HALO]
        xw_ref[HALO:HALO + T] = xm_ref[...]
        xw_ref[HALO + T:E] = xh_ref[HALO:2 * HALO]

        if v_last < T:
            # Ragged tail: x's 1-row reflection about the true end lands inside
            # the zero-padded main region of the last tile -> patch it here.
            @pl.when(j == last)
            def _():
                xw_ref[q_star + 1, :] = xw_ref[q_star - 1, :]

        def res_block(i, src_ref, q0, n, d):
            """shortcut(src) + conv1x1(leaky(dilconv3(leaky(src)))) on frames
            [q0, q0+n); src must be valid on [q0-d, q0+n+d).  Accumulated MXU
            matmuls (no im2col / concat temporaries)."""
            acc = jnp.dot(_leaky(src_ref[q0 - d:q0 - d + n]), w1_ref[i, 0],
                          preferred_element_type=jnp.float32)
            acc = acc + jnp.dot(_leaky(src_ref[q0:q0 + n]), w1_ref[i, 1],
                                preferred_element_type=jnp.float32)
            acc = acc + jnp.dot(_leaky(src_ref[q0 + d:q0 + d + n]), w1_ref[i, 2],
                                preferred_element_type=jnp.float32)
            h = _leaky(acc + b1_ref[i]).astype(jnp.bfloat16)
            out = jnp.dot(src_ref[q0:q0 + n], ws_ref[i],
                          preferred_element_type=jnp.float32)
            out = out + jnp.dot(h, w2_ref[i], preferred_element_type=jnp.float32)
            return out + bo_ref[i]

        # ---- block 0 (dilation 1): frames [1, T+25) ------------------------
        y0_ref[1:T + 25] = res_block(0, xw_ref, 1, T + 24, 1).astype(jnp.bfloat16)

        # ReflectionPad1d of blocks 1/2 around the true sequence boundaries.
        # Single-row copies, but only executed on the two boundary grid steps.
        @pl.when(j == 0)
        def _():
            for k in range(1, HALO):            # y0[-k] := y0[k]
                y0_ref[HALO - k, :] = y0_ref[HALO + k, :]

        @pl.when(j == last)
        def _():
            for k in range(1, HALO):            # y0[L-1+k] := y0[L-1-k]
                y0_ref[q_star + k, :] = y0_ref[q_star - k, :]

        # ---- block 1 (dilation 3): frames [4, T+22) ------------------------
        y1_ref[4:T + 22] = res_block(1, y0_ref, 4, T + 18, 3).astype(jnp.bfloat16)

        @pl.when(j == 0)
        def _():
            for k in range(1, 10):              # y1[-k] := y1[k]
                y1_ref[HALO - k, :] = y1_ref[HALO + k, :]

        @pl.when(j == last)
        def _():
            for k in range(1, 10):              # y1[L-1+k] := y1[L-1-k]
                y1_ref[q_star + k, :] = y1_ref[q_star - k, :]

        # ---- block 2 (dilation 9): frames [13, T+13) == the output tile ----
        out_ref[...] = res_block(2, y1_ref, HALO, T, 9).astype(out_ref.dtype)

    return kernel


# ---------------------------------------------------------------------------
# Wrapper (jitted so the light host prep/post fuses into single XLA passes).
# ---------------------------------------------------------------------------
@functools.partial(jax.jit, static_argnames=("cp", "tile_l", "channels_last"))
def _res_stack_impl(x_ncw, w1, b1, ws, w2, bo, *, cp, tile_l, channels_last):
    B, C, L = x_ncw.shape
    Cp = cp
    if L < HALO + 1:
        raise ValueError("ResStack Pallas kernel requires L >= 14 (reflection halo).")

    # bf16 BEFORE transpose/pad; channels-last with lane-dense Cp.
    x = jnp.transpose(x_ncw.astype(jnp.bfloat16), (0, 2, 1))
    x = jnp.pad(x, ((0, 0), (0, 0), (0, Cp - C)))

    T = _pick_tile(L, tile_l)
    nT = -(-L // T)
    Lp = nT * T
    v_last = L - (nT - 1) * T
    assert v_last == T or v_last >= HALO        # guaranteed by _pick_tile

    x_main = jnp.pad(x, ((0, 0), (0, Lp - L), (0, 0)))

    # Per-tile halos (13 left + 13 right rows), reflect-indexed at the true
    # sequence boundaries.  Only ~26/T of the input is duplicated host-side.
    tiles = np.arange(nT)[:, None] * T
    k = np.arange(2 * HALO)[None, :]
    g = np.where(k < HALO, tiles - HALO + k, tiles + T + (k - HALO))
    g = np.where(g < 0, -g, g)
    g = np.where(g >= L, 2 * (L - 1) - g, g)
    g = np.clip(g, 0, L - 1).astype(np.int32)
    x_halo = jnp.take(x, jnp.asarray(g.reshape(-1)), axis=1)
    x_halo = x_halo.reshape(B, nT, 2 * HALO, Cp)

    E = T + 2 * HALO
    # Whole-array VMEM residency for weights/biases: single buffered, no
    # per-step re-DMA (replaces the previous double-buffered full blocks).
    wspec = pl.BlockSpec(memory_space=pltpu.MemorySpace.VMEM)

    out = pl.pallas_call(
        _make_kernel(T, v_last),
        out_shape=jax.ShapeDtypeStruct((B, Lp, Cp), jnp.bfloat16),
        grid=(B, nT),
        in_specs=[
            pl.BlockSpec((None, T, Cp), lambda b, j: (b, j, 0)),                  # main tile
            pl.BlockSpec((None, None, 2 * HALO, Cp), lambda b, j: (b, j, 0, 0)),  # halos
            wspec, wspec, wspec, wspec, wspec,                                    # weights/biases
        ],
        out_specs=pl.BlockSpec((None, T, Cp), lambda b, j: (b, j, 0)),
        scratch_shapes=[pltpu.VMEM((E, Cp), jnp.bfloat16),    # assembled x window
                        pltpu.VMEM((E, Cp), jnp.bfloat16),    # y0
                        pltpu.VMEM((E, Cp), jnp.bfloat16)],   # y1
        compiler_params=pltpu.CompilerParams(
            dimension_semantics=("parallel", "parallel"),
            vmem_limit_bytes=_vmem_limit_bytes(T, Cp)),
    )(x_main, x_halo, w1, b1, ws, w2, bo)

    if channels_last:
        return out[:, :L, :C]                   # bf16 (B, L, C): no transpose pass
    return jnp.transpose(out[:, :L, :C], (0, 2, 1)).astype(x_ncw.dtype)


def res_stack_pallas(x_ncw, params, tile_l=1024, channels_last=False):
    """PyTorch-compatible entry point: x_ncw is (B, C, L) like nn.Conv1d.
    tile_l: <=1024 recommended on v7x (64 MiB VMEM); 2048-4096 on v5e/v6e."""
    kp = params["kernel"]
    return _res_stack_impl(x_ncw, kp["w1"], kp["b1"], kp["ws"], kp["w2"], kp["bo"],
                           cp=kp["cp"], tile_l=tile_l, channels_last=channels_last)


# ---------------------------------------------------------------------------
# Deterministic parameter construction (synthetic; mirrors weight_norm layers).
# ---------------------------------------------------------------------------
def _weight_norm(v):
    # nn.utils.weight_norm over dims (1, 2): at init g = ||v|| so weight == v.
    norm = jnp.sqrt(jnp.sum(v * v, axis=(1, 2), keepdims=True))
    g = norm[:, 0, 0]
    return g[:, None, None] * v / norm


def make_params(channel, seed=0):
    Cp = _round_up(channel, 128)
    key = jax.random.PRNGKey(seed)
    pt_blocks = []
    w1_l, b1_l, ws_l, w2_l, bo_l = [], [], [], [], []

    def pad_mat(m):      # (C, C) -> (Cp, Cp) zero-padded
        return jnp.zeros((Cp, Cp), jnp.float32).at[:channel, :channel].set(m)

    def pad_vec(v):
        return jnp.zeros((Cp,), jnp.float32).at[:channel].set(v)

    for i in range(3):
        keys = jax.random.split(jax.random.fold_in(key, i), 6)
        W1 = _weight_norm(0.3 * jax.random.normal(keys[0], (channel, channel, 3), jnp.float32))
        b1 = 0.1 * jax.random.normal(keys[1], (channel,), jnp.float32)
        W2 = _weight_norm(0.3 * jax.random.normal(keys[2], (channel, channel, 1), jnp.float32))
        b2 = 0.1 * jax.random.normal(keys[3], (channel,), jnp.float32)
        Ws = _weight_norm(0.3 * jax.random.normal(keys[4], (channel, channel, 1), jnp.float32))
        bs = 0.1 * jax.random.normal(keys[5], (channel,), jnp.float32)
        pt_blocks.append((W1, b1, W2, b2, Ws, bs))

        # Kernel layout: per-tap (Cp, Cp) matrices; x_row @ W[:, :, k].T.
        w1_l.append(jnp.stack([pad_mat(W1[:, :, t].T) for t in range(3)], axis=0))
        b1_l.append(pad_vec(b1))
        ws_l.append(pad_mat(Ws[:, :, 0].T))
        w2_l.append(pad_mat(W2[:, :, 0].T))
        bo_l.append(pad_vec(bs + b2))           # shortcut + tail biases pre-summed

    kernel_params = dict(
        w1=jnp.stack(w1_l).astype(jnp.bfloat16),     # (3, 3, Cp, Cp)
        b1=jnp.stack(b1_l)[:, None, :],              # (3, 1, Cp) f32
        ws=jnp.stack(ws_l).astype(jnp.bfloat16),     # (3, Cp, Cp)
        w2=jnp.stack(w2_l).astype(jnp.bfloat16),     # (3, Cp, Cp)
        bo=jnp.stack(bo_l)[:, None, :],              # (3, 1, Cp) f32
        cp=Cp,
    )
    return {"pytorch": pt_blocks, "kernel": kernel_params}


# ---------------------------------------------------------------------------
# Pure-JAX reference (NCW, matches the PyTorch module semantics).
# ---------------------------------------------------------------------------
def _conv1d_ref(x_ncw, w_oik, b, dilation):
    y = lax.conv_general_dilated(
        x_ncw, w_oik, window_strides=(1,), padding="VALID",
        rhs_dilation=(dilation,), dimension_numbers=("NCH", "OIH", "NCH"))
    return y + b[None, :, None]


def res_stack_ref(x_ncw, params):
    x = x_ncw.astype(jnp.float32)
    for i, (W1, b1, W2, b2, Ws, bs) in enumerate(params["pytorch"]):
        d = 3 ** i
        a = _leaky(x)
        a = jnp.pad(a, ((0, 0), (0, 0), (d, d)), mode="reflect")
        h = _leaky(_conv1d_ref(a, W1, b1, d))
        blk = _conv1d_ref(h, W2, b2, 1)
        sc = _conv1d_ref(x, Ws, bs, 1)
        x = sc + blk
    return x


if __name__ == "__main__":
    B, C, L = 2, 8, 96                     # small shapes; tile_l=32 -> 3 L-tiles
    key = jax.random.PRNGKey(0)
    x = jax.random.normal(key, (B, C, L), jnp.float32)
    params = make_params(C, seed=0)

    out = jax.block_until_ready(res_stack_pallas(x, params, tile_l=32))
    ref = jax.block_until_ready(res_stack_ref(x, params))
    assert out.shape == (B, C, L)
    # bf16 activations / MXU operands end-to-end, f32 accumulation.
    err = float(jnp.max(jnp.abs(out - ref)) / jnp.max(jnp.abs(ref)))
    assert err < 5e-2, f"normalized max err {err}"

    # Ragged length: exercises the padded-tail path and the tile-size search.
    L2 = 70
    x2 = jax.random.normal(jax.random.fold_in(key, 1), (B, C, L2), jnp.float32)
    out2 = jax.block_until_ready(res_stack_pallas(x2, params, tile_l=32))
    ref2 = jax.block_until_ready(res_stack_ref(x2, params))
    assert out2.shape == (B, C, L2)
    err2 = float(jnp.max(jnp.abs(out2 - ref2)) / jnp.max(jnp.abs(ref2)))
    assert err2 < 5e-2, f"ragged normalized max err {err2}"

    print("KERNEL_OK")
</pallas_src>

<mosaic_0001>
module attributes {stable_mosaic.version = 11 : i64} {
  func.func @kernel(%arg0: i32, %arg1: i32, %arg2: memref<1x32x128xbf16, #tpu.memory_space<vmem>>, %arg3: memref<1x1x26x128xbf16, #tpu.memory_space<vmem>>, %arg4: memref<3x3x128x128xbf16, #tpu.memory_space<vmem>>, %arg5: memref<3x1x128xf32, #tpu.memory_space<vmem>>, %arg6: memref<3x128x128xbf16, #tpu.memory_space<vmem>>, %arg7: memref<3x128x128xbf16, #tpu.memory_space<vmem>>, %arg8: memref<3x1x128xf32, #tpu.memory_space<vmem>>, %arg9: memref<1x32x128xbf16, #tpu.memory_space<vmem>>, %arg10: memref<58x128xbf16, #tpu.memory_space<vmem>>, %arg11: memref<58x128xbf16, #tpu.memory_space<vmem>>, %arg12: memref<58x128xbf16, #tpu.memory_space<vmem>>) attributes {dimension_semantics = [#tpu.dimension_semantics<parallel>, #tpu.dimension_semantics<parallel>], iteration_bounds = array<i64: 2, 3>, scalar_prefetch = 0 : i64, scratch_operands = 3 : i64, tpu.core_type = #tpu.core_type<tc>, window_params = [{transform_indices = @transform_0, window_bounds = array<i64: 1, 32, 128>}, {transform_indices = @transform_1, window_bounds = array<i64: 1, 1, 26, 128>}, {pipeline_mode = #tpu.pipeline_mode<synchronous>, transform_indices = @transform_2, window_bounds = array<i64: 3, 3, 128, 128>}, {pipeline_mode = #tpu.pipeline_mode<synchronous>, transform_indices = @transform_3, window_bounds = array<i64: 3, 1, 128>}, {pipeline_mode = #tpu.pipeline_mode<synchronous>, transform_indices = @transform_4, window_bounds = array<i64: 3, 128, 128>}, {pipeline_mode = #tpu.pipeline_mode<synchronous>, transform_indices = @transform_5, window_bounds = array<i64: 3, 128, 128>}, {pipeline_mode = #tpu.pipeline_mode<synchronous>, transform_indices = @transform_6, window_bounds = array<i64: 3, 1, 128>}, {transform_indices = @transform_7, window_bounds = array<i64: 1, 32, 128>}]} {
    %c0 = arith.constant 0 : index
    %c0_0 = arith.constant 0 : index
    %c0_1 = arith.constant 0 : index
    %c0_2 = arith.constant 0 : index
    %0 = vector.load %arg3[%c0, %c0_0, %c0_1, %c0_2] : memref<1x1x26x128xbf16, #tpu.memory_space<vmem>>, vector<1x1x13x128xbf16>
    %1 = vector.shape_cast %0 : vector<1x1x13x128xbf16> to vector<13x128xbf16>
    %c0_3 = arith.constant 0 : index
    %c0_4 = arith.constant 0 : index
    %2 = vector.load %arg10[%c0_3, %c0_4] : memref<58x128xbf16, #tpu.memory_space<vmem>>, vector<13x128xbf16>
    tpu.vector_store %arg10[%c0_3, %c0_4], %1 {strides = array<i32>} : memref<58x128xbf16, #tpu.memory_space<vmem>>, vector<13x128xbf16>,
    %c0_5 = arith.constant 0 : index
    %c0_6 = arith.constant 0 : index
    %c0_7 = arith.constant 0 : index
    %3 = vector.load %arg2[%c0_5, %c0_6, %c0_7] : memref<1x32x128xbf16, #tpu.memory_space<vmem>>, vector<1x32x128xbf16>
    %4 = vector.shape_cast %3 : vector<1x32x128xbf16> to vector<32x128xbf16>
    %c13 = arith.constant 13 : index
    %c0_8 = arith.constant 0 : index
    %5 = vector.load %arg10[%c13, %c0_8] : memref<58x128xbf16, #tpu.memory_space<vmem>>, vector<32x128xbf16>
    tpu.vector_store %arg10[%c13, %c0_8], %4 {strides = array<i32>} : memref<58x128xbf16, #tpu.memory_space<vmem>>, vector<32x128xbf16>,
    %c0_9 = arith.constant 0 : index
    %c0_10 = arith.constant 0 : index
    %c13_11 = arith.constant 13 : index
    %c0_12 = arith.constant 0 : index
    %6 = vector.load %arg3[%c0_9, %c0_10, %c13_11, %c0_12] : memref<1x1x26x128xbf16, #tpu.memory_space<vmem>>, vector<1x1x13x128xbf16>
    %7 = vector.shape_cast %6 : vector<1x1x13x128xbf16> to vector<13x128xbf16>
    %c45 = arith.constant 45 : index
    %c0_13 = arith.constant 0 : index
    %8 = vector.load %arg10[%c45, %c0_13] : memref<58x128xbf16, #tpu.memory_space<vmem>>, vector<13x128xbf16>
    tpu.vector_store %arg10[%c45, %c0_13], %7 {strides = array<i32>} : memref<58x128xbf16, #tpu.memory_space<vmem>>, vector<13x128xbf16>,
    %c0_14 = arith.constant 0 : index
    %c0_15 = arith.constant 0 : index
    %9 = vector.load %arg10[%c0_14, %c0_15] : memref<58x128xbf16, #tpu.memory_space<vmem>>, vector<56x128xbf16>
    %cst = arith.constant 0.000000e+00 : bf16
    %10 = vector.broadcast %cst : bf16 to vector<56x128xbf16>
    %11 = arith.cmpf ogt, %9, %10 : vector<56x128xbf16>
    %cst_16 = arith.constant 2.001950e-01 : bf16
    %12 = vector.broadcast %cst_16 : bf16 to vector<56x128xbf16>
    %13 = arith.mulf %12, %9 : vector<56x128xbf16>
    %14 = arith.select %11, %9, %13 : vector<56x128xi1>, vector<56x128xbf16>
    %c0_17 = arith.constant 0 : index
    %c0_18 = arith.constant 0 : index
    %c0_19 = arith.constant 0 : index
    %c0_20 = arith.constant 0 : index
    %15 = vector.load %arg4[%c0_17, %c0_18, %c0_19, %c0_20] : memref<3x3x128x128xbf16, #tpu.memory_space<vmem>>, vector<1x1x128x128xbf16>
    %16 = vector.shape_cast %15 : vector<1x1x128x128xbf16> to vector<128x128xbf16>
    %cst_21 = arith.constant dense<0.000000e+00> : vector<56x128xf32>
    %17 = tpu.matmul %14, %16, %cst_21 {dimension_numbers = #tpu.dot_dimension_numbers<[1], [0], [0], [1], [0, 0, 1, 1], [], []>} : vector<56x128xbf16>, vector<128x128xbf16>, vector<56x128xf32> -> vector<56x128xf32>
    %c1 = arith.constant 1 : index
    %c0_22 = arith.constant 0 : index
    %18 = vector.load %arg10[%c1, %c0_22] : memref<58x128xbf16, #tpu.memory_space<vmem>>, vector<56x128xbf16>
    %cst_23 = arith.constant 0.000000e+00 : bf16
    %19 = vector.broadcast %cst_23 : bf16 to vector<56x128xbf16>
    %20 = arith.cmpf ogt, %18, %19 : vector<56x128xbf16>
    %cst_24 = arith.constant 2.001950e-01 : bf16
    %21 = vector.broadcast %cst_24 : bf16 to vector<56x128xbf16>
    %22 = arith.mulf %21, %18 : vector<56x128xbf16>
    %23 = arith.select %20, %18, %22 : vector<56x128xi1>, vector<56x128xbf16>
    %c0_25 = arith.constant 0 : index
    %c1_26 = arith.constant 1 : index
    %c0_27 = arith.constant 0 : index
    %c0_28 = arith.constant 0 : index
    %24 = vector.load %arg4[%c0_25, %c1_26, %c0_27, %c0_28] : memref<3x3x128x128xbf16, #tpu.memory_space<vmem>>, vector<1x1x128x128xbf16>
    %25 = vector.shape_cast %24 : vector<1x1x128x128xbf16> to vector<128x128xbf16>
    %cst_29 = arith.constant dense<0.000000e+00> : vector<56x128xf32>
    %26 = tpu.matmul %23, %25, %cst_29 {dimension_numbers = #tpu.dot_dimension_numbers<[1], [0], [0], [1], [0, 0, 1, 1], [], []>} : vector<56x128xbf16>, vector<128x128xbf16>, vector<56x128xf32> -> vector<56x128xf32>
    %27 = arith.addf %17, %26 : vector<56x128xf32>
    %c2 = arith.constant 2 : index
    %c0_30 = arith.constant 0 : index
    %28 = vector.load %arg10[%c2, %c0_30] : memref<58x128xbf16, #tpu.memory_space<vmem>>, vector<56x128xbf16>
    %cst_31 = arith.constant 0.000000e+00 : bf16
    %29 = vector.broadcast %cst_31 : bf16 to vector<56x128xbf16>
    %30 = arith.cmpf ogt, %28, %29 : vector<56x128xbf16>
    %cst_32 = arith.constant 2.001950e-01 : bf16
    %31 = vector.broadcast %cst_32 : bf16 to vector<56x128xbf16>
    %32 = arith.mulf %31, %28 : vector<56x128xbf16>
    %33 = arith.select %30, %28, %32 : vector<56x128xi1>, vector<56x128xbf16>
    %c0_33 = arith.constant 0 : index
    %c2_34 = arith.constant 2 : index
    %c0_35 = arith.constant 0 : index
    %c0_36 = arith.constant 0 : index
    %34 = vector.load %arg4[%c0_33, %c2_34, %c0_35, %c0_36] : memref<3x3x128x128xbf16, #tpu.memory_space<vmem>>, vector<1x1x128x128xbf16>
    %35 = vector.shape_cast %34 : vector<1x1x128x128xbf16> to vector<128x128xbf16>
    %cst_37 = arith.constant dense<0.000000e+00> : vector<56x128xf32>
    %36 = tpu.matmul %33, %35, %cst_37 {dimension_numbers = #tpu.dot_dimension_numbers<[1], [0], [0], [1], [0, 0, 1, 1], [], []>} : vector<56x128xbf16>, vector<128x128xbf16>, vector<56x128xf32> -> vector<56x128xf32>
    %37 = arith.addf %27, %36 : vector<56x128xf32>
    %c0_38 = arith.constant 0 : index
    %c0_39 = arith.constant 0 : index
    %c0_40 = arith.constant 0 : index
    %38 = vector.load %arg5[%c0_38, %c0_39, %c0_40] : memref<3x1x128xf32, #tpu.memory_space<vmem>>, vector<1x1x128xf32>
    %39 = vector.shape_cast %38 : vector<1x1x128xf32> to vector<1x128xf32>
    %40 = vector.broadcast %39 : vector<1x128xf32> to vector<56x128xf32>
    %41 = arith.addf %37, %40 : vector<56x128xf32>
    %cst_41 = arith.constant 0.000000e+00 : f32
    %42 = vector.broadcast %cst_41 : f32 to vector<56x128xf32>
    %43 = arith.cmpf ogt, %41, %42 : vector<56x128xf32>
    %cst_42 = arith.constant 2.000000e-01 : f32
    %44 = vector.broadcast %cst_42 : f32 to vector<56x128xf32>
    %45 = arith.mulf %44, %41 : vector<56x128xf32>
    %46 = arith.select %43, %41, %45 : vector<56x128xi1>, vector<56x128xf32>
    %47 = arith.truncf %46 : vector<56x128xf32> to vector<56x128xbf16>
    %c1_43 = arith.constant 1 : index
    %c0_44 = arith.constant 0 : index
    %48 = vector.load %arg10[%c1_43, %c0_44] : memref<58x128xbf16, #tpu.memory_space<vmem>>, vector<56x128xbf16>
    %c0_45 = arith.constant 0 : index
    %c0_46 = arith.constant 0 : index
    %c0_47 = arith.constant 0 : index
    %49 = vector.load %arg6[%c0_45, %c0_46, %c0_47] : memref<3x128x128xbf16, #tpu.memory_space<vmem>>, vector<1x128x128xbf16>
    %50 = vector.shape_cast %49 : vector<1x128x128xbf16> to vector<128x128xbf16>
    %cst_48 = arith.constant dense<0.000000e+00> : vector<56x128xf32>
    %51 = tpu.matmul %48, %50, %cst_48 {dimension_numbers = #tpu.dot_dimension_numbers<[1], [0], [0], [1], [0, 0, 1, 1], [], []>} : vector<56x128xbf16>, vector<128x128xbf16>, vector<56x128xf32> -> vector<56x128xf32>
    %c0_49 = arith.constant 0 : index
    %c0_50 = arith.constant 0 : index
    %c0_51 = arith.constant 0 : index
    %52 = vector.load %arg7[%c0_49, %c0_50, %c0_51] : memref<3x128x128xbf16, #tpu.memory_space<vmem>>, vector<1x128x128xbf16>
    %53 = vector.shape_cast %52 : vector<1x128x128xbf16> to vector<128x128xbf16>
    %cst_52 = arith.constant dense<0.000000e+00> : vector<56x128xf32>
    %54 = tpu.matmul %47, %53, %cst_52 {dimension_numbers = #tpu.dot_dimension_numbers<[1], [0], [0], [1], [0, 0, 1, 1], [], []>} : vector<56x128xbf16>, vector<128x128xbf16>, vector<56x128xf32> -> vector<56x128xf32>
    %55 = arith.addf %51, %54 : vector<56x128xf32>
    %c0_53 = arith.constant 0 : index
    %c0_54 = arith.constant 0 : index
    %c0_55 = arith.constant 0 : index
    %56 = vector.load %arg8[%c0_53, %c0_54, %c0_55] : memref<3x1x128xf32, #tpu.memory_space<vmem>>, vector<1x1x128xf32>
    %57 = vector.shape_cast %56 : vector<1x1x128xf32> to vector<1x128xf32>
    %58 = vector.broadcast %57 : vector<1x128xf32> to vector<56x128xf32>
    %59 = arith.addf %55, %58 : vector<56x128xf32>
    %60 = arith.truncf %59 : vector<56x128xf32> to vector<56x128xbf16>
    %c1_56 = arith.constant 1 : index
    %c0_57 = arith.constant 0 : index
    %61 = vector.load %arg11[%c1_56, %c0_57] : memref<58x128xbf16, #tpu.memory_space<vmem>>, vector<56x128xbf16>
    tpu.vector_store %arg11[%c1_56, %c0_57], %60 {strides = array<i32>} : memref<58x128xbf16, #tpu.memory_space<vmem>>, vector<56x128xbf16>,
    %c0_i32 = arith.constant 0 : i32
    %62 = arith.cmpi eq, %arg1, %c0_i32 : i32
    %63 = arith.extui %62 : i1 to i32
    %c0_i32_58 = arith.constant 0 : i32
    %64 = arith.cmpi ne, %63, %c0_i32_58 : i32
    scf.if %64 {
      %c14 = arith.constant 14 : index
      %c0_156 = arith.constant 0 : index
      %182 = vector.load %arg11[%c14, %c0_156] : memref<58x128xbf16, #tpu.memory_space<vmem>>, vector<1x128xbf16>
      %183 = vector.shape_cast %182 : vector<1x128xbf16> to vector<128xbf16>
      %c12 = arith.constant 12 : index
      %c0_157 = arith.constant 0 : index
      %184 = vector.load %arg11[%c12, %c0_157] : memref<58x128xbf16, #tpu.memory_space<vmem>>, vector<1x128xbf16>
      %185 = vector.shape_cast %184 : vector<1x128xbf16> to vector<128xbf16>
      %186 = vector.shape_cast %183 : vector<128xbf16> to vector<1x128xbf16>
      tpu.vector_store %arg11[%c12, %c0_157], %186 {strides = array<i32>} : memref<58x128xbf16, #tpu.memory_space<vmem>>, vector<1x128xbf16>,
      %c15 = arith.constant 15 : index
      %c0_158 = arith.constant 0 : index
      %187 = vector.load %arg11[%c15, %c0_158] : memref<58x128xbf16, #tpu.memory_space<vmem>>, vector<1x128xbf16>
      %188 = vector.shape_cast %187 : vector<1x128xbf16> to vector<128xbf16>
      %c11 = arith.constant 11 : index
      %c0_159 = arith.constant 0 : index
      %189 = vector.load %arg11[%c11, %c0_159] : memref<58x128xbf16, #tpu.memory_space<vmem>>, vector<1x128xbf16>
      %190 = vector.shape_cast %189 : vector<1x128xbf16> to vector<128xbf16>
      %191 = vector.shape_cast %188 : vector<128xbf16> to vector<1x128xbf16>
      tpu.vector_store %arg11[%c11, %c0_159], %191 {strides = array<i32>} : memref<58x128xbf16, #tpu.memory_space<vmem>>, vector<1x128xbf16>,
      %c16 = arith.constant 16 : index
      %c0_160 = arith.constant 0 : index
      %192 = vector.load %arg11[%c16, %c0_160] : memref<58x128xbf16, #tpu.memory_space<vmem>>, vector<1x128xbf16>
      %193 = vector.shape_cast %192 : vector<1x128xbf16> to vector<128xbf16>
      %c10 = arith.constant 10 : index
      %c0_161 = arith.constant 0 : index
      %194 = vector.load %arg11[%c10, %c0_161] : memref<58x128xbf16, #tpu.memory_space<vmem>>, vector<1x128xbf16>
      %195 = vector.shape_cast %194 : vector<1x128xbf16> to vector<128xbf16>
      %196 = vector.shape_cast %193 : vector<128xbf16> to vector<1x128xbf16>
      tpu.vector_store %arg11[%c10, %c0_161], %196 {strides = array<i32>} : memref<58x128xbf16, #tpu.memory_space<vmem>>, vector<1x128xbf16>,
      %c17 = arith.constant 17 : index
      %c0_162 = arith.constant 0 : index
      %197 = vector.load %arg11[%c17, %c0_162] : memref<58x128xbf16, #tpu.memory_space<vmem>>, vector<1x128xbf16>
      %198 = vector.shape_cast %197 : vector<1x128xbf16> to vector<128xbf16>
      %c9 = arith.constant 9 : index
      %c0_163 = arith.constant 0 : index
      %199 = vector.load %arg11[%c9, %c0_163] : memref<58x128xbf16, #tpu.memory_space<vmem>>, vector<1x128xbf16>
      %200 = vector.shape_cast %199 : vector<1x128xbf16> to vector<128xbf16>
      %201 = vector.shape_cast %198 : vector<128xbf16> to vector<1x128xbf16>
      tpu.vector_store %arg11[%c9, %c0_163], %201 {strides = array<i32>} : memref<58x128xbf16, #tpu.memory_space<vmem>>, vector<1x128xbf16>,
      %c18 = arith.constant 18 : index
      %c0_164 = arith.constant 0 : index
      %202 = vector.load %arg11[%c18, %c0_164] : memref<58x128xbf16, #tpu.memory_space<vmem>>, vector<1x128xbf16>
      %203 = vector.shape_cast %202 : vector<1x128xbf16> to vector<128xbf16>
      %c8 = arith.constant 8 : index
      %c0_165 = arith.constant 0 : index
      %204 = vector.load %arg11[%c8, %c0_165] : memref<58x128xbf16, #tpu.memory_space<vmem>>, vector<1x128xbf16>
      %205 = vector.shape_cast %204 : vector<1x128xbf16> to vector<128xbf16>
      %206 = vector.shape_cast %203 : vector<128xbf16> to vector<1x128xbf16>
      tpu.vector_store %arg11[%c8, %c0_165], %206 {strides = array<i32>} : memref<58x128xbf16, #tpu.memory_space<vmem>>, vector<1x128xbf16>,
      %c19 = arith.constant 19 : index
      %c0_166 = arith.constant 0 : index
      %207 = vector.load %arg11[%c19, %c0_166] : memref<58x128xbf16, #tpu.memory_space<vmem>>, vector<1x128xbf16>
      %208 = vector.shape_cast %207 : vector<1x128xbf16> to vector<128xbf16>
      %c7_167 = arith.constant 7 : index
      %c0_168 = arith.constant 0 : index
      %209 = vector.load %arg11[%c7_167, %c0_168] : memref<58x128xbf16, #tpu.memory_space<vmem>>, vector<1x128xbf16>
      %210 = vector.shape_cast %209 : vector<1x128xbf16> to vector<128xbf16>
      %211 = vector.shape_cast %208 : vector<128xbf16> to vector<1x128xbf16>
      tpu.vector_store %arg11[%c7_167, %c0_168], %211 {strides = array<i32>} : memref<58x128xbf16, #tpu.memory_space<vmem>>, vector<1x128xbf16>,
      %c20 = arith.constant 20 : index
      %c0_169 = arith.constant 0 : index
      %212 = vector.load %arg11[%c20, %c0_169] : memref<58x128xbf16, #tpu.memory_space<vmem>>, vector<1x128xbf16>
      %213 = vector.shape_cast %212 : vector<1x128xbf16> to vector<128xbf16>
      %c6 = arith.constant 6 : index
      %c0_170 = arith.constant 0 : index
      %214 = vector.load %arg11[%c6, %c0_170] : memref<58x128xbf16, #tpu.memory_space<vmem>>, vector<1x128xbf16>
      %215 = vector.shape_cast %214 : vector<1x128xbf16> to vector<128xbf16>
      %216 = vector.shape_cast %213 : vector<128xbf16> to vector<1x128xbf16>
      tpu.vector_store %arg11[%c6, %c0_170], %216 {strides = array<i32>} : memref<58x128xbf16, #tpu.memory_space<vmem>>, vector<1x128xbf16>,
      %c21 = arith.constant 21 : index
      %c0_171 = arith.constant 0 : index
      %217 = vector.load %arg11[%c21, %c0_171] : memref<58x128xbf16, #tpu.memory_space<vmem>>, vector<1x128xbf16>
      %218 = vector.shape_cast %217 : vector<1x128xbf16> to vector<128xbf16>
      %c5 = arith.constant 5 : index
      %c0_172 = arith.constant 0 : index
      %219 = vector.load %arg11[%c5, %c0_172] : memref<58x128xbf16, #tpu.memory_space<vmem>>, vector<1x128xbf16>
      %220 = vector.shape_cast %219 : vector<1x128xbf16> to vector<128xbf16>
      %221 = vector.shape_cast %218 : vector<128xbf16> to vector<1x128xbf16>
      tpu.vector_store %arg11[%c5, %c0_172], %221 {strides = array<i32>} : memref<58x128xbf16, #tpu.memory_space<vmem>>, vector<1x128xbf16>,
      %c22_173 = arith.constant 22 : index
      %c0_174 = arith.constant 0 : index
      %222 = vector.load %arg11[%c22_173, %c0_174] : memref<58x128xbf16, #tpu.memory_space<vmem>>, vector<1x128xbf16>
      %223 = vector.shape_cast %222 : vector<1x128xbf16> to vector<128xbf16>
      %c4_175 = arith.constant 4 : index
      %c0_176 = arith.constant 0 : index
      %224 = vector.load %arg11[%c4_175, %c0_176] : memref<58x128xbf16, #tpu.memory_space<vmem>>, vector<1x128xbf16>
      %225 = vector.shape_cast %224 : vector<1x128xbf16> to vector<128xbf16>
      %226 = vector.shape_cast %223 : vector<128xbf16> to vector<1x128xbf16>
      tpu.vector_store %arg11[%c4_175, %c0_176], %226 {strides = array<i32>} : memref<58x128xbf16, #tpu.memory_space<vmem>>, vector<1x128xbf16>,
      %c23 = arith.constant 23 : index
      %c0_177 = arith.constant 0 : index
      %227 = vector.load %arg11[%c23, %c0_177] : memref<58x128xbf16, #tpu.memory_space<vmem>>, vector<1x128xbf16>
      %228 = vector.shape_cast %227 : vector<1x128xbf16> to vector<128xbf16>
      %c3 = arith.constant 3 : index
      %c0_178 = arith.constant 0 : index
      %229 = vector.load %arg11[%c3, %c0_178] : memref<58x128xbf16, #tpu.memory_space<vmem>>, vector<1x128xbf16>
      %230 = vector.shape_cast %229 : vector<1x128xbf16> to vector<128xbf16>
      %231 = vector.shape_cast %228 : vector<128xbf16> to vector<1x128xbf16>
      tpu.vector_store %arg11[%c3, %c0_178], %231 {strides = array<i32>} : memref<58x128xbf16, #tpu.memory_space<vmem>>, vector<1x128xbf16>,
      %c24 = arith.constant 24 : index
      %c0_179 = arith.constant 0 : index
      %232 = vector.load %arg11[%c24, %c0_179] : memref<58x128xbf16, #tpu.memory_space<vmem>>, vector<1x128xbf16>
      %233 = vector.shape_cast %232 : vector<1x128xbf16> to vector<128xbf16>
      %c2_180 = arith.constant 2 : index
      %c0_181 = arith.constant 0 : index
      %234 = vector.load %arg11[%c2_180, %c0_181] : memref<58x128xbf16, #tpu.memory_space<vmem>>, vector<1x128xbf16>
      %235 = vector.shape_cast %234 : vector<1x128xbf16> to vector<128xbf16>
      %236 = vector.shape_cast %233 : vector<128xbf16> to vector<1x128xbf16>
      tpu.vector_store %arg11[%c2_180, %c0_181], %236 {strides = array<i32>} : memref<58x128xbf16, #tpu.memory_space<vmem>>, vector<1x128xbf16>,
      %c25 = arith.constant 25 : index
      %c0_182 = arith.constant 0 : index
      %237 = vector.load %arg11[%c25, %c0_182] : memref<58x128xbf16, #tpu.memory_space<vmem>>, vector<1x128xbf16>
      %238 = vector.shape_cast %237 : vector<1x128xbf16> to vector<128xbf16>
      %c1_183 = arith.constant 1 : index
      %c0_184 = arith.constant 0 : index
      %239 = vector.load %arg11[%c1_183, %c0_184] : memref<58x128xbf16, #tpu.memory_space<vmem>>, vector<1x128xbf16>
      %240 = vector.shape_cast %239 : vector<1x128xbf16> to vector<128xbf16>
      %241 = vector.shape_cast %238 : vector<128xbf16> to vector<1x128xbf16>
      tpu.vector_store %arg11[%c1_183, %c0_184], %241 {strides = array<i32>} : memref<58x128xbf16, #tpu.memory_space<vmem>>, vector<1x128xbf16>,
    } else {
    }
    %c2_i32 = arith.constant 2 : i32
    %65 = arith.cmpi eq, %arg1, %c2_i32 : i32
    %66 = arith.extui %65 : i1 to i32
    %c0_i32_59 = arith.constant 0 : i32
    %67 = arith.cmpi ne, %66, %c0_i32_59 : i32
    scf.if %67 {
      %c43 = arith.constant 43 : index
      %c0_156 = arith.constant 0 : index
      %182 = vector.load %arg11[%c43, %c0_156] : memref<58x128xbf16, #tpu.memory_space<vmem>>, vector<1x128xbf16>
      %183 = vector.shape_cast %182 : vector<1x128xbf16> to vector<128xbf16>
      %c45_157 = arith.constant 45 : index
      %c0_158 = arith.constant 0 : index
      %184 = vector.load %arg11[%c45_157, %c0_158] : memref<58x128xbf16, #tpu.memory_space<vmem>>, vector<1x128xbf16>
      %185 = vector.shape_cast %184 : vector<1x128xbf16> to vector<128xbf16>
      %186 = vector.shape_cast %183 : vector<128xbf16> to vector<1x128xbf16>
      tpu.vector_store %arg11[%c45_157, %c0_158], %186 {strides = array<i32>} : memref<58x128xbf16, #tpu.memory_space<vmem>>, vector<1x128xbf16>,
      %c42 = arith.constant 42 : index
      %c0_159 = arith.constant 0 : index
      %187 = vector.load %arg11[%c42, %c0_159] : memref<58x128xbf16, #tpu.memory_space<vmem>>, vector<1x128xbf16>
      %188 = vector.shape_cast %187 : vector<1x128xbf16> to vector<128xbf16>
      %c46 = arith.constant 46 : index
      %c0_160 = arith.constant 0 : index
      %189 = vector.load %arg11[%c46, %c0_160] : memref<58x128xbf16, #tpu.memory_space<vmem>>, vector<1x128xbf16>
      %190 = vector.shape_cast %189 : vector<1x128xbf16> to vector<128xbf16>
      %191 = vector.shape_cast %188 : vector<128xbf16> to vector<1x128xbf16>
      tpu.vector_store %arg11[%c46, %c0_160], %191 {strides = array<i32>} : memref<58x128xbf16, #tpu.memory_space<vmem>>, vector<1x128xbf16>,
      %c41 = arith.constant 41 : index
      %c0_161 = arith.constant 0 : index
      %192 = vector.load %arg11[%c41, %c0_161] : memref<58x128xbf16, #tpu.memory_space<vmem>>, vector<1x128xbf16>
      %193 = vector.shape_cast %192 : vector<1x128xbf16> to vector<128xbf16>
      %c47 = arith.constant 47 : index
      %c0_162 = arith.constant 0 : index
      %194 = vector.load %arg11[%c47, %c0_162] : memref<58x128xbf16, #tpu.memory_space<vmem>>, vector<1x128xbf16>
      %195 = vector.shape_cast %194 : vector<1x128xbf16> to vector<128xbf16>
      %196 = vector.shape_cast %193 : vector<128xbf16> to vector<1x128xbf16>
      tpu.vector_store %arg11[%c47, %c0_162], %196 {strides = array<i32>} : memref<58x128xbf16, #tpu.memory_space<vmem>>, vector<1x128xbf16>,
      %c40 = arith.constant 40 : index
      %c0_163 = arith.constant 0 : index
      %197 = vector.load %arg11[%c40, %c0_163] : memref<58x128xbf16, #tpu.memory_space<vmem>>, vector<1x128xbf16>
      %198 = vector.shape_cast %197 : vector<1x128xbf16> to vector<128xbf16>
      %c48 = arith.constant 48 : index
      %c0_164 = arith.constant 0 : index
      %199 = vector.load %arg11[%c48, %c0_164] : memref<58x128xbf16, #tpu.memory_space<vmem>>, vector<1x128xbf16>
      %200 = vector.shape_cast %199 : vector<1x128xbf16> to vector<128xbf16>
      %201 = vector.shape_cast %198 : vector<128xbf16> to vector<1x128xbf16>
      tpu.vector_store %arg11[%c48, %c0_164], %201 {strides = array<i32>} : memref<58x128xbf16, #tpu.memory_space<vmem>>, vector<1x128xbf16>,
      %c39 = arith.constant 39 : index
      %c0_165 = arith.constant 0 : index
      %202 = vector.load %arg11[%c39, %c0_165] : memref<58x128xbf16, #tpu.memory_space<vmem>>, vector<1x128xbf16>
      %203 = vector.shape_cast %202 : vector<1x128xbf16> to vector<128xbf16>
      %c49 = arith.constant 49 : index
      %c0_166 = arith.constant 0 : index
      %204 = vector.load %arg11[%c49, %c0_166] : memref<58x128xbf16, #tpu.memory_space<vmem>>, vector<1x128xbf16>
      %205 = vector.shape_cast %204 : vector<1x128xbf16> to vector<128xbf16>
      %206 = vector.shape_cast %203 : vector<128xbf16> to vector<1x128xbf16>
      tpu.vector_store %arg11[%c49, %c0_166], %206 {strides = array<i32>} : memref<58x128xbf16, #tpu.memory_space<vmem>>, vector<1x128xbf16>,
      %c38 = arith.constant 38 : index
      %c0_167 = arith.constant 0 : index
      %207 = vector.load %arg11[%c38, %c0_167] : memref<58x128xbf16, #tpu.memory_space<vmem>>, vector<1x128xbf16>
      %208 = vector.shape_cast %207 : vector<1x128xbf16> to vector<128xbf16>
      %c50 = arith.constant 50 : index
      %c0_168 = arith.constant 0 : index
      %209 = vector.load %arg11[%c50, %c0_168] : memref<58x128xbf16, #tpu.memory_space<vmem>>, vector<1x128xbf16>
      %210 = vector.shape_cast %209 : vector<1x128xbf16> to vector<128xbf16>
      %211 = vector.shape_cast %208 : vector<128xbf16> to vector<1x128xbf16>
      tpu.vector_store %arg11[%c50, %c0_168], %211 {strides = array<i32>} : memref<58x128xbf16, #tpu.memory_space<vmem>>, vector<1x128xbf16>,
      %c37 = arith.constant 37 : index
      %c0_169 = arith.constant 0 : index
      %212 = vector.load %arg11[%c37, %c0_169] : memref<58x128xbf16, #tpu.memory_space<vmem>>, vector<1x128xbf16>
      %213 = vector.shape_cast %212 : vector<1x128xbf16> to vector<128xbf16>
      %c51 = arith.constant 51 : index
      %c0_170 = arith.constant 0 : index
      %214 = vector.load %arg11[%c51, %c0_170] : memref<58x128xbf16, #tpu.memory_space<vmem>>, vector<1x128xbf16>
      %215 = vector.shape_cast %214 : vector<1x128xbf16> to vector<128xbf16>
      %216 = vector.shape_cast %213 : vector<128xbf16> to vector<1x128xbf16>
      tpu.vector_store %arg11[%c51, %c0_170], %216 {strides = array<i32>} : memref<58x128xbf16, #tpu.memory_space<vmem>>, vector<1x128xbf16>,
      %c36 = arith.constant 36 : index
      %c0_171 = arith.constant 0 : index
      %217 = vector.load %arg11[%c36, %c0_171] : memref<58x128xbf16, #tpu.memory_space<vmem>>, vector<1x128xbf16>
      %218 = vector.shape_cast %217 : vector<1x128xbf16> to vector<128xbf16>
      %c52 = arith.constant 52 : index
      %c0_172 = arith.constant 0 : index
      %219 = vector.load %arg11[%c52, %c0_172] : memref<58x128xbf16, #tpu.memory_space<vmem>>, vector<1x128xbf16>
      %220 = vector.shape_cast %219 : vector<1x128xbf16> to vector<128xbf16>
      %221 = vector.shape_cast %218 : vector<128xbf16> to vector<1x128xbf16>
      tpu.vector_store %arg11[%c52, %c0_172], %221 {strides = array<i32>} : memref<58x128xbf16, #tpu.memory_space<vmem>>, vector<1x128xbf16>,
      %c35 = arith.constant 35 : index
      %c0_173 = arith.constant 0 : index
      %222 = vector.load %arg11[%c35, %c0_173] : memref<58x128xbf16, #tpu.memory_space<vmem>>, vector<1x128xbf16>
      %223 = vector.shape_cast %222 : vector<1x128xbf16> to vector<128xbf16>
      %c53 = arith.constant 53 : index
      %c0_174 = arith.constant 0 : index
      %224 = vector.load %arg11[%c53, %c0_174] : memref<58x128xbf16, #tpu.memory_space<vmem>>, vector<1x128xbf16>
      %225 = vector.shape_cast %224 : vector<1x128xbf16> to vector<128xbf16>
      %226 = vector.shape_cast %223 : vector<128xbf16> to vector<1x128xbf16>
      tpu.vector_store %arg11[%c53, %c0_174], %226 {strides = array<i32>} : memref<58x128xbf16, #tpu.memory_space<vmem>>, vector<1x128xbf16>,
      %c34 = arith.constant 34 : index
      %c0_175 = arith.constant 0 : index
      %227 = vector.load %arg11[%c34, %c0_175] : memref<58x128xbf16, #tpu.memory_space<vmem>>, vector<1x128xbf16>
      %228 = vector.shape_cast %227 : vector<1x128xbf16> to vector<128xbf16>
      %c54 = arith.constant 54 : index
      %c0_176 = arith.constant 0 : index
      %229 = vector.load %arg11[%c54, %c0_176] : memref<58x128xbf16, #tpu.memory_space<vmem>>, vector<1x128xbf16>
      %230 = vector.shape_cast %229 : vector<1x128xbf16> to vector<128xbf16>
      %231 = vector.shape_cast %228 : vector<128xbf16> to vector<1x128xbf16>
      tpu.vector_store %arg11[%c54, %c0_176], %231 {strides = array<i32>} : memref<58x128xbf16, #tpu.memory_space<vmem>>, vector<1x128xbf16>,
      %c33 = arith.constant 33 : index
      %c0_177 = arith.constant 0 : index
      %232 = vector.load %arg11[%c33, %c0_177] : memref<58x128xbf16, #tpu.memory_space<vmem>>, vector<1x128xbf16>
      %233 = vector.shape_cast %232 : vector<1x128xbf16> to vector<128xbf16>
      %c55 = arith.constant 55 : index
      %c0_178 = arith.constant 0 : index
      %234 = vector.load %arg11[%c55, %c0_178] : memref<58x128xbf16, #tpu.memory_space<vmem>>, vector<1x128xbf16>
      %235 = vector.shape_cast %234 : vector<1x128xbf16> to vector<128xbf16>
      %236 = vector.shape_cast %233 : vector<128xbf16> to vector<1x128xbf16>
      tpu.vector_store %arg11[%c55, %c0_178], %236 {strides = array<i32>} : memref<58x128xbf16, #tpu.memory_space<vmem>>, vector<1x128xbf16>,
      %c32 = arith.constant 32 : index
      %c0_179 = arith.constant 0 : index
      %237 = vector.load %arg11[%c32, %c0_179] : memref<58x128xbf16, #tpu.memory_space<vmem>>, vector<1x128xbf16>
      %238 = vector.shape_cast %237 : vector<1x128xbf16> to vector<128xbf16>
      %c56 = arith.constant 56 : index
      %c0_180 = arith.constant 0 : index
      %239 = vector.load %arg11[%c56, %c0_180] : memref<58x128xbf16, #tpu.memory_space<vmem>>, vector<1x128xbf16>
      %240 = vector.shape_cast %239 : vector<1x128xbf16> to vector<128xbf16>
      %241 = vector.shape_cast %238 : vector<128xbf16> to vector<1x128xbf16>
      tpu.vector_store %arg11[%c56, %c0_180], %241 {strides = array<i32>} : memref<58x128xbf16, #tpu.memory_space<vmem>>, vector<1x128xbf16>,
    } else {
    }
    %c1_60 = arith.constant 1 : index
    %c0_61 = arith.constant 0 : index
    %68 = vector.load %arg11[%c1_60, %c0_61] : memref<58x128xbf16, #tpu.memory_space<vmem>>, vector<50x128xbf16>
    %cst_62 = arith.constant 0.000000e+00 : bf16
    %69 = vector.broadcast %cst_62 : bf16 to vector<50x128xbf16>
    %70 = arith.cmpf ogt, %68, %69 : vector<50x128xbf16>
    %cst_63 = arith.constant 2.001950e-01 : bf16
    %71 = vector.broadcast %cst_63 : bf16 to vector<50x128xbf16>
    %72 = arith.mulf %71, %68 : vector<50x128xbf16>
    %73 = arith.select %70, %68, %72 : vector<50x128xi1>, vector<50x128xbf16>
    %c1_64 = arith.constant 1 : index
    %c0_65 = arith.constant 0 : index
    %c0_66 = arith.constant 0 : index
    %c0_67 = arith.constant 0 : index
    %74 = vector.load %arg4[%c1_64, %c0_65, %c0_66, %c0_67] : memref<3x3x128x128xbf16, #tpu.memory_space<vmem>>, vector<1x1x128x128xbf16>
    %75 = vector.shape_cast %74 : vector<1x1x128x128xbf16> to vector<128x128xbf16>
    %cst_68 = arith.constant dense<0.000000e+00> : vector<50x128xf32>
    %76 = tpu.matmul %73, %75, %cst_68 {dimension_numbers = #tpu.dot_dimension_numbers<[1], [0], [0], [1], [0, 0, 1, 1], [], []>} : vector<50x128xbf16>, vector<128x128xbf16>, vector<50x128xf32> -> vector<50x128xf32>
    %c4 = arith.constant 4 : index
    %c0_69 = arith.constant 0 : index
    %77 = vector.load %arg11[%c4, %c0_69] : memref<58x128xbf16, #tpu.memory_space<vmem>>, vector<50x128xbf16>
    %cst_70 = arith.constant 0.000000e+00 : bf16
    %78 = vector.broadcast %cst_70 : bf16 to vector<50x128xbf16>
    %79 = arith.cmpf ogt, %77, %78 : vector<50x128xbf16>
    %cst_71 = arith.constant 2.001950e-01 : bf16
    %80 = vector.broadcast %cst_71 : bf16 to vector<50x128xbf16>
    %81 = arith.mulf %80, %77 : vector<50x128xbf16>
    %82 = arith.select %79, %77, %81 : vector<50x128xi1>, vector<50x128xbf16>
    %c1_72 = arith.constant 1 : index
    %c1_73 = arith.constant 1 : index
    %c0_74 = arith.constant 0 : index
    %c0_75 = arith.constant 0 : index
    %83 = vector.load %arg4[%c1_72, %c1_73, %c0_74, %c0_75] : memref<3x3x128x128xbf16, #tpu.memory_space<vmem>>, vector<1x1x128x128xbf16>
    %84 = vector.shape_cast %83 : vector<1x1x128x128xbf16> to vector<128x128xbf16>
    %cst_76 = arith.constant dense<0.000000e+00> : vector<50x128xf32>
    %85 = tpu.matmul %82, %84, %cst_76 {dimension_numbers = #tpu.dot_dimension_numbers<[1], [0], [0], [1], [0, 0, 1, 1], [], []>} : vector<50x128xbf16>, vector<128x128xbf16>, vector<50x128xf32> -> vector<50x128xf32>
    %86 = arith.addf %76, %85 : vector<50x128xf32>
    %c7 = arith.constant 7 : index
    %c0_77 = arith.constant 0 : index
    %87 = vector.load %arg11[%c7, %c0_77] : memref<58x128xbf16, #tpu.memory_space<vmem>>, vector<50x128xbf16>
    %cst_78 = arith.constant 0.000000e+00 : bf16
    %88 = vector.broadcast %cst_78 : bf16 to vector<50x128xbf16>
    %89 = arith.cmpf ogt, %87, %88 : vector<50x128xbf16>
    %cst_79 = arith.constant 2.001950e-01 : bf16
    %90 = vector.broadcast %cst_79 : bf16 to vector<50x128xbf16>
    %91 = arith.mulf %90, %87 : vector<50x128xbf16>
    %92 = arith.select %89, %87, %91 : vector<50x128xi1>, vector<50x128xbf16>
    %c1_80 = arith.constant 1 : index
    %c2_81 = arith.constant 2 : index
    %c0_82 = arith.constant 0 : index
    %c0_83 = arith.constant 0 : index
    %93 = vector.load %arg4[%c1_80, %c2_81, %c0_82, %c0_83] : memref<3x3x128x128xbf16, #tpu.memory_space<vmem>>, vector<1x1x128x128xbf16>
    %94 = vector.shape_cast %93 : vector<1x1x128x128xbf16> to vector<128x128xbf16>
    %cst_84 = arith.constant dense<0.000000e+00> : vector<50x128xf32>
    %95 = tpu.matmul %92, %94, %cst_84 {dimension_numbers = #tpu.dot_dimension_numbers<[1], [0], [0], [1], [0, 0, 1, 1], [], []>} : vector<50x128xbf16>, vector<128x128xbf16>, vector<50x128xf32> -> vector<50x128xf32>
    %96 = arith.addf %86, %95 : vector<50x128xf32>
    %c1_85 = arith.constant 1 : index
    %c0_86 = arith.constant 0 : index
    %c0_87 = arith.constant 0 : index
    %97 = vector.load %arg5[%c1_85, %c0_86, %c0_87] : memref<3x1x128xf32, #tpu.memory_space<vmem>>, vector<1x1x128xf32>
    %98 = vector.shape_cast %97 : vector<1x1x128xf32> to vector<1x128xf32>
    %99 = vector.broadcast %98 : vector<1x128xf32> to vector<50x128xf32>
    %100 = arith.addf %96, %99 : vector<50x128xf32>
    %cst_88 = arith.constant 0.000000e+00 : f32
    %101 = vector.broadcast %cst_88 : f32 to vector<50x128xf32>
    %102 = arith.cmpf ogt, %100, %101 : vector<50x128xf32>
    %cst_89 = arith.constant 2.000000e-01 : f32
    %103 = vector.broadcast %cst_89 : f32 to vector<50x128xf32>
    %104 = arith.mulf %103, %100 : vector<50x128xf32>
    %105 = arith.select %102, %100, %104 : vector<50x128xi1>, vector<50x128xf32>
    %106 = arith.truncf %105 : vector<50x128xf32> to vector<50x128xbf16>
    %c4_90 = arith.constant 4 : index
    %c0_91 = arith.constant 0 : index
    %107 = vector.load %arg11[%c4_90, %c0_91] : memref<58x128xbf16, #tpu.memory_space<vmem>>, vector<50x128xbf16>
    %c1_92 = arith.constant 1 : index
    %c0_93 = arith.constant 0 : index
    %c0_94 = arith.constant 0 : index
    %108 = vector.load %arg6[%c1_92, %c0_93, %c0_94] : memref<3x128x128xbf16, #tpu.memory_space<vmem>>, vector<1x128x128xbf16>
    %109 = vector.shape_cast %108 : vector<1x128x128xbf16> to vector<128x128xbf16>
    %cst_95 = arith.constant dense<0.000000e+00> : vector<50x128xf32>
    %110 = tpu.matmul %107, %109, %cst_95 {dimension_numbers = #tpu.dot_dimension_numbers<[1], [0], [0], [1], [0, 0, 1, 1], [], []>} : vector<50x128xbf16>, vector<128x128xbf16>, vector<50x128xf32> -> vector<50x128xf32>
    %c1_96 = arith.constant 1 : index
    %c0_97 = arith.constant 0 : index
    %c0_98 = arith.constant 0 : index
    %111 = vector.load %arg7[%c1_96, %c0_97, %c0_98] : memref<3x128x128xbf16, #tpu.memory_space<vmem>>, vector<1x128x128xbf16>
    %112 = vector.shape_cast %111 : vector<1x128x128xbf16> to vector<128x128xbf16>
    %cst_99 = arith.constant dense<0.000000e+00> : vector<50x128xf32>
    %113 = tpu.matmul %106, %112, %cst_99 {dimension_numbers = #tpu.dot_dimension_numbers<[1], [0], [0], [1], [0, 0, 1, 1], [], []>} : vector<50x128xbf16>, vector<128x128xbf16>, vector<50x128xf32> -> vector<50x128xf32>
    %114 = arith.addf %110, %113 : vector<50x128xf32>
    %c1_100 = arith.constant 1 : index
    %c0_101 = arith.constant 0 : index
    %c0_102 = arith.constant 0 : index
    %115 = vector.load %arg8[%c1_100, %c0_101, %c0_102] : memref<3x1x128xf32, #tpu.memory_space<vmem>>, vector<1x1x128xf32>
    %116 = vector.shape_cast %115 : vector<1x1x128xf32> to vector<1x128xf32>
    %117 = vector.broadcast %116 : vector<1x128xf32> to vector<50x128xf32>
    %118 = arith.addf %114, %117 : vector<50x128xf32>
    %119 = arith.truncf %118 : vector<50x128xf32> to vector<50x128xbf16>
    %c4_103 = arith.constant 4 : index
    %c0_104 = arith.constant 0 : index
    %120 = vector.load %arg12[%c4_103, %c0_104] : memref<58x128xbf16, #tpu.memory_space<vmem>>, vector<50x128xbf16>
    tpu.vector_store %arg12[%c4_103, %c0_104], %119 {strides = array<i32>} : memref<58x128xbf16, #tpu.memory_space<vmem>>, vector<50x128xbf16>,
    %c0_i32_105 = arith.constant 0 : i32
    %121 = arith.cmpi eq, %arg1, %c0_i32_105 : i32
    %122 = arith.extui %121 : i1 to i32
    %c0_i32_106 = arith.constant 0 : i32
    %123 = arith.cmpi ne, %122, %c0_i32_106 : i32
    scf.if %123 {
      %c14 = arith.constant 14 : index
      %c0_156 = arith.constant 0 : index
      %182 = vector.load %arg12[%c14, %c0_156] : memref<58x128xbf16, #tpu.memory_space<vmem>>, vector<1x128xbf16>
      %183 = vector.shape_cast %182 : vector<1x128xbf16> to vector<128xbf16>
      %c12 = arith.constant 12 : index
      %c0_157 = arith.constant 0 : index
      %184 = vector.load %arg12[%c12, %c0_157] : memref<58x128xbf16, #tpu.memory_space<vmem>>, vector<1x128xbf16>
      %185 = vector.shape_cast %184 : vector<1x128xbf16> to vector<128xbf16>
      %186 = vector.shape_cast %183 : vector<128xbf16> to vector<1x128xbf16>
      tpu.vector_store %arg12[%c12, %c0_157], %186 {strides = array<i32>} : memref<58x128xbf16, #tpu.memory_space<vmem>>, vector<1x128xbf16>,
      %c15 = arith.constant 15 : index
      %c0_158 = arith.constant 0 : index
      %187 = vector.load %arg12[%c15, %c0_158] : memref<58x128xbf16, #tpu.memory_space<vmem>>, vector<1x128xbf16>
      %188 = vector.shape_cast %187 : vector<1x128xbf16> to vector<128xbf16>
      %c11 = arith.constant 11 : index
      %c0_159 = arith.constant 0 : index
      %189 = vector.load %arg12[%c11, %c0_159] : memref<58x128xbf16, #tpu.memory_space<vmem>>, vector<1x128xbf16>
      %190 = vector.shape_cast %189 : vector<1x128xbf16> to vector<128xbf16>
      %191 = vector.shape_cast %188 : vector<128xbf16> to vector<1x128xbf16>
      tpu.vector_store %arg12[%c11, %c0_159], %191 {strides = array<i32>} : memref<58x128xbf16, #tpu.memory_space<vmem>>, vector<1x128xbf16>,
      %c16 = arith.constant 16 : index
      %c0_160 = arith.constant 0 : index
      %192 = vector.load %arg12[%c16, %c0_160] : memref<58x128xbf16, #tpu.memory_space<vmem>>, vector<1x128xbf16>
      %193 = vector.shape_cast %192 : vector<1x128xbf16> to vector<128xbf16>
      %c10 = arith.constant 10 : index
      %c0_161 = arith.constant 0 : index
      %194 = vector.load %arg12[%c10, %c0_161] : memref<58x128xbf16, #tpu.memory_space<vmem>>, vector<1x128xbf16>
      %195 = vector.shape_cast %194 : vector<1x128xbf16> to vector<128xbf16>
      %196 = vector.shape_cast %193 : vector<128xbf16> to vector<1x128xbf16>
      tpu.vector_store %arg12[%c10, %c0_161], %196 {strides = array<i32>} : memref<58x128xbf16, #tpu.memory_space<vmem>>, vector<1x128xbf16>,
      %c17 = arith.constant 17 : index
      %c0_162 = arith.constant 0 : index
      %197 = vector.load %arg12[%c17, %c0_162] : memref<58x128xbf16, #tpu.memory_space<vmem>>, vector<1x128xbf16>
      %198 = vector.shape_cast %197 : vector<1x128xbf16> to vector<128xbf16>
      %c9 = arith.constant 9 : index
      %c0_163 = arith.constant 0 : index
      %199 = vector.load %arg12[%c9, %c0_163] : memref<58x128xbf16, #tpu.memory_space<vmem>>, vector<1x128xbf16>
      %200 = vector.shape_cast %199 : vector<1x128xbf16> to vector<128xbf16>
      %201 = vector.shape_cast %198 : vector<128xbf16> to vector<1x128xbf16>
      tpu.vector_store %arg12[%c9, %c0_163], %201 {strides = array<i32>} : memref<58x128xbf16, #tpu.memory_space<vmem>>, vector<1x128xbf16>,
      %c18 = arith.constant 18 : index
      %c0_164 = arith.constant 0 : index
      %202 = vector.load %arg12[%c18, %c0_164] : memref<58x128xbf16, #tpu.memory_space<vmem>>, vector<1x128xbf16>
      %203 = vector.shape_cast %202 : vector<1x128xbf16> to vector<128xbf16>
      %c8 = arith.constant 8 : index
      %c0_165 = arith.constant 0 : index
      %204 = vector.load %arg12[%c8, %c0_165] : memref<58x128xbf16, #tpu.memory_space<vmem>>, vector<1x128xbf16>
      %205 = vector.shape_cast %204 : vector<1x128xbf16> to vector<128xbf16>
      %206 = vector.shape_cast %203 : vector<128xbf16> to vector<1x128xbf16>
      tpu.vector_store %arg12[%c8, %c0_165], %206 {strides = array<i32>} : memref<58x128xbf16, #tpu.memory_space<vmem>>, vector<1x128xbf16>,
      %c19 = arith.constant 19 : index
      %c0_166 = arith.constant 0 : index
      %207 = vector.load %arg12[%c19, %c0_166] : memref<58x128xbf16, #tpu.memory_space<vmem>>, vector<1x128xbf16>
      %208 = vector.shape_cast %207 : vector<1x128xbf16> to vector<128xbf16>
      %c7_167 = arith.constant 7 : index
      %c0_168 = arith.constant 0 : index
      %209 = vector.load %arg12[%c7_167, %c0_168] : memref<58x128xbf16, #tpu.memory_space<vmem>>, vector<1x128xbf16>
      %210 = vector.shape_cast %209 : vector<1x128xbf16> to vector<128xbf16>
      %211 = vector.shape_cast %208 : vector<128xbf16> to vector<1x128xbf16>
      tpu.vector_store %arg12[%c7_167, %c0_168], %211 {strides = array<i32>} : memref<58x128xbf16, #tpu.memory_space<vmem>>, vector<1x128xbf16>,
      %c20 = arith.constant 20 : index
      %c0_169 = arith.constant 0 : index
      %212 = vector.load %arg12[%c20, %c0_169] : memref<58x128xbf16, #tpu.memory_space<vmem>>, vector<1x128xbf16>
      %213 = vector.shape_cast %212 : vector<1x128xbf16> to vector<128xbf16>
      %c6 = arith.constant 6 : index
      %c0_170 = arith.constant 0 : index
      %214 = vector.load %arg12[%c6, %c0_170] : memref<58x128xbf16, #tpu.memory_space<vmem>>, vector<1x128xbf16>
      %215 = vector.shape_cast %214 : vector<1x128xbf16> to vector<128xbf16>
      %216 = vector.shape_cast %213 : vector<128xbf16> to vector<1x128xbf16>
      tpu.vector_store %arg12[%c6, %c0_170], %216 {strides = array<i32>} : memref<58x128xbf16, #tpu.memory_space<vmem>>, vector<1x128xbf16>,
      %c21 = arith.constant 21 : index
      %c0_171 = arith.constant 0 : index
      %217 = vector.load %arg12[%c21, %c0_171] : memref<58x128xbf16, #tpu.memory_space<vmem>>, vector<1x128xbf16>
      %218 = vector.shape_cast %217 : vector<1x128xbf16> to vector<128xbf16>
      %c5 = arith.constant 5 : index
      %c0_172 = arith.constant 0 : index
      %219 = vector.load %arg12[%c5, %c0_172] : memref<58x128xbf16, #tpu.memory_space<vmem>>, vector<1x128xbf16>
      %220 = vector.shape_cast %219 : vector<1x128xbf16> to vector<128xbf16>
      %221 = vector.shape_cast %218 : vector<128xbf16> to vector<1x128xbf16>
      tpu.vector_store %arg12[%c5, %c0_172], %221 {strides = array<i32>} : memref<58x128xbf16, #tpu.memory_space<vmem>>, vector<1x128xbf16>,
      %c22_173 = arith.constant 22 : index
      %c0_174 = arith.constant 0 : index
      %222 = vector.load %arg12[%c22_173, %c0_174] : memref<58x128xbf16, #tpu.memory_space<vmem>>, vector<1x128xbf16>
      %223 = vector.shape_cast %222 : vector<1x128xbf16> to vector<128xbf16>
      %c4_175 = arith.constant 4 : index
      %c0_176 = arith.constant 0 : index
      %224 = vector.load %arg12[%c4_175, %c0_176] : memref<58x128xbf16, #tpu.memory_space<vmem>>, vector<1x128xbf16>
      %225 = vector.shape_cast %224 : vector<1x128xbf16> to vector<128xbf16>
      %226 = vector.shape_cast %223 : vector<128xbf16> to vector<1x128xbf16>
      tpu.vector_store %arg12[%c4_175, %c0_176], %226 {strides = array<i32>} : memref<58x128xbf16, #tpu.memory_space<vmem>>, vector<1x128xbf16>,
    } else {
    }
    %c2_i32_107 = arith.constant 2 : i32
    %124 = arith.cmpi eq, %arg1, %c2_i32_107 : i32
    %125 = arith.extui %124 : i1 to i32
    %c0_i32_108 = arith.constant 0 : i32
    %126 = arith.cmpi ne, %125, %c0_i32_108 : i32
    scf.if %126 {
      %c43 = arith.constant 43 : index
      %c0_156 = arith.constant 0 : index
      %182 = vector.load %arg12[%c43, %c0_156] : memref<58x128xbf16, #tpu.memory_space<vmem>>, vector<1x128xbf16>
      %183 = vector.shape_cast %182 : vector<1x128xbf16> to vector<128xbf16>
      %c45_157 = arith.constant 45 : index
      %c0_158 = arith.constant 0 : index
      %184 = vector.load %arg12[%c45_157, %c0_158] : memref<58x128xbf16, #tpu.memory_space<vmem>>, vector<1x128xbf16>
      %185 = vector.shape_cast %184 : vector<1x128xbf16> to vector<128xbf16>
      %186 = vector.shape_cast %183 : vector<128xbf16> to vector<1x128xbf16>
      tpu.vector_store %arg12[%c45_157, %c0_158], %186 {strides = array<i32>} : memref<58x128xbf16, #tpu.memory_space<vmem>>, vector<1x128xbf16>,
      %c42 = arith.constant 42 : index
      %c0_159 = arith.constant 0 : index
      %187 = vector.load %arg12[%c42, %c0_159] : memref<58x128xbf16, #tpu.memory_space<vmem>>, vector<1x128xbf16>
      %188 = vector.shape_cast %187 : vector<1x128xbf16> to vector<128xbf16>
      %c46 = arith.constant 46 : index
      %c0_160 = arith.constant 0 : index
      %189 = vector.load %arg12[%c46, %c0_160] : memref<58x128xbf16, #tpu.memory_space<vmem>>, vector<1x128xbf16>
      %190 = vector.shape_cast %189 : vector<1x128xbf16> to vector<128xbf16>
      %191 = vector.shape_cast %188 : vector<128xbf16> to vector<1x128xbf16>
      tpu.vector_store %arg12[%c46, %c0_160], %191 {strides = array<i32>} : memref<58x128xbf16, #tpu.memory_space<vmem>>, vector<1x128xbf16>,
      %c41 = arith.constant 41 : index
      %c0_161 = arith.constant 0 : index
      %192 = vector.load %arg12[%c41, %c0_161] : memref<58x128xbf16, #tpu.memory_space<vmem>>, vector<1x128xbf16>
      %193 = vector.shape_cast %192 : vector<1x128xbf16> to vector<128xbf16>
      %c47 = arith.constant 47 : index
      %c0_162 = arith.constant 0 : index
      %194 = vector.load %arg12[%c47, %c0_162] : memref<58x128xbf16, #tpu.memory_space<vmem>>, vector<1x128xbf16>
      %195 = vector.shape_cast %194 : vector<1x128xbf16> to vector<128xbf16>
      %196 = vector.shape_cast %193 : vector<128xbf16> to vector<1x128xbf16>
      tpu.vector_store %arg12[%c47, %c0_162], %196 {strides = array<i32>} : memref<58x128xbf16, #tpu.memory_space<vmem>>, vector<1x128xbf16>,
      %c40 = arith.constant 40 : index
      %c0_163 = arith.constant 0 : index
      %197 = vector.load %arg12[%c40, %c0_163] : memref<58x128xbf16, #tpu.memory_space<vmem>>, vector<1x128xbf16>
      %198 = vector.shape_cast %197 : vector<1x128xbf16> to vector<128xbf16>
      %c48 = arith.constant 48 : index
      %c0_164 = arith.constant 0 : index
      %199 = vector.load %arg12[%c48, %c0_164] : memref<58x128xbf16, #tpu.memory_space<vmem>>, vector<1x128xbf16>
      %200 = vector.shape_cast %199 : vector<1x128xbf16> to vector<128xbf16>
      %201 = vector.shape_cast %198 : vector<128xbf16> to vector<1x128xbf16>
      tpu.vector_store %arg12[%c48, %c0_164], %201 {strides = array<i32>} : memref<58x128xbf16, #tpu.memory_space<vmem>>, vector<1x128xbf16>,
      %c39 = arith.constant 39 : index
      %c0_165 = arith.constant 0 : index
      %202 = vector.load %arg12[%c39, %c0_165] : memref<58x128xbf16, #tpu.memory_space<vmem>>, vector<1x128xbf16>
      %203 = vector.shape_cast %202 : vector<1x128xbf16> to vector<128xbf16>
      %c49 = arith.constant 49 : index
      %c0_166 = arith.constant 0 : index
      %204 = vector.load %arg12[%c49, %c0_166] : memref<58x128xbf16, #tpu.memory_space<vmem>>, vector<1x128xbf16>
      %205 = vector.shape_cast %204 : vector<1x128xbf16> to vector<128xbf16>
      %206 = vector.shape_cast %203 : vector<128xbf16> to vector<1x128xbf16>
      tpu.vector_store %arg12[%c49, %c0_166], %206 {strides = array<i32>} : memref<58x128xbf16, #tpu.memory_space<vmem>>, vector<1x128xbf16>,
      %c38 = arith.constant 38 : index
      %c0_167 = arith.constant 0 : index
      %207 = vector.load %arg12[%c38, %c0_167] : memref<58x128xbf16, #tpu.memory_space<vmem>>, vector<1x128xbf16>
      %208 = vector.shape_cast %207 : vector<1x128xbf16> to vector<128xbf16>
      %c50 = arith.constant 50 : index
      %c0_168 = arith.constant 0 : index
      %209 = vector.load %arg12[%c50, %c0_168] : memref<58x128xbf16, #tpu.memory_space<vmem>>, vector<1x128xbf16>
      %210 = vector.shape_cast %209 : vector<1x128xbf16> to vector<128xbf16>
      %211 = vector.shape_cast %208 : vector<128xbf16> to vector<1x128xbf16>
      tpu.vector_store %arg12[%c50, %c0_168], %211 {strides = array<i32>} : memref<58x128xbf16, #tpu.memory_space<vmem>>, vector<1x128xbf16>,
      %c37 = arith.constant 37 : index
      %c0_169 = arith.constant 0 : index
      %212 = vector.load %arg12[%c37, %c0_169] : memref<58x128xbf16, #tpu.memory_space<vmem>>, vector<1x128xbf16>
      %213 = vector.shape_cast %212 : vector<1x128xbf16> to vector<128xbf16>
      %c51 = arith.constant 51 : index
      %c0_170 = arith.constant 0 : index
      %214 = vector.load %arg12[%c51, %c0_170] : memref<58x128xbf16, #tpu.memory_space<vmem>>, vector<1x128xbf16>
      %215 = vector.shape_cast %214 : vector<1x128xbf16> to vector<128xbf16>
      %216 = vector.shape_cast %213 : vector<128xbf16> to vector<1x128xbf16>
      tpu.vector_store %arg12[%c51, %c0_170], %216 {strides = array<i32>} : memref<58x128xbf16, #tpu.memory_space<vmem>>, vector<1x128xbf16>,
      %c36 = arith.constant 36 : index
      %c0_171 = arith.constant 0 : index
      %217 = vector.load %arg12[%c36, %c0_171] : memref<58x128xbf16, #tpu.memory_space<vmem>>, vector<1x128xbf16>
      %218 = vector.shape_cast %217 : vector<1x128xbf16> to vector<128xbf16>
      %c52 = arith.constant 52 : index
      %c0_172 = arith.constant 0 : index
      %219 = vector.load %arg12[%c52, %c0_172] : memref<58x128xbf16, #tpu.memory_space<vmem>>, vector<1x128xbf16>
      %220 = vector.shape_cast %219 : vector<1x128xbf16> to vector<128xbf16>
      %221 = vector.shape_cast %218 : vector<128xbf16> to vector<1x128xbf16>
      tpu.vector_store %arg12[%c52, %c0_172], %221 {strides = array<i32>} : memref<58x128xbf16, #tpu.memory_space<vmem>>, vector<1x128xbf16>,
      %c35 = arith.constant 35 : index
      %c0_173 = arith.constant 0 : index
      %222 = vector.load %arg12[%c35, %c0_173] : memref<58x128xbf16, #tpu.memory_space<vmem>>, vector<1x128xbf16>
      %223 = vector.shape_cast %222 : vector<1x128xbf16> to vector<128xbf16>
      %c53 = arith.constant 53 : index
      %c0_174 = arith.constant 0 : index
      %224 = vector.load %arg12[%c53, %c0_174] : memref<58x128xbf16, #tpu.memory_space<vmem>>, vector<1x128xbf16>
      %225 = vector.shape_cast %224 : vector<1x128xbf16> to vector<128xbf16>
      %226 = vector.shape_cast %223 : vector<128xbf16> to vector<1x128xbf16>
      tpu.vector_store %arg12[%c53, %c0_174], %226 {strides = array<i32>} : memref<58x128xbf16, #tpu.memory_space<vmem>>, vector<1x128xbf16>,
    } else {
    }
    %c4_109 = arith.constant 4 : index
    %c0_110 = arith.constant 0 : index
    %127 = vector.load %arg12[%c4_109, %c0_110] : memref<58x128xbf16, #tpu.memory_space<vmem>>, vector<32x128xbf16>
    %cst_111 = arith.constant 0.000000e+00 : bf16
    %128 = vector.broadcast %cst_111 : bf16 to vector<32x128xbf16>
    %129 = arith.cmpf ogt, %127, %128 : vector<32x128xbf16>
    %cst_112 = arith.constant 2.001950e-01 : bf16
    %130 = vector.broadcast %cst_112 : bf16 to vector<32x128xbf16>
    %131 = arith.mulf %130, %127 : vector<32x128xbf16>
    %132 = arith.select %129, %127, %131 : vector<32x128xi1>, vector<32x128xbf16>
    %c2_113 = arith.constant 2 : index
    %c0_114 = arith.constant 0 : index
    %c0_115 = arith.constant 0 : index
    %c0_116 = arith.constant 0 : index
    %133 = vector.load %arg4[%c2_113, %c0_114, %c0_115, %c0_116] : memref<3x3x128x128xbf16, #tpu.memory_space<vmem>>, vector<1x1x128x128xbf16>
    %134 = vector.shape_cast %133 : vector<1x1x128x128xbf16> to vector<128x128xbf16>
    %cst_117 = arith.constant dense<0.000000e+00> : vector<32x128xf32>
    %135 = tpu.matmul %132, %134, %cst_117 {dimension_numbers = #tpu.dot_dimension_numbers<[1], [0], [0], [1], [0, 0, 1, 1], [], []>} : vector<32x128xbf16>, vector<128x128xbf16>, vector<32x128xf32> -> vector<32x128xf32>
    %c13_118 = arith.constant 13 : index
    %c0_119 = arith.constant 0 : index
    %136 = vector.load %arg12[%c13_118, %c0_119] : memref<58x128xbf16, #tpu.memory_space<vmem>>, vector<32x128xbf16>
    %cst_120 = arith.constant 0.000000e+00 : bf16
    %137 = vector.broadcast %cst_120 : bf16 to vector<32x128xbf16>
    %138 = arith.cmpf ogt, %136, %137 : vector<32x128xbf16>
    %cst_121 = arith.constant 2.001950e-01 : bf16
    %139 = vector.broadcast %cst_121 : bf16 to vector<32x128xbf16>
    %140 = arith.mulf %139, %136 : vector<32x128xbf16>
    %141 = arith.select %138, %136, %140 : vector<32x128xi1>, vector<32x128xbf16>
    %c2_122 = arith.constant 2 : index
    %c1_123 = arith.constant 1 : index
    %c0_124 = arith.constant 0 : index
    %c0_125 = arith.constant 0 : index
    %142 = vector.load %arg4[%c2_122, %c1_123, %c0_124, %c0_125] : memref<3x3x128x128xbf16, #tpu.memory_space<vmem>>, vector<1x1x128x128xbf16>
    %143 = vector.shape_cast %142 : vector<1x1x128x128xbf16> to vector<128x128xbf16>
    %cst_126 = arith.constant dense<0.000000e+00> : vector<32x128xf32>
    %144 = tpu.matmul %141, %143, %cst_126 {dimension_numbers = #tpu.dot_dimension_numbers<[1], [0], [0], [1], [0, 0, 1, 1], [], []>} : vector<32x128xbf16>, vector<128x128xbf16>, vector<32x128xf32> -> vector<32x128xf32>
    %145 = arith.addf %135, %144 : vector<32x128xf32>
    %c22 = arith.constant 22 : index
    %c0_127 = arith.constant 0 : index
    %146 = vector.load %arg12[%c22, %c0_127] : memref<58x128xbf16, #tpu.memory_space<vmem>>, vector<32x128xbf16>
    %cst_128 = arith.constant 0.000000e+00 : bf16
    %147 = vector.broadcast %cst_128 : bf16 to vector<32x128xbf16>
    %148 = arith.cmpf ogt, %146, %147 : vector<32x128xbf16>
    %cst_129 = arith.constant 2.001950e-01 : bf16
    %149 = vector.broadcast %cst_129 : bf16 to vector<32x128xbf16>
    %150 = arith.mulf %149, %146 : vector<32x128xbf16>
    %151 = arith.select %148, %146, %150 : vector<32x128xi1>, vector<32x128xbf16>
    %c2_130 = arith.constant 2 : index
    %c2_131 = arith.constant 2 : index
    %c0_132 = arith.constant 0 : index
    %c0_133 = arith.constant 0 : index
    %152 = vector.load %arg4[%c2_130, %c2_131, %c0_132, %c0_133] : memref<3x3x128x128xbf16, #tpu.memory_space<vmem>>, vector<1x1x128x128xbf16>
    %153 = vector.shape_cast %152 : vector<1x1x128x128xbf16> to vector<128x128xbf16>
    %cst_134 = arith.constant dense<0.000000e+00> : vector<32x128xf32>
    %154 = tpu.matmul %151, %153, %cst_134 {dimension_numbers = #tpu.dot_dimension_numbers<[1], [0], [0], [1], [0, 0, 1, 1], [], []>} : vector<32x128xbf16>, vector<128x128xbf16>, vector<32x128xf32> -> vector<32x128xf32>
    %155 = arith.addf %145, %154 : vector<32x128xf32>
    %c2_135 = arith.constant 2 : index
    %c0_136 = arith.constant 0 : index
    %c0_137 = arith.constant 0 : index
    %156 = vector.load %arg5[%c2_135, %c0_136, %c0_137] : memref<3x1x128xf32, #tpu.memory_space<vmem>>, vector<1x1x128xf32>
    %157 = vector.shape_cast %156 : vector<1x1x128xf32> to vector<1x128xf32>
    %158 = vector.broadcast %157 : vector<1x128xf32> to vector<32x128xf32>
    %159 = arith.addf %155, %158 : vector<32x128xf32>
    %cst_138 = arith.constant 0.000000e+00 : f32
    %160 = vector.broadcast %cst_138 : f32 to vector<32x128xf32>
    %161 = arith.cmpf ogt, %159, %160 : vector<32x128xf32>
    %cst_139 = arith.constant 2.000000e-01 : f32
    %162 = vector.broadcast %cst_139 : f32 to vector<32x128xf32>
    %163 = arith.mulf %162, %159 : vector<32x128xf32>
    %164 = arith.select %161, %159, %163 : vector<32x128xi1>, vector<32x128xf32>
    %165 = arith.truncf %164 : vector<32x128xf32> to vector<32x128xbf16>
    %c13_140 = arith.constant 13 : index
    %c0_141 = arith.constant 0 : index
    %166 = vector.load %arg12[%c13_140, %c0_141] : memref<58x128xbf16, #tpu.memory_space<vmem>>, vector<32x128xbf16>
    %c2_142 = arith.constant 2 : index
    %c0_143 = arith.constant 0 : index
    %c0_144 = arith.constant 0 : index
    %167 = vector.load %arg6[%c2_142, %c0_143, %c0_144] : memref<3x128x128xbf16, #tpu.memory_space<vmem>>, vector<1x128x128xbf16>
    %168 = vector.shape_cast %167 : vector<1x128x128xbf16> to vector<128x128xbf16>
    %cst_145 = arith.constant dense<0.000000e+00> : vector<32x128xf32>
    %169 = tpu.matmul %166, %168, %cst_145 {dimension_numbers = #tpu.dot_dimension_numbers<[1], [0], [0], [1], [0, 0, 1, 1], [], []>} : vector<32x128xbf16>, vector<128x128xbf16>, vector<32x128xf32> -> vector<32x128xf32>
    %c2_146 = arith.constant 2 : index
    %c0_147 = arith.constant 0 : index
    %c0_148 = arith.constant 0 : index
    %170 = vector.load %arg7[%c2_146, %c0_147, %c0_148] : memref<3x128x128xbf16, #tpu.memory_space<vmem>>, vector<1x128x128xbf16>
    %171 = vector.shape_cast %170 : vector<1x128x128xbf16> to vector<128x128xbf16>
    %cst_149 = arith.constant dense<0.000000e+00> : vector<32x128xf32>
    %172 = tpu.matmul %165, %171, %cst_149 {dimension_numbers = #tpu.dot_dimension_numbers<[1], [0], [0], [1], [0, 0, 1, 1], [], []>} : vector<32x128xbf16>, vector<128x128xbf16>, vector<32x128xf32> -> vector<32x128xf32>
    %173 = arith.addf %169, %172 : vector<32x128xf32>
    %c2_150 = arith.constant 2 : index
    %c0_151 = arith.constant 0 : index
    %c0_152 = arith.constant 0 : index
    %174 = vector.load %arg8[%c2_150, %c0_151, %c0_152] : memref<3x1x128xf32, #tpu.memory_space<vmem>>, vector<1x1x128xf32>
    %175 = vector.shape_cast %174 : vector<1x1x128xf32> to vector<1x128xf32>
    %176 = vector.broadcast %175 : vector<1x128xf32> to vector<32x128xf32>
    %177 = arith.addf %173, %176 : vector<32x128xf32>
    %178 = arith.truncf %177 : vector<32x128xf32> to vector<32x128xbf16>
    %c0_153 = arith.constant 0 : index
    %c0_154 = arith.constant 0 : index
    %c0_155 = arith.constant 0 : index
    %179 = vector.load %arg9[%c0_153, %c0_154, %c0_155] : memref<1x32x128xbf16, #tpu.memory_space<vmem>>, vector<1x32x128xbf16>
    %180 = vector.shape_cast %179 : vector<1x32x128xbf16> to vector<32x128xbf16>
    %181 = vector.shape_cast %178 : vector<32x128xbf16> to vector<1x32x128xbf16>
    tpu.vector_store %arg9[%c0_153, %c0_154, %c0_155], %181 {strides = array<i32>} : memref<1x32x128xbf16, #tpu.memory_space<vmem>>, vector<1x32x128xbf16>,
    return
  }
  func.func @transform_0(%arg0: i32, %arg1: i32) -> (i32, i32, i32) {
    %c0_i32 = arith.constant 0 : i32
    %c0_i32_0 = arith.constant 0 : i32
    return %arg0, %arg1, %c0_i32 : i32, i32, i32
  }
  func.func @transform_1(%arg0: i32, %arg1: i32) -> (i32, i32, i32, i32) {
    %c0_i32 = arith.constant 0 : i32
    %c0_i32_0 = arith.constant 0 : i32
    %c0_i32_1 = arith.constant 0 : i32
    return %arg0, %arg1, %c0_i32, %c0_i32_0 : i32, i32, i32, i32
  }
  func.func @transform_2(%arg0: i32, %arg1: i32) -> (i32, i32, i32, i32) {
    %c0_i32 = arith.constant 0 : i32
    %c0_i32_0 = arith.constant 0 : i32
    %c0_i32_1 = arith.constant 0 : i32
    %c0_i32_2 = arith.constant 0 : i32
    %c0_i32_3 = arith.constant 0 : i32
    return %c0_i32, %c0_i32_0, %c0_i32_1, %c0_i32_2 : i32, i32, i32, i32
  }
  func.func @transform_3(%arg0: i32, %arg1: i32) -> (i32, i32, i32) {
    %c0_i32 = arith.constant 0 : i32
    %c0_i32_0 = arith.constant 0 : i32
    %c0_i32_1 = arith.constant 0 : i32
    %c0_i32_2 = arith.constant 0 : i32
    return %c0_i32, %c0_i32_0, %c0_i32_1 : i32, i32, i32
  }
  func.func @transform_4(%arg0: i32, %arg1: i32) -> (i32, i32, i32) {
    %c0_i32 = arith.constant 0 : i32
    %c0_i32_0 = arith.constant 0 : i32
    %c0_i32_1 = arith.constant 0 : i32
    %c0_i32_2 = arith.constant 0 : i32
    return %c0_i32, %c0_i32_0, %c0_i32_1 : i32, i32, i32
  }
  func.func @transform_5(%arg0: i32, %arg1: i32) -> (i32, i32, i32) {
    %c0_i32 = arith.constant 0 : i32
    %c0_i32_0 = arith.constant 0 : i32
    %c0_i32_1 = arith.constant 0 : i32
    %c0_i32_2 = arith.constant 0 : i32
    return %c0_i32, %c0_i32_0, %c0_i32_1 : i32, i32, i32
  }
  func.func @transform_6(%arg0: i32, %arg1: i32) -> (i32, i32, i32) {
    %c0_i32 = arith.constant 0 : i32
    %c0_i32_0 = arith.constant 0 : i32
    %c0_i32_1 = arith.constant 0 : i32
    %c0_i32_2 = arith.constant 0 : i32
    return %c0_i32, %c0_i32_0, %c0_i32_1 : i32, i32, i32
  }
  func.func @transform_7(%arg0: i32, %arg1: i32) -> (i32, i32, i32) {
    %c0_i32 = arith.constant 0 : i32
    %c0_i32_0 = arith.constant 0 : i32
    return %arg0, %arg1, %c0_i32 : i32, i32, i32
  }
}

</mosaic_0001>

<bundles_post_ra>
// kernel: _res_stack_impl.1
= control target key start
LH: loop header
LB: loop body
LE: loop exit
PB: predicated region body
PF: predicated region fallthrough
CT: control target
= control target key end

     0   :  { %12 = vsyncpa [#allocation6], 0  ;;  %s4981_s24 = smov 0   ;;  %s4983_s25 = smov 0   ;;  %s5897_s0 = inlined_call_operand.vmem [shape: bf16[2,96,128], index: 0, kind: input, shape index: {}]   ;;  %s5898_s1 = inlined_call_operand.vmem [shape: bf16[2,3,26,128], index: 1, kind: input, shape index: {}]   ;;  %s5899_s2 = inlined_call_operand.vmem [shape: bf16[3,3,128,128], index: 2, kind: input, shape index: {}]   ;;  %s5900_s3 = inlined_call_operand.vmem [shape: f32[3,1,128], index: 3, kind: input, shape index: {}]   ;;  %s5901_s4 = inlined_call_operand.vmem [shape: bf16[3,128,128], index: 4, kind: input, shape index: {}]   ;;  %s5902_s5 = inlined_call_operand.vmem [shape: bf16[3,128,128], index: 5, kind: input, shape index: {}]   ;;  %s5903_s6 = inlined_call_operand.hbm [shape: f32[3,1,128], index: 6, kind: input, shape index: {}]   ;;  %s5904_s7 = inlined_call_operand.vmem [shape: bf16[2,96,128], index: 7, kind: output, shape index: {}]  }
   0x1   :  { %s4985_s26 = smov 0   ;;  %s4987_s27 = smov 0  }
   0x2   :  { %s4989_s28 = smov 0  }
   0x3 LB: > { %s3698_s29 = sadd.s32 4294967295, %s4936_s28   ;;  %s27_s30 = sadd.s32 1, %s4928_s26  ;;  %s4936_s28 = sphi %s4989_s28, %s18_s28   ;;  %s4932_s27 = sphi %s4987_s27, %s5950_s27   ;;  %s4928_s26 = sphi %s4985_s26, %s5949_s26   ;;  %s4924_s25 = sphi %s4983_s25, %s5948_s25   ;;  %s4920_s24 = sphi %s4981_s24, %s5947_s24  }
   0x4   : > { %p28_p0 = scmp.ge.s32.totalorder %s27_s30, 3  ;;  %s30_s8 = sadd.s32 1, %s4932_s27 }
   0x5   : > { %p3700_p1 = scmp.ge.s32.totalorder %s4936_s28, 1  ;;  %p224_p2 = scmp.lt.s32.totalorder %s4936_s28, 7 }
   0x6   : > { %s5952_s30 = smov (%p28_p0, %s27_s30), 0  ;;  %s5954_s8 = smov (!%p28_p0, %s30_s8), %s4932_s27 }
   0x7   : > { %p5014_p3 = pnand %p3700_p1, %p224_p2  ;;  %p32_p4 = scmp.ge.s32.totalorder %s5954_s8, 2 }
   0x8   : > { %p5018_p5 = scmp.eq.s32.totalorder %s3698_s29, 0  ;;  %s4938_s11 = smov [#allocation5]  }
   0x9   : > { %s5908_s9 = scalar_select %p5014_p3, 1, 0 }
   0xa   : > { %s5909_s10 = scalar_select %p5018_p5, 1, 0 }
   0xb   : > { %p4686_p6 = pneg %p5014_p3  ;;  %s5956_s8 = smov (%p32_p4, %s5954_s8), 0 }
   0xc   : > { %s248_s12 = sshll.u32 %s4938_s11, 4  ;;  %s4866_s16 = scalar_lea.hbm %s5903_s6, 48  ;;  %s249_s12 = int_to_ptr.vmem [resolvable:$true] %s248_s12 }
   0xd   : > { %p5028_p7 = pnand %p5018_p5, %p4686_p6  ;;  %p4867_p8 = scmp.ne.s32.totalorder %s5903_s6, %s4866_s16 }
   0xe   : > { %p4873_p12 = scmp.lt.u32.totalorder %s4866_s16, %s5903_s6 }
   0xf   : > { %p4868_p9 = pneg %p5028_p7 }
  0x11   : > { %p4869_p10 = pnand %p4868_p9, %p4867_p8 }
  0x13   : > { %p4870_p11 = pneg %p4869_p10 }
  0x15   : > { %p4875_p13 = pnand %p4873_p12, %p4870_p11 }
  0x17   : > { %4878 = shalt.err (!%p4875_p13)
}
  0x18   : > { %s4879_s21 = scalar_lea.vmem %s249_s12, 48  ;;  %s4886_s22 = scalar_lea.vmem %s249_s12, 64 }
  0x19   : > { %p4880_p0 = scmp.ne.s32.totalorder %s249_s12, %s4879_s21  ;;  %p4887_p4 = scmp.lt.s32.totalorder %s249_s12, %s249_s12 }
  0x1a   : > { %p4888_p6 = scmp.lt.s32.totalorder %s4886_s22, %s4879_s21 }
  0x1b   : > { %p4882_p1 = pnand %p4880_p0, %p4868_p9 }
  0x1c   : > { %p4889_p5 = por %p4888_p6, %p4887_p4 }
  0x1d   : > { %p4883_p2 = pneg %p4882_p1 }
  0x1f   : > { %p4890_p3 = pnand %p4889_p5, %p4883_p2 }
  0x21   : > { %4893 = shalt.err (!%p4890_p3)
}
  0x22   : > { %s4939_s23 = smov 16   ;;  %s4940_s29 = smov 1  }
  0x23   : > { %4689 = dma.hbm_to_vmem [thread:$0]  (!%p5028_p7), %s5903_s6, 48, %s249_s12, [#allocation6], %s4939_s23, %s4939_s23, %s4940_s29  }
  0x24   : > { %p5911_p8 = scmp.ne.s32.totalorder %s5908_s9, 0 }
  0x25   : > { %p5912_p9 = scmp.ne.s32.totalorder (!%p5911_p8), %s5909_s10, 0 }
  0x26   : > { %289 = sbr.rel (%p5911_p8) target bundleno = 1877 (0x755), region = 48 }
  0x2d   : > { %4915 = dma.done.wait (%p5912_p9), [#allocation6], 48  }
  0x2e   : > { %4917 = vsyncadd (%p5912_p9), [#allocation6], 4294967248  ;;  %s3705_s15 = sshll.u32 %s4920_s24, 2  ;;  %p339_p3 = scmp.lt.s32.totalorder %s4924_s25, 1  ;;  %v4735_v0 = vld [vmem:[%s5899_s2 + $0x40] sm:$0xff]   ;;  %v4736_v1 = vld [vmem:[%s5899_s2 + $0x48] sm:$0xff]  }
  0x2f   : > { %p341_p5 = scmp.lt.s32.totalorder %s3705_s15, 11  ;;  %p350_p10 = scmp.lt.s32.totalorder %s4920_s24, 2  ;;  %4305 = vmatprep.subr.bf16.mxu0 %v4735_v0  ;;  %vm373_vm0 = vsmask.f32 2304  ;;  %vm372_vm1 = vcmask 1042432   ;;  %v4737_v2 = vld [vmem:[%s5899_s2 + $0x50] sm:$0xff]  }
  0x30   : > { %s5958_s25 = smov (!%p339_p3, %s4924_s25), 1  ;;  %4306 = vmatpush3.bf16.msra.mxu0 %v4735_v0  ;;  %vm382_vm2 = vsmask.f32 6416  ;;  %vm5079_vm3 = vmand %vm372_vm1, %vm373_vm0  ;;  %vm429_vm4 = vsmask.f32 7946  ;;  %v4738_v4 = vld [vmem:[%s5899_s2 + $0x58] sm:$0xff]  }
  0x31   : > { %s5960_s15 = smov (!%p341_p5, %s3705_s15), 11  ;;  %s4681_s12 = smul.u32 12, %s5958_s25  ;;  %4307 = vmatprep.subr.bf16.mxu0 %v4736_v1  ;;  %v375_v7 = vld [vmem:[#allocation2 + $0x4] sm:$0x7]  ;;  %vm428_vm5 = vcmask 1043458   ;;  %vm5098_vm6 = vmor %vm373_vm0, %vm382_vm2  ;;  %v4740_v35 = vld [vmem:[%s5899_s2 + $0x68] sm:$0xff]  }
  0x32   : > { %s351_s9 = scalar_select %p350_p10, %s4920_s24, 2  ;;  %v4739_v16 = vld [vmem:[%s5899_s2 + $0x60] sm:$0xff]   ;;  %vm5104_vm7 = vmand %vm428_vm5, %vm429_vm4  ;;  %v437_v38 = vld [vmem:[#allocation2 + $0x14] sm:$0x7]  ;;  %vm533_vm12 = vsmask.f32 7424 }
  0x33   : > { %s344_s13 = sadd.s32 %s4681_s12, %s5960_s15  ;;  %v4741_v48 = vld [vmem:[%s5899_s2 + $0x70] sm:$0xff]   ;;  %v4742_v53 = vld [vmem:[%s5899_s2 + $0x78] sm:$0xff]   ;;  %v4743_v60 = vld [vmem:[%s5899_s2] sm:$0xff]   ;;  %vm822_vm2 = vcmask 1046528   ;;  %p3802_p7 = scmp.ne.s32.totalorder %s4920_s24, 0 }
  0x34   : > { %s3706_s10 = sshll.u32 %s344_s13, 2  ;;  %s3707_s20 = sshll.u32 %s351_s9, 2  ;;  %4308 = vmatpush3.bf16.msra.mxu0 %v4736_v1 }
  0x35   : > { %s354_s21 = sadd.s32 %s4681_s12, %s3707_s20  ;;  %s5068_s29 = scalar_lea.vmem %s5904_s7, %s3706_s10  ;;  %4309 = vmatprep.subr.bf16.mxu0 %v4737_v2 }
  0x36   : > { %s3708_s25 = sshll.u32 %s354_s21, 2  ;;  %s346_s19 = scalar_lea.vmem %s5897_s0, %s3706_s10 }
  0x37   : > { %s5076_s9 = scalar_lea.vmem %s5898_s1, %s3708_s25  ;;  %v378_v9 = vld [vmem:[%s346_s19] sm:$0xf]  ;;  %v379_v10 = vld [vmem:[%s346_s19 + $0x4] sm:$0xf]  ;;  %v380_v11 = vld [vmem:[%s346_s19 + $0x8] sm:$0xf] }
  0x38   : > { %v369_v5 = vld [vmem:[%s5076_s9] sm:$0xf]  ;;  %v370_v6 = vld [vmem:[%s5076_s9 + $0x4] sm:$0x7]  ;;  %v385_v12 = vshrl.u32 %v378_v9, 16  ;;  %v388_v13 = vshll.u32 %v378_v9, 16  ;;  %4310 = vmatpush3.bf16.msra.mxu0 %v4737_v2 }
  0x39   : > { %371 = vst [vmem:[#allocation2] sm:$0xf] %v369_v5  ;;  %v376_v8 = vsel %vm5079_vm3, %v370_v6, %v375_v7  ;;  %v394_v14 = vshrl.u32 %v379_v10, 16  ;;  %v397_v15 = vshll.u32 %v379_v10, 16  ;;  %v404_v17 = vshrl.u32 %v380_v11, 16  ;;  %4311 = vmatprep.subr.bf16.mxu0 %v4738_v4 }
  0x3a   : > { %377 = vst [vmem:[#allocation2 + $0x4] sm:$0x7] %v376_v8  ;;  %v407_v18 = vshll.u32 %v380_v11, 16  ;;  %v387_v19 = vrot.slane %v385_v12, 5  ;;  %v390_v20 = vrot.slane %v388_v13, 6 }
  0x3b   : > { %v396_v21 = vrot.slane %v394_v14, 5  ;;  %v399_v22 = vrot.slane %v397_v15, 6  ;;  %v381_v23 = vld [vmem:[%s346_s19 + $0xc] sm:$0xf]  ;;  %v406_v24 = vrot.slane %v404_v17, 5 }
  0x3c   : > { %v409_v25 = vrot.slane %v407_v18, 6  ;;  %v414_v26 = vshrl.u32 %v381_v23, 16  ;;  %v417_v27 = vshll.u32 %v381_v23, 16  ;;  %v391_v29 = vor.u32 %v390_v20, %v387_v19  ;;  %4312 = vmatpush3.bf16.msra.mxu0 %v4738_v4  ;;  %v441_v49 = vld [vmem:[%s5076_s9 + $0x8] sm:$0xf] }
  0x3d   : > { %v400_v30 = vor.u32 %v399_v22, %v396_v21  ;;  %4313 = vmatprep.subr.bf16.mxu0 %v4739_v16  ;;  %v442_v51 = vld [vmem:[%s5076_s9 + $0xc] sm:$0x1]  ;;  %446 = vst [vmem:[#allocation2 + $0x18] sm:$0xf] %v441_v49  ;;  %v440_v54 = vld [vmem:[%s5076_s9 + $0x4] sm:$0xc] }
  0x3e   : > { %v410_v31 = vor.u32 %v409_v25, %v406_v24  ;;  %v416_v33 = vrot.slane %v414_v26, 5  ;;  %v419_v34 = vrot.slane %v417_v27, 6  ;;  %v392_v36 = vrot.slane %v391_v29, 4  ;;  %447 = vst [vmem:[#allocation2 + $0x1c] sm:$0x1] %v442_v51 }
  0x3f   : > { %v402_v37 = vrot.slane %v400_v30, 4 }
  0x40   : > { %v5111_v40 = vld [vmem:[#allocation2] sm:$0xf]  ;;  %v412_v41 = vrot.slane %v410_v31, 4  ;;  %v420_v42 = vor.u32 %v419_v34, %v416_v33  ;;  %v401_v43 = vsel %vm5098_vm6, %v392_v36, %v400_v30  ;;  %4314 = vmatpush3.bf16.msra.mxu0 %v4739_v16 }
  0x41   : > { %v431_v39 = vld [vmem:[#allocation2 + $0x4] sm:$0xc]  ;;  %v411_v44 = vsel %vm5098_vm6, %v402_v37, %v410_v31  ;;  %434 = vst [vmem:[#allocation2 + $0x8] sm:$0xf] %v401_v43  ;;  %4315 = vmatprep.subr.bf16.mxu0 %v4740_v35  ;;  %v462_v52 = vmul.bf16 1045249613, %v5111_v40 }
  0x42   : > { %v432_v45 = vsel %vm5104_vm7, %v391_v29, %v431_v39  ;;  %435 = vst [vmem:[#allocation2 + $0xc] sm:$0xf] %v411_v44  ;;  %v421_v46 = vsel %vm5098_vm6, %v412_v41, %v420_v42  ;;  %v422_v47 = vrot.slane %v420_v42, 4  ;;  %vm455_vm8 = vcmp.gt.bf16.partialorder %v5111_v40, 0  ;;  %v4745_v43 = vld [vmem:[%s5899_s2 + $0x10] sm:$0xff]  }
  0x43   : > { %433 = vst [vmem:[#allocation2 + $0x4] sm:$0xc] %v432_v45  ;;  %436 = vst [vmem:[#allocation2 + $0x10] sm:$0xf] %v421_v46  ;;  %v469_v58 = vsel %vm455_vm8, %v5111_v40, %v462_v52  ;;  %v4746_v45 = vld [vmem:[%s5899_s2 + $0x18] sm:$0xff]   ;;  %v4747_v46 = vld [vmem:[%s5899_s2 + $0x20] sm:$0xff]  }
  0x44   : > { %v438_v50 = vsel %vm5079_vm3, %v422_v47, %v437_v38  ;;  %4316 = vmatpush3.bf16.msra.mxu0 %v4740_v35  ;;  %v5161_v7 = vld [vmem:[#allocation2 + $0x18] sm:$0xf]  ;;  %v4744_v35 = vld [vmem:[%s5899_s2 + $0x8] sm:$0xff]   ;;  %v798_v49 = vld [vmem:[#allocation2] sm:$0xe] }
  0x45   : > { %439 = vst [vmem:[#allocation2 + $0x14] sm:$0x7] %v438_v50  ;;  %4317 = vmatprep.subr.bf16.mxu0 %v4741_v48  ;;  %v5163_v8 = vld [vmem:[#allocation2 + $0x1c] sm:$0x1]  ;;  %vm461_vm13 = vcmp.gt.bf16.partialorder %v5161_v7, 0  ;;  %v4748_v47 = vld [vmem:[%s5899_s2 + $0x28] sm:$0xff]  }
  0x46   : > { %v468_v10 = vmul.bf16 1045249613, %v5161_v7  ;;  %vm493_vm14 = vcmp.gt.bf16.partialorder %v5163_v8, 0  ;;  %v494_v13 = vmul.bf16 1045249613, %v5163_v8  ;;  %v4750_v50 = vld [vmem:[%s5899_s2 + $0x38] sm:$0xff]  }
  0x47   : > { %v800_v51 = vmul.bf16 1045249613, %v798_v49  ;;  %vm799_vm3 = vcmp.gt.bf16.partialorder %v798_v49, 0  ;;  %v4751_v52 = vld [vmem:[%s5899_s2 + $0x80] sm:$0xff]  }
  0x48   : > { %v5136_v56 = vld [vmem:[#allocation2 + $0x8] sm:$0xf]  ;;  %4318 = vmatpush3.bf16.msra.mxu0 %v4741_v48  ;;  %v5173_v15 = vsel %vm461_vm13, %v5161_v7, %v468_v10  ;;  %v495_v17 = vsel %vm493_vm14, %v5163_v8, %v494_v13  ;;  %v4749_v48 = vld [vmem:[%s5899_s2 + $0x30] sm:$0xff]   ;;  %v4763_v13 = vld [vmem:[%s5902_s5 + $0x20] sm:$0xff]   ;;  %vm1412_vm13 = vcmask 1043456  }
  0x49   : > { %v5138_v57 = vld [vmem:[#allocation2 + $0xc] sm:$0xf]  ;;  %vm457_vm10 = vcmp.gt.bf16.partialorder %v5136_v56, 0  ;;  %4319 = vmatprep.subr.bf16.mxu0 %v4742_v53  ;;  %v464_v61 = vmul.bf16 1045249613, %v5136_v56  ;;  %v5177_v19 = vcombine.low %v5173_v15, %v495_v17  ;;  %v4767_v17 = vld [vmem:[%s5901_s4] sm:$0xff]  }
  0x4a   : > { %v5134_v55 = vld [vmem:[#allocation2 + $0x4] sm:$0xf]  ;;  %vm458_vm11 = vcmp.gt.bf16.partialorder %v5138_v57, 0  ;;  %v465_v62 = vmul.bf16 1045249613, %v5138_v57  ;;  %v4760_v10 = vld [vmem:[%s5902_s5 + $0x8] sm:$0xff]  }
  0x4b   : > { %vm456_vm9 = vcmp.gt.bf16.partialorder %v5134_v55, 0  ;;  %v463_v59 = vmul.bf16 1045249613, %v5134_v55  ;;  %v5150_v63 = vld [vmem:[#allocation2 + $0x10] sm:$0xf]  ;;  %v471_v3 = vsel %vm457_vm10, %v5136_v56, %v464_v61  ;;  %v558_v24 = vshll.u32 %v5177_v19, 16 }
  0x4c   : > { %v443_v1 = vld [vmem:[#allocation2 + $0x14] sm:$0xc]  ;;  %v466_v2 = vmul.bf16 1045249613, %v5150_v63  ;;  %v472_v4 = vsel %vm458_vm11, %v5138_v57, %v465_v62  ;;  %4320 = vmatpush3.bf16.msra.mxu0 %v4742_v53  ;;  %vm459_vm15 = vcmp.gt.bf16.partialorder %v5150_v63, 0  ;;  %v828_v27 = vrot.slane %v5177_v19, 1 }
  0x4d   : > { %v5153_v0 = vsel %vm456_vm9, %v5134_v55, %v463_v59  ;;  %v444_v6 = vsel %vm5104_vm7, %v440_v54, %v443_v1  ;;  %v5165_v9 = vcombine.low %v471_v3, %v472_v4  ;;  %4329 = vmatprep.subr.bf16.mxu0 %v4743_v60  ;;  %v562_v33 = vshrl.u32 %v5177_v19, 16  ;;  %v4752_v54 = vld [vmem:[%s5899_s2 + $0x88] sm:$0xff]   ;;  %v4753_v59 = vld [vmem:[%s5899_s2 + $0x90] sm:$0xff]  }
  0x4e   : > { %v3727_v5 = vcombine.low %v469_v58, %v5153_v0  ;;  %445 = vst [vmem:[#allocation2 + $0x14] sm:$0xc] %v444_v6  ;;  %v473_v26 = vsel %vm459_vm15, %v5150_v63, %v466_v2  ;;  %v560_v37 = vrot.slane %v558_v24, 1  ;;  %v801_v53 = vsel %vm799_vm3, %v798_v49, %v800_v51  ;;  %v4755_v2 = vld [vmem:[%s5899_s2 + $0xa0] sm:$0xff]   ;;  %v4756_v3 = vld [vmem:[%s5899_s2 + $0xa8] sm:$0xff]   ;;  %v4757_v4 = vld [vmem:[%s5899_s2 + $0xb0] sm:$0xff]  }
  0x4f   : > { %v542_v14 = vshll.u32 %v5165_v9, 16  ;;  %v546_v23 = vshrl.u32 %v5165_v9, 16  ;;  %v3764_v58 = vcombine.low %v801_v53, %v5153_v0  ;;  %v824_v61 = vrot.slane %v5165_v9, 1  ;;  %v4754_v0 = vld [vmem:[%s5899_s2 + $0x98] sm:$0xff]  }
  0x50   : > { %v535_v11 = vshrl.u32 %v3727_v5, 16  ;;  %v537_v12 = vshll.u32 %v3727_v5, 16  ;;  %v564_v44 = vor.u32 %v562_v33, %v560_v37  ;;  %v3739_v62 = vcombine.low %v5173_v15, %v5173_v15  ;;  %v4765_v15 = vld [vmem:[%s5902_s5 + $0x30] sm:$0xff]  }
  0x51   : > { %v544_v18 = vrot.slane %v542_v14, 1  ;;  %v4764_v14 = vld [vmem:[%s5902_s5 + $0x28] sm:$0xff]   ;;  %vm1413_vm14 = vsmask.f32 7938  ;;  %vm1339_vm15 = vsmask.f32 256 }
  0x52   : > { %v539_v16 = vrot.slane %v537_v12, 1  ;;  %v4762_v12 = vld [vmem:[%s5902_s5 + $0x18] sm:$0xff]  }
  0x53   : > { %v548_v30 = vor.u32 %v546_v23, %v544_v18 }
  0x54   : > { %v540_v20 = vor.u32 %v539_v16, %v535_v11  ;;  %v4761_v11 = vld [vmem:[%s5902_s5 + $0x10] sm:$0xff]   ;;  %v4766_v16 = vld [vmem:[%s5902_s5 + $0x38] sm:$0xff]  }
  0x55   : > { %v5181_v22 = vld [vmem:[#allocation2 + $0x14] sm:$0xf] }
  0x56   : > { %v545_v21 = vsel %vm533_vm12, %v540_v20, %v544_v18  ;;  %vm460_vm1 = vcmp.gt.bf16.partialorder %v5181_v22, 0  ;;  %v467_v25 = vmul.bf16 1045249613, %v5181_v22 }
  0x57   : > { %4321 = vmatprep.mubr.bf16.mxu0 %v545_v21 }
  0x58   : > { %v474_v28 = vsel %vm460_vm1, %v5181_v22, %v467_v25  ;;  %vm1340_vm1 = vsmask.f32 4368 }
  0x59   : > { %v5190_v29 = vcombine.low %v473_v26, %v474_v28  ;;  %vm5336_vm3 = vmor %vm1339_vm15, %vm1340_vm1 }
  0x5b   : > { %v550_v31 = vshll.u32 %v5190_v29, 16  ;;  %v554_v32 = vshrl.u32 %v5190_v29, 16  ;;  %v826_v34 = vrot.slane %v5190_v29, 1 }
  0x5d   : > { %v552_v36 = vrot.slane %v550_v31, 1  ;;  %v5204_v38 = vsel %vm822_vm2, %v826_v34, %v828_v27  ;;  %v827_v6 = vsel %vm822_vm2, %v824_v61, %v826_v34 }
  0x5f   : > { %v553_v39 = vsel %vm533_vm12, %v548_v30, %v552_v36  ;;  %v556_v41 = vor.u32 %v554_v32, %v552_v36  ;;  %v3773_v30 = vld [vmem:[%s5900_s3] ss:$0 sm:$0xff] }
  0x60   : > { %4322 = vmatmul.mubr.bf16.vlgmr.msra.gmra.mrb[0].mxu0 %v553_v39 }
  0x61   : > { %4330 = vmatpush3.bf16.msra.mxu0 %v4743_v60  ;;  %v561_v42 = vsel %vm533_vm12, %v556_v41, %v560_v37  ;;  %v823_v60 = vrot.slane %v3764_v58, 1 }
  0x62   : > { %4331 = vmatprep.subr.bf16.mxu0 %v4744_v35  ;;  %4325 = vmatprep.mubr.bf16.mxu0 %v561_v42  ;;  %v3782_v42 = vcombine.low %v5111_v40, %v5134_v55 }
  0x63   : > { %v825_v1 = vsel %vm822_vm2, %v823_v60, %v824_v61  ;;  %vm5330_vm2 = vmand %vm1412_vm13, %vm1413_vm14  ;;  %vm1438_vm13 = vcmask (!%p3802_p7), 1042434  }
  0x65   : > { %4332 = vmatpush3.bf16.msra.mxu0 %v4744_v35 }
  0x66   : > { %4333 = vmatprep.subr.bf16.mxu0 %v4745_v43 }
  0x68   : > { %4326 = vmatmul.mubr.bf16.gmra.mrb[4].mxu0 %v564_v44 }
  0x69   : > { %4334 = vmatpush3.bf16.msra.mxu0 %v4745_v43  ;;  %4345 = vmatprep.mubr.bf16.mxu0 %v3727_v5  ;;  %v4758_v5 = vld [vmem:[%s5899_s2 + $0xb8] sm:$0xff]  }
  0x6a   : > { %4335 = vmatprep.subr.bf16.mxu0 %v4746_v45 }
  0x6d   : > { %4336 = vmatpush3.bf16.msra.mxu0 %v4746_v45 }
  0x6e   : > { %4337 = vmatprep.subr.bf16.mxu0 %v4747_v46 }
  0x71   : > { %4338 = vmatpush3.bf16.msra.mxu0 %v4747_v46 }
  0x72   : > { %4339 = vmatprep.subr.bf16.mxu0 %v4748_v47 }
  0x75   : > { %4340 = vmatpush3.bf16.msra.mxu0 %v4748_v47  ;;  %v5297_v47 = vcombine.low %v5136_v56, %v5138_v57 }
  0x76   : > { %4341 = vmatprep.subr.bf16.mxu0 %v4749_v48 }
  0x77   : > { %v1164_v56 = vshll.u32 %v5297_v47, 16 }
  0x79   : > { %4342 = vmatpush3.bf16.msra.mxu0 %v4749_v48 }
  0x7a   : > { %4343 = vmatprep.subr.bf16.mxu0 %v4750_v50 }
  0x7d   : > { %4344 = vmatpush3.bf16.msra.mxu0 %v4750_v50 }
  0x7e   : > { %4353 = vmatprep.subr.bf16.mxu0 %v4751_v52 }
  0x80   : > { %4346 = vmatmul.mubr.bf16.vlgmr.msra.gmra.mrb[0].mxu0 %v5165_v9  ;;  %v4759_v9 = vld [vmem:[%s5902_s5] sm:$0xff]  }
  0x81   : > { %4354 = vmatpush3.bf16.msra.mxu0 %v4751_v52  ;;  %4349 = vmatprep.mubr.bf16.mxu0 %v5190_v29  ;;  %v1159_v52 = vshll.u32 %v3782_v42, 16 }
  0x82   : > { %4355 = vmatprep.subr.bf16.mxu0 %v4752_v54  ;;  %4377 = vmatprep.subr.bf16.mxu1 %v4759_v9 }
  0x83   : > { %4378 = vmatpush3.bf16.msra.mxu1 %v4759_v9 }
  0x84   : > { %4379 = vmatprep.subr.bf16.mxu1 %v4760_v10 }
  0x85   : > { %4356 = vmatpush3.bf16.msra.mxu0 %v4752_v54 }
  0x86   : > { %4357 = vmatprep.subr.bf16.mxu0 %v4753_v59 }
  0x87   : > { %4380 = vmatpush3.bf16.msra.mxu1 %v4760_v10  ;;  %v1166_v10 = vrot.slane %v1164_v56, 1  ;;  %v1415_v56 = vld [vmem:[#allocation3] sm:$0xf] }
  0x88   : > { %4350 = vmatmul.mubr.bf16.gmra.mrb[8].mxu0 %v3739_v62  ;;  %4381 = vmatprep.subr.bf16.mxu1 %v4761_v11 }
  0x89   : > { %4358 = vmatpush3.bf16.msra.mxu0 %v4753_v59  ;;  %4369 = vmatprep.mubr.bf16.mxu0 %v825_v1  ;;  %v4768_v59 = vld [vmem:[%s5901_s4 + $0x8] sm:$0xff]   ;;  %v1161_v1 = vrot.slane %v1159_v52, 1 }
  0x8a   : > { %4359 = vmatprep.subr.bf16.mxu0 %v4754_v0 }
  0x8b   : > { %4382 = vmatpush3.bf16.msra.mxu1 %v4761_v11 }
  0x8c   : > { %4383 = vmatprep.subr.bf16.mxu1 %v4762_v12 }
  0x8d   : > { %4360 = vmatpush3.bf16.msra.mxu0 %v4754_v0  ;;  %v1157_v0 = vshrl.u32 %v3782_v42, 16 }
  0x8e   : > { %4361 = vmatprep.subr.bf16.mxu0 %v4755_v2 }
  0x8f   : > { %4384 = vmatpush3.bf16.msra.mxu1 %v4762_v12  ;;  %v1162_v9 = vor.u32 %v1161_v1, %v1157_v0 }
  0x90   : > { %4385 = vmatprep.subr.bf16.mxu1 %v4763_v13 }
  0x91   : > { %4362 = vmatpush3.bf16.msra.mxu0 %v4755_v2 }
  0x92   : > { %4363 = vmatprep.subr.bf16.mxu0 %v4756_v3 }
  0x93   : > { %4386 = vmatpush3.bf16.msra.mxu1 %v4763_v13 }
  0x94   : > { %4387 = vmatprep.subr.bf16.mxu1 %v4764_v14 }
  0x95   : > { %4364 = vmatpush3.bf16.msra.mxu0 %v4756_v3 }
  0x96   : > { %4365 = vmatprep.subr.bf16.mxu0 %v4757_v4 }
  0x97   : > { %4388 = vmatpush3.bf16.msra.mxu1 %v4764_v14  ;;  %v4770_v14 = vld [vmem:[%s5901_s4 + $0x18] sm:$0xff]  }
  0x98   : > { %4389 = vmatprep.subr.bf16.mxu1 %v4765_v15 }
  0x99   : > { %4366 = vmatpush3.bf16.msra.mxu0 %v4757_v4 }
  0x9a   : > { %4367 = vmatprep.subr.bf16.mxu0 %v4758_v5 }
  0x9b   : > { %4390 = vmatpush3.bf16.msra.mxu1 %v4765_v15 }
  0x9c   : > { %4391 = vmatprep.subr.bf16.mxu1 %v4766_v16 }
  0x9d   : > { %4368 = vmatpush3.bf16.msra.mxu0 %v4758_v5  ;;  %v4769_v5 = vld [vmem:[%s5901_s4 + $0x10] sm:$0xff]  }
  0x9f   : > { %4392 = vmatpush3.bf16.msra.mxu1 %v4766_v16 }
  0xa0   : > { %4370 = vmatmul.mubr.bf16.vlgmr.msra.gmra.mrb[0].mxu0 %v827_v6  ;;  %4401 = vmatprep.subr.bf16.mxu1 %v4767_v17 }
  0xa1   : > { %4373 = vmatprep.mubr.bf16.mxu0 %v5204_v38 }
  0xa8   : > { %4374 = vmatmul.mubr.bf16.gmra.mrb[12].mxu0 %v828_v27 }
 0x13b   : > { %v4327_v18 = vpop.f32.mrb[4].mxu0 }
 0x13c   : > { %v667_v19 = vpop.f32.mrb[5].mxu0 }
 0x13d   : > { %v4328_v20 = vpop.f32.mrb[6].mxu0 }
 0x13e   : > { %v670_v21 = vpop.f32.mrb[7].mxu0  ;;  %v3784_v20 = vcombine.low %v5150_v63, %v5181_v22 }
 0x15b   : > { %v4351_v23 = vpop.f32.mrb[8].mxu0 }
 0x15c   : > { %v793_v24 = vadd.f32 %v4351_v23, %v4327_v18  ;;  %v784_v25 = vpop.f32.mrb[9].mxu0  ;;  %v4771_v18 = vld [vmem:[%s5901_s4 + $0x20] sm:$0xff]   ;;  %v3785_v23 = vcombine.low %v5161_v7, %v5163_v8 }
 0x15d   : > { %v785_v26 = vadd.f32 %v784_v25, %v667_v19  ;;  %v4352_v27 = vpop.f32.mrb[10].mxu0  ;;  %v4772_v19 = vld [vmem:[%s5901_s4 + $0x28] sm:$0xff]   ;;  %v1168_v25 = vshrl.u32 %v5297_v47, 16 }
 0x15e   : > { %v787_v28 = vpop.f32.mrb[11].mxu0  ;;  %v1176_v27 = vshrl.u32 %v3784_v20, 16  ;;  %v1180_v63 = vshll.u32 %v3785_v23, 16 }
 0x15f   : > { %v788_v29 = vadd.f32 %v787_v28, %v670_v21  ;;  %v4773_v21 = vld [vmem:[%s5901_s4 + $0x30] sm:$0xff]   ;;  %v1170_v28 = vor.u32 %v1168_v25, %v1166_v10 }
 0x173   : > { %v4371_v31 = vpop.f32.mrb[0].mxu0 }
 0x174   : > { %v962_v32 = vadd.f32 %v4371_v31, %v3773_v30  ;;  %v916_v33 = vpop.f32.mrb[1].mxu0  ;;  %v1184_v31 = vshrl.u32 %v3785_v23, 16 }
 0x175   : > { %v960_v34 = vadd.f32 %v3773_v30, %v916_v33  ;;  %v4372_v35 = vpop.f32.mrb[2].mxu0 }
 0x176   : > { %v976_v36 = vmul.f32 0.2, %v962_v32  ;;  %v963_v37 = vadd.f32 %v4372_v35, %v3773_v30  ;;  %v919_v38 = vpop.f32.mrb[3].mxu0  ;;  %vm969_vm5 = vcmp.gt.f32.partialorder %v962_v32, 0.0 }
 0x177   : > { %v974_v39 = vmul.f32 0.2, %v960_v34  ;;  %v961_v41 = vadd.f32 %v3773_v30, %v919_v38  ;;  %vm967_vm7 = vcmp.gt.f32.partialorder %v960_v34, 0.0 }
 0x178   : > { %vm970_vm6 = vcmp.gt.f32.partialorder %v963_v37, 0.0  ;;  %v977_v43 = vmul.f32 0.2, %v963_v37  ;;  %v983_v45 = vsel %vm969_vm5, %v962_v32, %v976_v36  ;;  %vm1424_vm5 = vcmask 1040384  }
 0x179   : > { %v975_v44 = vmul.f32 0.2, %v961_v41  ;;  %vm968_vm8 = vcmp.gt.f32.partialorder %v961_v41, 0.0  ;;  %v981_v49 = vsel %vm967_vm7, %v960_v34, %v974_v39  ;;  %vm1448_vm7 = vcmask (!%p3802_p7), 1041409  }
 0x17a   : > { %v984_v46 = vsel %vm970_vm6, %v963_v37, %v977_v43  ;;  %v3794_v37 = vld [vmem:[#allocation5] ss:$0 sm:$0xff]  ;;  %vm5350_vm6 = vmand %vm1424_vm5, %vm1339_vm15  ;;  %vm1481_vm15 = vsmask.f32 (!%p3802_p7), 7950 }
 0x17b   : > { %v4375_v48 = vpop.f32.mrb[12].mxu0  ;;  %v982_v50 = vsel %vm968_vm8, %v961_v41, %v975_v44  ;;  %v989_v51 = vpack.c.bf16 %v984_v46, %v983_v45  ;;  %vm1449_vm8 = vsmask.f32 (!%p3802_p7), 7942 }
 0x17c   : > { %v952_v53 = vadd.f32 %v4375_v48, %v793_v24  ;;  %v932_v54 = vpop.f32.mrb[13].mxu0  ;;  %v988_v58 = vpack.c.bf16 %v982_v50, %v981_v49  ;;  %v1172_v24 = vshll.u32 %v3784_v20, 16 }
 0x17d   : > { %v950_v40 = vadd.f32 %v932_v54, %v785_v26  ;;  %v4376_v55 = vpop.f32.mrb[14].mxu0  ;;  %v4774_v26 = vld [vmem:[%s5901_s4 + $0x38] sm:$0xff]  }
 0x17e   : > { %v966_v60 = vadd.f32 %v3773_v30, %v952_v53  ;;  %v935_v61 = vpop.f32.mrb[15].mxu0  ;;  %4393 = vmatprep.mubr.bf16.mxu1 %v988_v58  ;;  %v1174_v22 = vrot.slane %v1172_v24, 1 }
 0x17f   : > { %v964_v57 = vadd.f32 %v3773_v30, %v950_v40  ;;  %v951_v62 = vadd.f32 %v935_v61, %v788_v29  ;;  %4394 = vmatmul.mubr.bf16.vlgmr.msra.gmra.mrb[0].mxu1 %v989_v51 }
 0x180   : > { %v980_v2 = vmul.f32 0.2, %v966_v60  ;;  %4402 = vmatpush3.bf16.msra.mxu1 %v4767_v17  ;;  %vm973_vm9 = vcmp.gt.f32.partialorder %v966_v60, 0.0  ;;  %v1167_v17 = vsel %vm533_vm12, %v1162_v9, %v1166_v10  ;;  %v1178_v29 = vor.u32 %v1176_v27, %v1174_v22 }
 0x181   : > { %v978_v3 = vmul.f32 0.2, %v964_v57  ;;  %v965_v4 = vadd.f32 %v3773_v30, %v951_v62  ;;  %4403 = vmatprep.subr.bf16.mxu1 %v4768_v59  ;;  %vm971_vm10 = vcmp.gt.f32.partialorder %v964_v57, 0.0  ;;  %v1182_v30 = vrot.slane %v1180_v63, 1 }
 0x182   : > { %v987_v11 = vsel %vm973_vm9, %v966_v60, %v980_v2  ;;  %v1175_v7 = vsel %vm533_vm12, %v1170_v28, %v1174_v22  ;;  %vm5367_vm9 = vmand (!%p3802_p7), %vm1424_vm5, %vm1413_vm14 }
 0x183   : > { %vm972_vm11 = vcmp.gt.f32.partialorder %v965_v4, 0.0  ;;  %v979_v6 = vmul.f32 0.2, %v965_v4  ;;  %v985_v12 = vsel %vm971_vm10, %v964_v57, %v978_v3  ;;  %v991_v16 = vpack.c.bf16 %v987_v11, %v987_v11 }
 0x184   : > { %4404 = vmatpush3.bf16.msra.mxu1 %v4768_v59  ;;  %v1183_v8 = vsel %vm533_vm12, %v1178_v29, %v1182_v30  ;;  %v1186_v32 = vor.u32 %v1184_v31, %v1182_v30  ;;  %vm1480_vm10 = vcmask (!%p3802_p7), 1043459  }
 0x185   : > { %4405 = vmatprep.subr.bf16.mxu1 %v4769_v5  ;;  %v986_v13 = vsel %vm972_vm11, %v965_v4, %v979_v6  ;;  %vm5372_vm11 = vmand (!%p3802_p7), %vm1448_vm7, %vm1449_vm8 }
 0x186   : > { %v990_v15 = vpack.c.bf16 %v986_v13, %v985_v12  ;;  %vm1482_vm1 = vmand (!%p3802_p7), %vm1480_vm10, %vm1481_vm15 }
 0x187   : > { %vm5385_vm8 = vmand (!%p3802_p7), %vm1438_vm13, %vm373_vm0 }
 0x188   : > { %4406 = vmatpush3.bf16.msra.mxu1 %v4769_v5  ;;  %4397 = vmatprep.mubr.bf16.mxu1 %v990_v15 }
 0x189   : > { %4398 = vmatmul.mubr.bf16.gmra.mrb[4].mxu1 %v991_v16  ;;  %4407 = vmatprep.subr.bf16.mxu1 %v4770_v14 }
 0x18a   : > { %4417 = vmatprep.mubr.bf16.mxu1 %v1167_v17 }
 0x18c   : > { %4408 = vmatpush3.bf16.msra.mxu1 %v4770_v14 }
 0x18d   : > { %4409 = vmatprep.subr.bf16.mxu1 %v4771_v18 }
 0x190   : > { %4410 = vmatpush3.bf16.msra.mxu1 %v4771_v18 }
 0x191   : > { %4411 = vmatprep.subr.bf16.mxu1 %v4772_v19 }
 0x194   : > { %4412 = vmatpush3.bf16.msra.mxu1 %v4772_v19 }
 0x195   : > { %4413 = vmatprep.subr.bf16.mxu1 %v4773_v21 }
 0x198   : > { %4414 = vmatpush3.bf16.msra.mxu1 %v4773_v21 }
 0x199   : > { %4415 = vmatprep.subr.bf16.mxu1 %v4774_v26 }
 0x19c   : > { %4416 = vmatpush3.bf16.msra.mxu1 %v4774_v26 }
 0x19f   : > { %4418 = vmatmul.mubr.bf16.vlgmr.msra.gmra.mrb[0].mxu1 %v1175_v7  ;;  %v1426_v7 = vld [vmem:[#allocation3 + $0x1c] sm:$0x1] }
 0x1a0   : > { %4421 = vmatprep.mubr.bf16.mxu1 %v1183_v8 }
 0x1a7   : > { %4422 = vmatmul.mubr.bf16.gmra.mrb[8].mxu1 %v1186_v32 }
 0x25c   : > { %v4399_v33 = vpop.f32.mrb[4].mxu1 }
 0x25d   : > { %v1122_v34 = vpop.f32.mrb[5].mxu1 }
 0x25e   : > { %v4400_v35 = vpop.f32.mrb[6].mxu1 }
 0x25f   : > { %v1125_v36 = vpop.f32.mrb[7].mxu1 }
 0x272   : > { %v4419_v38 = vpop.f32.mrb[0].mxu1 }
 0x273   : > { %v1312_v39 = vadd.f32 %v4419_v38, %v3794_v37  ;;  %v1273_v41 = vpop.f32.mrb[1].mxu1 }
 0x274   : > { %v1310_v42 = vadd.f32 %v3794_v37, %v1273_v41  ;;  %v4420_v43 = vpop.f32.mrb[2].mxu1 }
 0x275   : > { %v4108_v44 = vpack.c.bf16 %v1312_v39, %v1312_v39  ;;  %v1313_v45 = vadd.f32 %v4420_v43, %v3794_v37  ;;  %v1276_v46 = vpop.f32.mrb[3].mxu1 }
 0x276   : > { %v4106_v47 = vpack.c.bf16 %v1310_v42, %v1310_v42  ;;  %v1311_v48 = vadd.f32 %v3794_v37, %v1276_v46 }
 0x277   : > { %v1360_v49 = vshrl.u32 %v4108_v44, 16  ;;  %v4109_v50 = vpack.c.bf16 %v1313_v45, %v1313_v45  ;;  %v1363_v58 = vshll.u32 %v4108_v44, 16 }
 0x278   : > { %v1343_v51 = vshrl.u32 %v4106_v47, 16  ;;  %v4107_v52 = vpack.c.bf16 %v1311_v48, %v1311_v48  ;;  %v1346_v55 = vshll.u32 %v4106_v47, 16 }
 0x279   : > { %v1362_v53 = vrot.slane %v1360_v49, 7  ;;  %v1369_v54 = vshrl.u32 %v4109_v50, 16  ;;  %v1372_v62 = vshll.u32 %v4109_v50, 16 }
 0x27a   : > { %v1345_v40 = vrot.slane %v1343_v51, 7  ;;  %v1351_v59 = vshrl.u32 %v4107_v52, 16  ;;  %v4423_v60 = vpop.f32.mrb[8].mxu1  ;;  %v1354_v0 = vshll.u32 %v4107_v52, 16 }
 0x27b   : > { %v1371_v57 = vrot.slane %v1369_v54, 7  ;;  %v1298_v1 = vadd.f32 %v4423_v60, %v4399_v33  ;;  %v1289_v2 = vpop.f32.mrb[9].mxu1  ;;  %v1365_v3 = vor.u32 %v1363_v58, %v1362_v53  ;;  %v1367_v11 = vrot.slane %v1362_v53, 4 }
 0x27c   : > { %v1348_v4 = vor.u32 %v1346_v55, %v1345_v40  ;;  %v1353_v6 = vrot.slane %v1351_v59, 7  ;;  %v1290_v9 = vadd.f32 %v1289_v2, %v1122_v34  ;;  %v4424_v10 = vpop.f32.mrb[10].mxu1  ;;  %v1349_v12 = vrot.slane %v1345_v40, 4 }
 0x27d   : > { %v1374_v13 = vor.u32 %v1372_v62, %v1371_v57  ;;  %v1316_v14 = vadd.f32 %v3794_v37, %v1298_v1  ;;  %v1292_v15 = vpop.f32.mrb[11].mxu1  ;;  %v1376_v34 = vrot.slane %v1371_v57, 4 }
 0x27e   : > { %v1416_v16 = vsel %vm5330_vm2, %v1348_v4, %v1415_v56  ;;  %v1356_v17 = vor.u32 %v1354_v0, %v1353_v6  ;;  %v1358_v18 = vrot.slane %v1353_v6, 4  ;;  %v1314_v19 = vadd.f32 %v3794_v37, %v1290_v9 }
 0x27f   : > { %1417 = vst [vmem:[#allocation3] sm:$0xf] %v1416_v16  ;;  %v1375_v20 = vsel %vm5336_vm3, %v1367_v11, %v1374_v13  ;;  %v4112_v21 = vpack.c.bf16 %v1316_v14, %v1316_v14  ;;  %v1293_v23 = vadd.f32 %v1292_v15, %v1125_v36  ;;  %vm1458_vm2 = vsmask.f32 (!%p3802_p7), 1280 }
 0x280   : > { %1420 = vst [vmem:[#allocation3 + $0xc] sm:$0xf] %v1375_v20  ;;  %v1357_v24 = vsel %vm5336_vm3, %v1349_v12, %v1356_v17  ;;  %v1366_v25 = vsel %vm5336_vm3, %v1358_v18, %v1365_v3  ;;  %v4110_v26 = vpack.c.bf16 %v1314_v19, %v1314_v19  ;;  %vm5393_vm15 = vmand (!%p3802_p7), %vm1448_vm7, %vm1458_vm2 }
 0x281   : > { %1418 = vst [vmem:[#allocation3 + $0x4] sm:$0xf] %v1357_v24  ;;  %1419 = vst [vmem:[#allocation3 + $0x8] sm:$0xf] %v1366_v25  ;;  %v1396_v27 = vshrl.u32 %v4112_v21, 16  ;;  %v1315_v63 = vadd.f32 %v3794_v37, %v1293_v23  ;;  %v1399_v36 = vshll.u32 %v4112_v21, 16 }
 0x282   : > { %v1378_v22 = vshrl.u32 %v4110_v26, 16  ;;  %v1381_v31 = vshll.u32 %v4110_v26, 16 }
 0x283   : > { %v1398_v28 = vrot.slane %v1396_v27, 7  ;;  %v4111_v29 = vpack.c.bf16 %v1315_v63, %v1315_v63 }
 0x284   : > { %v1380_v8 = vrot.slane %v1378_v22, 7 }
 0x285   : > { %v1403_v32 = vrot.slane %v1398_v28, 4  ;;  %v1387_v33 = vshrl.u32 %v4111_v29, 16  ;;  %v1390_v39 = vshll.u32 %v4111_v29, 16  ;;  %v1401_v42 = vor.u32 %v1399_v36, %v1398_v28 }
 0x286   : > { %v1383_v35 = vor.u32 %v1381_v31, %v1380_v8  ;;  %v1385_v43 = vrot.slane %v1380_v8, 4  ;;  %1432 = sbr.rel (%p3802_p7) target bundleno = 667 (0x29b), region = 56  ;;  %v1483_v59 = vld [vmem:[#allocation3] sm:$0x8] (!%p3802_p7)  ;;  %v1497_v56 = vld [vmem:[#allocation3] sm:$0x4] (!%p3802_p7) }
 0x287   : > { %v1427_v37 = vsel %vm5350_vm6, %v1403_v32, %v1426_v7  ;;  %v1389_v38 = vrot.slane %v1387_v33, 7  ;;  %v1513_v62 = vld [vmem:[#allocation3] sm:$0x2] (!%p3802_p7)  ;;  %v1523_v18 = vld [vmem:[#allocation3 + $0xc] sm:$0x1] (!%p3802_p7) }
 0x288   : > { %1428 = vst [vmem:[#allocation3 + $0x1c] sm:$0x1] %v1427_v37  ;;  %v1384_v41 = vsel %vm5336_vm3, %v1376_v34, %v1383_v35  ;;  %v1443_v48 = vld [vmem:[#allocation3 + $0x4] sm:$0x8] (!%p3802_p7)  ;;  %v1451_v52 = vld [vmem:[#allocation3 + $0x4] sm:$0x2] (!%p3802_p7) }
 0x289   : > { %1421 = vst [vmem:[#allocation3 + $0x10] sm:$0xf] %v1384_v41  ;;  %v1392_v44 = vor.u32 %v1390_v39, %v1389_v38  ;;  %v1394_v45 = vrot.slane %v1389_v38, 4  ;;  %v3804_v50 = vrot.slane (!%p3802_p7), %v1443_v48, 10  ;;  %v1463_v53 = vld [vmem:[#allocation3 + $0x8] sm:$0x1] (!%p3802_p7) }
 0x28a   : > { %v1465_v54 = vld [vmem:[#allocation3 + $0x4] sm:$0x1] (!%p3802_p7)  ;;  %v1476_v55 = vld [vmem:[#allocation3 + $0x8] sm:$0x2] (!%p3802_p7)  ;;  %v1495_v61 = vld [vmem:[#allocation3 + $0x8] sm:$0x4] (!%p3802_p7) }
 0x28b   : > { %v1393_v46 = vsel %vm5336_vm3, %v1385_v43, %v1392_v44  ;;  %v1402_v47 = vsel %vm5336_vm3, %v1394_v45, %v1401_v42  ;;  %v1452_v58 = vsel (!%p3802_p7), %vm5372_vm11, %v3804_v50, %v1451_v52  ;;  %v1466_v40 = vsel (!%p3802_p7), %vm5367_vm9, %v1463_v53, %v1465_v54  ;;  %vm1496_vm3 = vmand (!%p3802_p7), %vm1438_vm13, %vm429_vm4  ;;  %v1508_v57 = vld [vmem:[#allocation3 + $0x8] sm:$0x8] (!%p3802_p7)  ;;  %v1433_v3 = vld [vmem:[#allocation3 + $0x4] sm:$0x8] (!%p3802_p7) }
 0x28c   : > { %1422 = vst [vmem:[#allocation3 + $0x14] sm:$0xf] %v1393_v46  ;;  %1423 = vst [vmem:[#allocation3 + $0x18] sm:$0xf] %v1402_v47  ;;  %v1478_v60 = vrot.slane (!%p3802_p7), %v1476_v55, 6  ;;  %v1498_v1 = vsel (!%p3802_p7), %vm1496_vm3, %v1495_v61, %v1497_v56  ;;  %v3807_v2 = vrot.slane (!%p3802_p7), %v1508_v57, 10 }
 0x28d   : > { %1453 = vst [vmem:[#allocation3 + $0x4] sm:$0x2] %v1452_v58  ;;  %1467 = vst [vmem:[#allocation3 + $0x4] sm:$0x1] %v1466_v40  ;;  %v1440_v5 = vld [vmem:[#allocation3 + $0x4] sm:$0x4] }
 0x28e   : > { %v1484_v0 = vsel %vm1482_vm1, %v1478_v60, %v1483_v59  ;;  %1499 = vst [vmem:[#allocation3] sm:$0x4] %v1498_v1  ;;  %v3803_v6 = vrot.slane %v1433_v3, 9  ;;  %v1454_v9 = vld [vmem:[#allocation3 + $0x8] sm:$0x1]  ;;  %v1514_v11 = vsel %vm5372_vm11, %v3807_v2, %v1513_v62 }
 0x28f   : > { %1485 = vst [vmem:[#allocation3] sm:$0x8] %v1484_v0  ;;  %v1468_v10 = vld [vmem:[#allocation3 + $0x8] sm:$0x2]  ;;  %v1456_v12 = vrot.slane %v1454_v9, 7 }
 0x290   : > { %v3805_v13 = vrot.slane %v1468_v10, 9  ;;  %v1486_v14 = vld [vmem:[#allocation3 + $0x8] sm:$0x4]  ;;  %v1500_v15 = vld [vmem:[#allocation3 + $0x8] sm:$0x8]  ;;  %v1441_v17 = vsel %vm5385_vm8, %v3803_v6, %v1440_v5 }
 0x291   : > { %vm1490_vm13 = vsmask.f32 3328  ;;  %1515 = vst [vmem:[#allocation3] sm:$0x2] %v1514_v11  ;;  %1442 = vst [vmem:[#allocation3 + $0x4] sm:$0x4] %v1441_v17 }
 0x292   : > { %v1516_v19 = vld [vmem:[#allocation3 + $0xc] sm:$0x1]  ;;  %v1524_v20 = vld [vmem:[#allocation3] sm:$0x1]  ;;  %v1488_v24 = vrot.slane %v1486_v14, 7  ;;  %v3806_v25 = vrot.slane %v1500_v15, 9  ;;  %vm1491_vm7 = vmand %vm1480_vm10, %vm1490_vm13 }
 0x293   : > { %v1525_v26 = vsel %vm5367_vm9, %v1523_v18, %v1524_v20  ;;  %v1518_v22 = vrot.slane %v1516_v19, 7 }
 0x294   : > { %v1460_v21 = vld [vmem:[#allocation3 + $0x4] sm:$0x2]  ;;  %v1473_v23 = vld [vmem:[#allocation3 + $0x4] sm:$0x1]  ;;  %1526 = vst [vmem:[#allocation3] sm:$0x1] %v1525_v26 }
 0x295   : > { %v1461_v27 = vsel %vm5393_vm15, %v1456_v12, %v1460_v21  ;;  %v1474_v63 = vsel %vm5350_vm6, %v3805_v13, %v1473_v23  ;;  %v1505_v29 = vld [vmem:[#allocation3] sm:$0x4] }
 0x296   : > { %1462 = vst [vmem:[#allocation3 + $0x4] sm:$0x2] %v1461_v27  ;;  %1475 = vst [vmem:[#allocation3 + $0x4] sm:$0x1] %v1474_v63  ;;  %v1492_v28 = vld [vmem:[#allocation3] sm:$0x8]  ;;  %v1506_v8 = vsel %vm5385_vm8, %v3806_v25, %v1505_v29 }
 0x297   : > { %v1493_v7 = vsel %vm1491_vm7, %v1488_v24, %v1492_v28  ;;  %1507 = vst [vmem:[#allocation3] sm:$0x4] %v1506_v8 }
 0x298   : > { %1494 = vst [vmem:[#allocation3] sm:$0x8] %v1493_v7  ;;  %v1520_v31 = vld [vmem:[#allocation3] sm:$0x2] }
 0x299   : > { %v1521_v32 = vsel %vm5393_vm15, %v1518_v22, %v1520_v31 }
 0x29a   : > { %1522 = vst [vmem:[#allocation3] sm:$0x2] %v1521_v32 }
 0x29b PF: > { %p3808_p11 = scmp.ne.s32.totalorder %s4920_s24, 2 }
 0x29c   : > { %vm1544_vm9 = vcmask (!%p3808_p11), 1043459   ;;  %vm1545_vm10 = vsmask.f32 (!%p3808_p11), 3328  ;;  %vm1577_vm11 = vcmask (!%p3808_p11), 1041409   ;;  %vm1535_vm2 = vcmask (!%p3808_p11), 1042434  }
 0x29d   : > { %1530 = sbr.rel (%p3808_p11) target bundleno = 688 (0x2b0), region = 60  ;;  %vm5414_vm1 = vmand (!%p3808_p11), %vm1544_vm9, %vm1545_vm10  ;;  %vm1578_vm3 = vsmask.f32 (!%p3808_p11), 1280  ;;  %vm1554_vm15 = vsmask.f32 (!%p3808_p11), 7950 }
 0x29e   : > { %v1572_v42 = vld [vmem:[#allocation3 + $0x10] sm:$0x8] (!%p3808_p11)  ;;  %vm1579_vm8 = vmand (!%p3808_p11), %vm1577_vm11, %vm1578_vm3  ;;  %v1593_v45 = vld [vmem:[#allocation3 + $0x10] sm:$0x4] (!%p3808_p11)  ;;  %vm1588_vm3 = vsmask.f32 (!%p3808_p11), 7942 }
 0x29f   : > { %v3810_v44 = vrot.slane (!%p3808_p11), %v1572_v42, 10  ;;  %vm1594_vm13 = vmand (!%p3808_p11), %vm1535_vm2, %vm373_vm0  ;;  %v1605_v47 = vld [vmem:[#allocation3 + $0x10] sm:$0x2] (!%p3808_p11)  ;;  %v1563_v55 = vld [vmem:[#allocation3 + $0x10] sm:$0x8] (!%p3808_p11) }
 0x2a0   : > { %v1607_v51 = vrot.slane (!%p3808_p11), %v1605_v47, 6  ;;  %vm5427_vm7 = vmand (!%p3808_p11), %vm1535_vm2, %vm429_vm4  ;;  %v3809_v61 = vrot.slane (!%p3808_p11), %v1563_v55, 11  ;;  %v1583_v57 = vld [vmem:[#allocation3 + $0x10] sm:$0x4] (!%p3808_p11)  ;;  %v1598_v62 = vld [vmem:[#allocation3 + $0x10] sm:$0x2] (!%p3808_p11) }
 0x2a1   : > { %v1540_v33 = vld [vmem:[#allocation3 + $0x14] sm:$0x2] (!%p3808_p11)  ;;  %v1547_v36 = vld [vmem:[#allocation3 + $0x14] sm:$0x8] (!%p3808_p11)  ;;  %v1559_v37 = vld [vmem:[#allocation3 + $0x14] sm:$0x1] (!%p3808_p11) }
 0x2a2   : > { %v1542_v34 = vrot.slane (!%p3808_p11), %v1540_v33, 6  ;;  %v1560_v38 = vld [vmem:[#allocation3 + $0x18] sm:$0x1] (!%p3808_p11)  ;;  %v1580_v43 = vld [vmem:[#allocation3 + $0x18] sm:$0x2] (!%p3808_p11)  ;;  %vm5435_vm10 = vmand (!%p3808_p11), %vm1424_vm5, %vm1413_vm14  ;;  %v3811_v9 = vrot.slane (!%p3808_p11), %v1583_v57, 9 }
 0x2a3   : > { %v1561_v41 = vsel (!%p3808_p11), %vm5350_vm6, %v1559_v37, %v1560_v38  ;;  %v1595_v46 = vld [vmem:[#allocation3 + $0x18] sm:$0x4] (!%p3808_p11)  ;;  %v1609_v48 = vld [vmem:[#allocation3 + $0x18] sm:$0x8] (!%p3808_p11)  ;;  %v1581_v49 = vsel (!%p3808_p11), %vm1579_vm8, %v3810_v44, %v1580_v43  ;;  %v1531_v52 = vld [vmem:[#allocation3 + $0x14] sm:$0x2] (!%p3808_p11) }
 0x2a4   : > { %v1548_v39 = vsel %vm5414_vm1, %v1542_v34, %v1547_v36  ;;  %1562 = vst [vmem:[#allocation3 + $0x18] sm:$0x1] %v1561_v41  ;;  %v1596_v50 = vsel %vm1594_vm13, %v1593_v45, %v1595_v46  ;;  %v1537_v54 = vld [vmem:[#allocation3 + $0x14] sm:$0x4]  ;;  %1582 = vst [vmem:[#allocation3 + $0x18] sm:$0x2] %v1581_v49  ;;  %v1610_v59 = vsel %vm5414_vm1, %v1607_v51, %v1609_v48 }
 0x2a5   : > { %1549 = vst [vmem:[#allocation3 + $0x14] sm:$0x8] %v1548_v39  ;;  %1597 = vst [vmem:[#allocation3 + $0x18] sm:$0x4] %v1596_v50  ;;  %v1533_v58 = vrot.slane %v1531_v52, 7  ;;  %v1600_v10 = vrot.slane %v1598_v62, 7 }
 0x2a6   : > { %v1550_v40 = vld [vmem:[#allocation3 + $0x14] sm:$0x1]  ;;  %vm5441_vm2 = vmand %vm1544_vm9, %vm1554_vm15  ;;  %1611 = vst [vmem:[#allocation3 + $0x18] sm:$0x8] %v1610_v59  ;;  %v1619_v2 = vld [vmem:[#allocation3 + $0x10] sm:$0x1] }
 0x2a7   : > { %v1552_v60 = vrot.slane %v1550_v40, 5  ;;  %v1538_v1 = vsel %vm5427_vm7, %v1533_v58, %v1537_v54  ;;  %v1612_v3 = vld [vmem:[#allocation3 + $0x10] sm:$0x1]  ;;  %v1620_v4 = vld [vmem:[#allocation3 + $0x1c] sm:$0x1]  ;;  %vm1589_vm9 = vmand %vm1577_vm11, %vm1588_vm3 }
 0x2a8   : > { %1539 = vst [vmem:[#allocation3 + $0x14] sm:$0x4] %v1538_v1  ;;  %v1621_v11 = vsel %vm5350_vm6, %v1619_v2, %v1620_v4  ;;  %v1614_v14 = vrot.slane %v1612_v3, 5 }
 0x2a9   : > { %1622 = vst [vmem:[#allocation3 + $0x1c] sm:$0x1] %v1621_v11 }
 0x2ab   : > { %v1569_v6 = vld [vmem:[#allocation3 + $0x18] sm:$0x1]  ;;  %v1590_v15 = vld [vmem:[#allocation3 + $0x18] sm:$0x2] }
 0x2ac   : > { %v1556_v5 = vld [vmem:[#allocation3 + $0x14] sm:$0x8]  ;;  %v1570_v13 = vsel %vm5435_vm10, %v3809_v61, %v1569_v6  ;;  %v1602_v16 = vld [vmem:[#allocation3 + $0x18] sm:$0x4]  ;;  %v1591_v17 = vsel %vm1589_vm9, %v3811_v9, %v1590_v15 }
 0x2ad   : > { %v1557_v12 = vsel %vm5441_vm2, %v1552_v60, %v1556_v5  ;;  %1571 = vst [vmem:[#allocation3 + $0x18] sm:$0x1] %v1570_v13  ;;  %v1603_v18 = vsel %vm5427_vm7, %v1600_v10, %v1602_v16  ;;  %1592 = vst [vmem:[#allocation3 + $0x18] sm:$0x2] %v1591_v17  ;;  %v1616_v19 = vld [vmem:[#allocation3 + $0x18] sm:$0x8] }
 0x2ae   : > { %1558 = vst [vmem:[#allocation3 + $0x14] sm:$0x8] %v1557_v12  ;;  %1604 = vst [vmem:[#allocation3 + $0x18] sm:$0x4] %v1603_v18  ;;  %v1617_v20 = vsel %vm5441_vm2, %v1614_v14, %v1616_v19 }
 0x2af   : > { %1618 = vst [vmem:[#allocation3 + $0x18] sm:$0x8] %v1617_v20 }
 0x2b0 PF: > { %v4779_v21 = vld [vmem:[%s5899_s2 + $0x100] sm:$0xff]   ;;  %v4780_v23 = vld [vmem:[%s5899_s2 + $0x108] sm:$0xff]   ;;  %v4781_v24 = vld [vmem:[%s5899_s2 + $0x110] sm:$0xff]   ;;  %vm1711_vm1 = vcmask 1045504  }
 0x2b1   : > { %4425 = vmatprep.subr.bf16.mxu1 %v4779_v21  ;;  %v4782_v25 = vld [vmem:[%s5899_s2 + $0x118] sm:$0xff]   ;;  %v1623_v26 = vld [vmem:[#allocation3] sm:$0xf]  ;;  %v5470_v27 = vld [vmem:[#allocation3 + $0x4] sm:$0xf] }
 0x2b2   : > { %4426 = vmatpush3.bf16.msra.mxu1 %v4779_v21  ;;  %v5472_v63 = vld [vmem:[#allocation3 + $0x8] sm:$0xf]  ;;  %v5474_v22 = vld [vmem:[#allocation3 + $0xc] sm:$0xf]  ;;  %vm1631_vm11 = vcmp.gt.bf16.partialorder %v5470_v27, 0  ;;  %v4783_v32 = vld [vmem:[%s5899_s2 + $0x120] sm:$0xff]  }
 0x2b3   : > { %4427 = vmatprep.subr.bf16.mxu1 %v4780_v23  ;;  %vm1632_vm8 = vcmp.gt.bf16.partialorder %v5472_v63, 0  ;;  %vm1633_vm15 = vcmp.gt.bf16.partialorder %v5474_v22, 0  ;;  %v1637_v28 = vmul.bf16 1045249613, %v1623_v26  ;;  %v1638_v29 = vmul.bf16 1045249613, %v5470_v27 }
 0x2b4   : > { %v1639_v7 = vmul.bf16 1045249613, %v5472_v63  ;;  %v1640_v8 = vmul.bf16 1045249613, %v5474_v22  ;;  %v5482_v31 = vld [vmem:[#allocation3] sm:$0xc] }
 0x2b5   : > { %v1645_v33 = vsel %vm1631_vm11, %v5470_v27, %v1638_v29  ;;  %vm1670_vm13 = vcmp.gt.bf16.partialorder %v5482_v31, 0  ;;  %v1672_v34 = vmul.bf16 1045249613, %v5482_v31  ;;  %v5492_v37 = vld [vmem:[#allocation3 + $0x10] sm:$0xf]  ;;  %v4784_v39 = vld [vmem:[%s5899_s2 + $0x128] sm:$0xff]  }
 0x2b6   : > { %4428 = vmatpush3.bf16.msra.mxu1 %v4780_v23  ;;  %v1646_v35 = vsel %vm1632_vm8, %v5472_v63, %v1639_v7  ;;  %v1647_v36 = vsel %vm1633_vm15, %v5474_v22, %v1640_v8  ;;  %v5494_v38 = vld [vmem:[#allocation3 + $0x14] sm:$0xf]  ;;  %vm1634_vm7 = vcmp.gt.bf16.partialorder %v5492_v37, 0  ;;  %v1641_v44 = vmul.bf16 1045249613, %v5492_v37  ;;  %v4786_v55 = vld [vmem:[%s5899_s2 + $0x138] sm:$0xff]  }
 0x2b7   : > { %4429 = vmatprep.subr.bf16.mxu1 %v4781_v24  ;;  %v1674_v41 = vsel %vm1670_vm13, %v5482_v31, %v1672_v34  ;;  %v5500_v42 = vcombine.low %v1646_v35, %v1647_v36  ;;  %v1642_v45 = vmul.bf16 1045249613, %v5494_v38  ;;  %vm1635_vm10 = vcmp.gt.bf16.partialorder %v5494_v38, 0  ;;  %v5510_v51 = vld [vmem:[#allocation3 + $0x18] sm:$0x7]  ;;  %v4785_v52 = vld [vmem:[%s5899_s2 + $0x130] sm:$0xff]  }
 0x2b8   : > { %v3844_v43 = vcombine.low %v1674_v41, %v1645_v33  ;;  %vm1630_vm2 = vcmp.gt.bf16.partialorder %v1623_v26, 0  ;;  %v1648_v49 = vsel %vm1634_vm7, %v5492_v37, %v1641_v44  ;;  %vm1671_vm3 = vcmp.gt.bf16.partialorder %v5510_v51, 0  ;;  %v4787_v61 = vld [vmem:[%s5899_s2 + $0xc0] sm:$0xff]   ;;  %v4788_v1 = vld [vmem:[%s5899_s2 + $0xc8] sm:$0xff]   ;;  %v4789_v6 = vld [vmem:[%s5899_s2 + $0xd0] sm:$0xff]  }
 0x2b9   : > { %v1713_v46 = vrot.slane %v5500_v42, 2  ;;  %v1649_v50 = vsel %vm1635_vm10, %v5494_v38, %v1642_v45  ;;  %v1673_v53 = vmul.bf16 1045249613, %v5510_v51  ;;  %v1644_v54 = vsel %vm1630_vm2, %v1623_v26, %v1637_v28  ;;  %v1629_v11 = vld [vmem:[#allocation3 + $0x18] sm:$0x3]  ;;  %v4791_v20 = vld [vmem:[%s5899_s2 + $0xe0] sm:$0xff]  }
 0x2ba   : > { %4430 = vmatpush3.bf16.msra.mxu1 %v4781_v24  ;;  %v1712_v47 = vrot.slane %v3844_v43, 2  ;;  %v5517_v58 = vcombine.low %v1648_v49, %v1649_v50  ;;  %v3856_v59 = vcombine.low %v1644_v54, %v1645_v33  ;;  %v1849_v5 = vshll.u32 %v5500_v42, 16  ;;  %v1988_v12 = vld [vmem:[#allocation3] sm:$0x8]  ;;  %v1989_v13 = vld [vmem:[#allocation3 + $0x4] sm:$0xf] }
 0x2bb   : > { %4431 = vmatprep.subr.bf16.mxu1 %v4782_v25  ;;  %v1675_v40 = vsel %vm1671_vm3, %v5510_v51, %v1673_v53  ;;  %v1990_v14 = vld [vmem:[#allocation3 + $0x8] sm:$0xf]  ;;  %v1991_v15 = vld [vmem:[#allocation3 + $0xc] sm:$0xf]  ;;  %v4790_v16 = vld [vmem:[%s5899_s2 + $0xd8] sm:$0xff]   ;;  %vm1636_vm9 = vcmp.gt.bf16.partialorder %v1629_v11, 0 }
 0x2bc   : > { %v1714_v48 = vsel %vm1711_vm1, %v1712_v47, %v1713_v46  ;;  %v3847_v60 = vcombine.low %v1675_v40, %v1675_v40  ;;  %v1715_v56 = vrot.slane %v5517_v58, 2  ;;  %v1844_v62 = vshll.u32 %v3856_v59, 16  ;;  %v4792_v24 = vld [vmem:[%s5899_s2 + $0xe8] sm:$0xff]   ;;  %v4793_v29 = vld [vmem:[%s5899_s2 + $0xf0] sm:$0xff]   ;;  %v4794_v41 = vld [vmem:[%s5899_s2 + $0xf8] sm:$0xff]  }
 0x2bd   : > { %4441 = vmatprep.mubr.bf16.mxu1 %v1714_v48  ;;  %v1842_v3 = vshrl.u32 %v3856_v59, 16  ;;  %v1851_v10 = vrot.slane %v1849_v5, 1  ;;  %v1857_v18 = vshll.u32 %v5517_v58, 16  ;;  %v1643_v19 = vmul.bf16 1045249613, %v1629_v11  ;;  %v4796_v40 = vld [vmem:[%s5899_s2 + $0x148] sm:$0xff]  }
 0x2be   : > { %4432 = vmatpush3.bf16.msra.mxu1 %v4782_v25  ;;  %v1717_v57 = vrot.slane %v3847_v60, 2  ;;  %v1716_v0 = vsel %vm1711_vm1, %v1713_v46, %v1715_v56  ;;  %v1846_v4 = vrot.slane %v1844_v62, 1  ;;  %vm1996_vm11 = vcmp.gt.bf16.partialorder %v1988_v12, 0  ;;  %v1995_v5 = vld [vmem:[#allocation3 + $0x1c] sm:$0x1] }
 0x2bf   : > { %4433 = vmatprep.subr.bf16.mxu1 %v4783_v32  ;;  %vm1997_vm8 = vcmp.gt.bf16.partialorder %v1989_v13, 0  ;;  %vm1998_vm15 = vcmp.gt.bf16.partialorder %v1990_v14, 0  ;;  %vm1999_vm13 = vcmp.gt.bf16.partialorder %v1991_v15, 0  ;;  %v2004_v21 = vmul.bf16 1045249613, %v1988_v12 }
 0x2c0   : > { %v1718_v2 = vsel %vm1711_vm1, %v1715_v56, %v1717_v57  ;;  %v1847_v9 = vor.u32 %v1846_v4, %v1842_v3  ;;  %v2005_v23 = vmul.bf16 1045249613, %v1989_v13  ;;  %v2006_v25 = vmul.bf16 1045249613, %v1990_v14  ;;  %v1994_v4 = vld [vmem:[#allocation3 + $0x18] sm:$0xf] }
 0x2c1   : > { %v1650_v26 = vsel %vm1636_vm9, %v1629_v11, %v1643_v19  ;;  %v2007_v28 = vmul.bf16 1045249613, %v1991_v15  ;;  %v2012_v8 = vsel %vm1996_vm11, %v1988_v12, %v2004_v21  ;;  %v1853_v35 = vshrl.u32 %v5500_v42, 16  ;;  %v4795_v42 = vld [vmem:[%s5899_s2 + $0x140] sm:$0xff]  }
 0x2c2   : > { %4434 = vmatpush3.bf16.msra.mxu1 %v4783_v32  ;;  %v1852_v17 = vsel %vm533_vm12, %v1847_v9, %v1851_v10  ;;  %v3857_v7 = vcombine.low %v1650_v26, %v1650_v26  ;;  %v2013_v32 = vsel %vm1997_vm8, %v1989_v13, %v2005_v23  ;;  %v2014_v33 = vsel %vm1998_vm15, %v1990_v14, %v2006_v25  ;;  %v4799_v14 = vld [vmem:[%s5899_s2 + $0x160] sm:$0xff]   ;;  %v4801_v25 = vld [vmem:[%s5899_s2 + $0x170] sm:$0xff]  }
 0x2c3   : > { %4435 = vmatprep.subr.bf16.mxu1 %v4784_v39  ;;  %v2015_v34 = vsel %vm1999_vm13, %v1991_v15, %v2007_v28  ;;  %v1861_v36 = vshrl.u32 %v5517_v58, 16  ;;  %v3882_v43 = vcombine.low %v2012_v8, %v2013_v32  ;;  %v1859_v45 = vrot.slane %v1857_v18, 1  ;;  %v4802_v8 = vld [vmem:[%s5899_s2 + $0x178] sm:$0xff]  }
 0x2c4   : > { %v3883_v44 = vcombine.low %v2014_v33, %v2015_v34  ;;  %v1855_v46 = vor.u32 %v1853_v35, %v1851_v10  ;;  %v1869_v56 = vshrl.u32 %v3857_v7, 16  ;;  %v2010_v12 = vmul.bf16 1045249613, %v1994_v4 }
 0x2c5   : > { %v1863_v47 = vor.u32 %v1861_v36, %v1859_v45  ;;  %v2059_v49 = vshrl.u32 %v3882_v43, 16  ;;  %v2062_v50 = vshll.u32 %v3882_v43, 16  ;;  %v2011_v13 = vmul.bf16 1045249613, %v1995_v5  ;;  %v4804_v43 = vld [vmem:[%s5902_s5 + $0x48] sm:$0xff]  }
 0x2c6   : > { %4436 = vmatpush3.bf16.msra.mxu1 %v4784_v39  ;;  %v1865_v39 = vshll.u32 %v3857_v7, 16  ;;  %v2070_v53 = vshll.u32 %v3883_v44, 16  ;;  %v1860_v54 = vsel %vm533_vm12, %v1855_v46, %v1859_v45  ;;  %vm2002_vm2 = vcmp.gt.bf16.partialorder %v1994_v4, 0  ;;  %v4806_v45 = vld [vmem:[%s5902_s5 + $0x58] sm:$0xff]   ;;  %v4807_v46 = vld [vmem:[%s5902_s5 + $0x60] sm:$0xff]  }
 0x2c7   : > { %4437 = vmatprep.subr.bf16.mxu1 %v4785_v52  ;;  %v2064_v59 = vrot.slane %v2062_v50, 4  ;;  %vm2003_vm3 = vcmp.gt.bf16.partialorder %v1995_v5, 0 }
 0x2c8   : > { %v1867_v48 = vrot.slane %v1865_v39, 1  ;;  %v2019_v18 = vsel %vm2003_vm3, %v1995_v5, %v2011_v13 }
 0x2ca   : > { %4438 = vmatpush3.bf16.msra.mxu1 %v4785_v52  ;;  %v2067_v52 = vshrl.u32 %v3883_v44, 16  ;;  %v1868_v58 = vsel %vm533_vm12, %v1863_v47, %v1867_v48  ;;  %vm2057_vm12 = vsmask.f32 4352  ;;  %v1871_v3 = vor.u32 %v1869_v56, %v1867_v48  ;;  %v4805_v44 = vld [vmem:[%s5902_s5 + $0x50] sm:$0xff]   ;;  %v4808_v47 = vld [vmem:[%s5902_s5 + $0x68] sm:$0xff]  }
 0x2cb   : > { %4439 = vmatprep.subr.bf16.mxu1 %v4786_v55  ;;  %v4809_v48 = vld [vmem:[%s5902_s5 + $0x70] sm:$0xff]  }
 0x2cc   : > { %v2069_v60 = vrot.slane %v2067_v52, 3 }
 0x2ce   : > { %4440 = vmatpush3.bf16.msra.mxu1 %v4786_v55  ;;  %v2061_v55 = vrot.slane %v2059_v49, 3  ;;  %v4811_v49 = vld [vmem:[%s5901_s4 + $0x40] sm:$0xff]  }
 0x2cf   : > { %4449 = vmatprep.subr.bf16.mxu1 %v4787_v61 }
 0x2d0   : > { %v2065_v62 = vor.u32 %v2064_v59, %v2061_v55 }
 0x2d1   : > { %4442 = vmatmul.mubr.bf16.vlgmr.msra.gmra.mrb[12].mxu1 %v1716_v0 }
 0x2d2   : > { %4450 = vmatpush3.bf16.msra.mxu1 %v4787_v61  ;;  %4445 = vmatprep.mubr.bf16.mxu1 %v1718_v2  ;;  %v2072_v61 = vrot.slane %v2070_v53, 4  ;;  %v1993_v2 = vld [vmem:[#allocation3 + $0x14] sm:$0xf] }
 0x2d3   : > { %4451 = vmatprep.subr.bf16.mxu1 %v4788_v1  ;;  %v2009_v11 = vmul.bf16 1045249613, %v1993_v2  ;;  %vm2001_vm10 = vcmp.gt.bf16.partialorder %v1993_v2, 0 }
 0x2d4   : > { %v2073_v0 = vor.u32 %v2072_v61, %v2069_v60 }
 0x2d6   : > { %4452 = vmatpush3.bf16.msra.mxu1 %v4788_v1  ;;  %v1992_v1 = vld [vmem:[#allocation3 + $0x10] sm:$0xf]  ;;  %v2074_v9 = vsel %vm2057_vm12, %v2065_v62, %v2073_v0 }
 0x2d7   : > { %4453 = vmatprep.subr.bf16.mxu1 %v4789_v6  ;;  %v2008_v10 = vmul.bf16 1045249613, %v1992_v1  ;;  %vm2000_vm7 = vcmp.gt.bf16.partialorder %v1992_v1, 0 }
 0x2d9   : > { %4446 = vmatmul.mubr.bf16.gmra.mrb[16].mxu1 %v1717_v57  ;;  %v4797_v57 = vld [vmem:[%s5899_s2 + $0x150] sm:$0xff]   ;;  %v2016_v15 = vsel %vm2000_vm7, %v1992_v1, %v2008_v10 }
 0x2da   : > { %4454 = vmatpush3.bf16.msra.mxu1 %v4789_v6  ;;  %4465 = vmatprep.mubr.bf16.mxu1 %v1852_v17  ;;  %v4798_v6 = vld [vmem:[%s5899_s2 + $0x158] sm:$0xff]   ;;  %v2018_v17 = vsel %vm2002_vm2, %v1994_v4, %v2010_v12  ;;  %vm2581_vm2 = vcmask 1045508  }
 0x2db   : > { %4455 = vmatprep.subr.bf16.mxu1 %v4790_v16  ;;  %v3885_v21 = vcombine.low %v2018_v17, %v2019_v18 }
 0x2dd   : > { %v2085_v26 = vshrl.u32 %v3885_v21, 16  ;;  %v2088_v28 = vshll.u32 %v3885_v21, 16 }
 0x2de   : > { %4456 = vmatpush3.bf16.msra.mxu1 %v4790_v16  ;;  %v2017_v16 = vsel %vm2001_vm10, %v1993_v2, %v2009_v11  ;;  %vm2580_vm10 = vcmask 1041408  }
 0x2df   : > { %4457 = vmatprep.subr.bf16.mxu1 %v4791_v20  ;;  %v3884_v19 = vcombine.low %v2016_v15, %v2017_v16  ;;  %v2087_v32 = vrot.slane %v2085_v26, 3  ;;  %v2090_v33 = vrot.slane %v2088_v28, 4  ;;  %vm5651_vm3 = vmor %vm2580_vm10, %vm2581_vm2  ;;  %vm2644_vm2 = vsmask.f32 (!%p3802_p7), 1280 }
 0x2e1   : > { %v2076_v23 = vshrl.u32 %v3884_v19, 16  ;;  %v2091_v35 = vor.u32 %v2090_v33, %v2087_v32  ;;  %v3937_v32 = vcombine.low %v5472_v63, %v5474_v22  ;;  %v4814_v22 = vld [vmem:[%s5901_s4 + $0x58] sm:$0xff]  }
 0x2e2   : > { %4458 = vmatpush3.bf16.msra.mxu1 %v4791_v20  ;;  %v4800_v20 = vld [vmem:[%s5899_s2 + $0x168] sm:$0xff]  }
 0x2e3   : > { %4459 = vmatprep.subr.bf16.mxu1 %v4792_v24 }
 0x2e6   : > { %4460 = vmatpush3.bf16.msra.mxu1 %v4792_v24  ;;  %v2079_v24 = vshll.u32 %v3884_v19, 16 }
 0x2e7   : > { %4461 = vmatprep.subr.bf16.mxu1 %v4793_v29 }
 0x2e8   : > { %v2081_v7 = vrot.slane %v2079_v24, 4 }
 0x2ea   : > { %4462 = vmatpush3.bf16.msra.mxu1 %v4793_v29  ;;  %v2078_v29 = vrot.slane %v2076_v23, 3 }
 0x2eb   : > { %4463 = vmatprep.subr.bf16.mxu1 %v4794_v41 }
 0x2ec   : > { %v2082_v34 = vor.u32 %v2081_v7, %v2078_v29 }
 0x2ee   : > { %4464 = vmatpush3.bf16.msra.mxu1 %v4794_v41  ;;  %v2083_v36 = vsel %vm2057_vm12, %v2073_v0, %v2082_v34  ;;  %v2092_v39 = vsel %vm2057_vm12, %v2082_v34, %v2091_v35  ;;  %v4803_v41 = vld [vmem:[%s5902_s5 + $0x40] sm:$0xff]  }
 0x2ef   : > { %4473 = vmatprep.subr.bf16.mxu1 %v4795_v42  ;;  %4497 = vmatprep.subr.bf16.mxu0 %v4803_v41 }
 0x2f0   : > { %4498 = vmatpush3.bf16.msra.mxu0 %v4803_v41 }
 0x2f1   : > { %4466 = vmatmul.mubr.bf16.vlgmr.msra.gmra.mrb[12].mxu1 %v1860_v54  ;;  %4499 = vmatprep.subr.bf16.mxu0 %v4804_v43 }
 0x2f2   : > { %4474 = vmatpush3.bf16.msra.mxu1 %v4795_v42  ;;  %4469 = vmatprep.mubr.bf16.mxu1 %v1868_v58  ;;  %v4810_v42 = vld [vmem:[%s5902_s5 + $0x78] sm:$0xff]  }
 0x2f3   : > { %4475 = vmatprep.subr.bf16.mxu1 %v4796_v40 }
 0x2f4   : > { %4500 = vmatpush3.bf16.msra.mxu0 %v4804_v43  ;;  %v2421_v43 = vrot.slane %v3937_v32, 2 }
 0x2f5   : > { %4501 = vmatprep.subr.bf16.mxu0 %v4805_v44 }
 0x2f6   : > { %4476 = vmatpush3.bf16.msra.mxu1 %v4796_v40 }
 0x2f7   : > { %4477 = vmatprep.subr.bf16.mxu1 %v4797_v57 }
 0x2f8   : > { %4502 = vmatpush3.bf16.msra.mxu0 %v4805_v44 }
 0x2f9   : > { %4470 = vmatmul.mubr.bf16.gmra.mrb[20].mxu1 %v1871_v3  ;;  %4503 = vmatprep.subr.bf16.mxu0 %v4806_v45 }
 0x2fa   : > { %4478 = vmatpush3.bf16.msra.mxu1 %v4797_v57  ;;  %4489 = vmatprep.mubr.bf16.mxu1 %v2074_v9  ;;  %v3895_v57 = vld [vmem:[%s5900_s3 + $0x1] ss:$0 sm:$0xff] }
 0x2fb   : > { %4479 = vmatprep.subr.bf16.mxu1 %v4798_v6 }
 0x2fc   : > { %4504 = vmatpush3.bf16.msra.mxu0 %v4806_v45 }
 0x2fd   : > { %4505 = vmatprep.subr.bf16.mxu0 %v4807_v46 }
 0x2fe   : > { %4480 = vmatpush3.bf16.msra.mxu1 %v4798_v6 }
 0x2ff   : > { %4481 = vmatprep.subr.bf16.mxu1 %v4799_v14 }
 0x300   : > { %4506 = vmatpush3.bf16.msra.mxu0 %v4807_v46 }
 0x301   : > { %4507 = vmatprep.subr.bf16.mxu0 %v4808_v47 }
 0x302   : > { %4482 = vmatpush3.bf16.msra.mxu1 %v4799_v14 }
 0x303   : > { %4483 = vmatprep.subr.bf16.mxu1 %v4800_v20 }
 0x304   : > { %4508 = vmatpush3.bf16.msra.mxu0 %v4808_v47  ;;  %v4815_v47 = vld [vmem:[%s5901_s4 + $0x60] sm:$0xff]  }
 0x305   : > { %4509 = vmatprep.subr.bf16.mxu0 %v4809_v48 }
 0x306   : > { %4484 = vmatpush3.bf16.msra.mxu1 %v4800_v20 }
 0x307   : > { %4485 = vmatprep.subr.bf16.mxu1 %v4801_v25 }
 0x308   : > { %4510 = vmatpush3.bf16.msra.mxu0 %v4809_v48  ;;  %v4816_v48 = vld [vmem:[%s5901_s4 + $0x68] sm:$0xff]  }
 0x309   : > { %4511 = vmatprep.subr.bf16.mxu0 %v4810_v42 }
 0x30a   : > { %4486 = vmatpush3.bf16.msra.mxu1 %v4801_v25  ;;  %v4812_v25 = vld [vmem:[%s5901_s4 + $0x48] sm:$0xff]  }
 0x30b   : > { %4487 = vmatprep.subr.bf16.mxu1 %v4802_v8 }
 0x30c   : > { %4512 = vmatpush3.bf16.msra.mxu0 %v4810_v42  ;;  %v4817_v42 = vld [vmem:[%s5901_s4 + $0x70] sm:$0xff]  }
 0x30d   : > { %4521 = vmatprep.subr.bf16.mxu0 %v4811_v49 }
 0x30e   : > { %4488 = vmatpush3.bf16.msra.mxu1 %v4802_v8  ;;  %v3936_v8 = vcombine.low %v5482_v31, %v5470_v27 }
 0x310   : > { %v2420_v41 = vrot.slane %v3936_v8, 2 }
 0x311   : > { %4490 = vmatmul.mubr.bf16.vlgmr.msra.gmra.mrb[12].mxu1 %v2083_v36  ;;  %v4813_v36 = vld [vmem:[%s5901_s4 + $0x50] sm:$0xff]  }
 0x312   : > { %4493 = vmatprep.mubr.bf16.mxu1 %v2092_v39  ;;  %v2422_v46 = vsel %vm1711_vm1, %v2420_v41, %v2421_v43 }
 0x319   : > { %4494 = vmatmul.mubr.bf16.gmra.mrb[24].mxu1 %v2091_v35 }
 0x3ac   : > { %v4447_v50 = vpop.f32.mrb[16].mxu1 }
 0x3ad   : > { %v1821_v52 = vpop.f32.mrb[17].mxu1 }
 0x3ae   : > { %v4448_v53 = vpop.f32.mrb[18].mxu1 }
 0x3af   : > { %v1824_v54 = vpop.f32.mrb[19].mxu1 }
 0x3cc   : > { %v4471_v58 = vpop.f32.mrb[20].mxu1 }
 0x3cd   : > { %v1983_v40 = vadd.f32 %v4471_v58, %v4447_v50  ;;  %v1974_v55 = vpop.f32.mrb[21].mxu1  ;;  %v4818_v50 = vld [vmem:[%s5901_s4 + $0x78] sm:$0xff]  }
 0x3ce   : > { %v1975_v59 = vadd.f32 %v1974_v55, %v1821_v52  ;;  %v4472_v60 = vpop.f32.mrb[22].mxu1  ;;  %v3939_v52 = vcombine.low %v5510_v51, %v5510_v51 }
 0x3cf   : > { %v1977_v61 = vpop.f32.mrb[23].mxu1  ;;  %v3948_v60 = vld [vmem:[#allocation5 + $0x1] ss:$0 sm:$0xff] }
 0x3d0   : > { %v1978_v56 = vadd.f32 %v1977_v61, %v1824_v54  ;;  %v2425_v54 = vrot.slane %v3939_v52, 2 }
 0x3e4   : > { %v4491_v62 = vpop.f32.mrb[12].mxu1 }
 0x3e5   : > { %v2226_v0 = vadd.f32 %v4491_v62, %v3895_v57  ;;  %v2179_v1 = vpop.f32.mrb[13].mxu1 }
 0x3e6   : > { %v2224_v2 = vadd.f32 %v3895_v57, %v2179_v1  ;;  %v4492_v3 = vpop.f32.mrb[14].mxu1 }
 0x3e7   : > { %v2240_v4 = vmul.f32 0.2, %v2226_v0  ;;  %v2227_v5 = vadd.f32 %v4492_v3, %v3895_v57  ;;  %v2182_v6 = vpop.f32.mrb[15].mxu1  ;;  %vm2233_vm9 = vcmp.gt.f32.partialorder %v2226_v0, 0.0 }
 0x3e8   : > { %v2238_v9 = vmul.f32 0.2, %v2224_v2  ;;  %v2225_v10 = vadd.f32 %v3895_v57, %v2182_v6  ;;  %vm2231_vm8 = vcmp.gt.f32.partialorder %v2224_v2, 0.0 }
 0x3e9   : > { %vm2234_vm11 = vcmp.gt.f32.partialorder %v2227_v5, 0.0  ;;  %v2241_v11 = vmul.f32 0.2, %v2227_v5  ;;  %v2247_v13 = vsel %vm2233_vm9, %v2226_v0, %v2240_v4  ;;  %vm2634_vm9 = vcmask (!%p3802_p7), 1041409  }
 0x3ea   : > { %v2239_v12 = vmul.f32 0.2, %v2225_v10  ;;  %vm2232_vm15 = vcmp.gt.f32.partialorder %v2225_v10, 0.0  ;;  %v2245_v16 = vsel %vm2231_vm8, %v2224_v2, %v2238_v9  ;;  %vm2650_vm8 = vmand (!%p3802_p7), %vm1424_vm5, %vm1413_vm14 }
 0x3eb   : > { %v2248_v14 = vsel %vm2234_vm11, %v2227_v5, %v2241_v11  ;;  %vm2635_vm11 = vsmask.f32 (!%p3802_p7), 7942 }
 0x3ec   : > { %v4495_v15 = vpop.f32.mrb[24].mxu1  ;;  %v2246_v17 = vsel %vm2232_vm15, %v2225_v10, %v2239_v12  ;;  %v2253_v18 = vpack.c.bf16 %v2248_v14, %v2247_v13  ;;  %vm2666_vm15 = vcmask (!%p3802_p7), 1043459  }
 0x3ed   : > { %v2215_v19 = vadd.f32 %v4495_v15, %v1983_v40  ;;  %v2195_v20 = vpop.f32.mrb[25].mxu1  ;;  %v2252_v21 = vpack.c.bf16 %v2246_v17, %v2245_v16 }
 0x3ee   : > { %v2213_v23 = vadd.f32 %v2195_v20, %v1975_v59  ;;  %v4496_v24 = vpop.f32.mrb[26].mxu1 }
 0x3ef   : > { %v2230_v26 = vadd.f32 %v3895_v57, %v2215_v19  ;;  %v2198_v28 = vpop.f32.mrb[27].mxu1  ;;  %4513 = vmatprep.mubr.bf16.mxu0 %v2252_v21 }
 0x3f0   : > { %v2228_v29 = vadd.f32 %v3895_v57, %v2213_v23  ;;  %v2214_v7 = vadd.f32 %v2198_v28, %v1978_v56  ;;  %4514 = vmatmul.mubr.bf16.vlgmr.msra.gmra.mrb[16].mxu0 %v2253_v18 }
 0x3f1   : > { %v2244_v33 = vmul.f32 0.2, %v2230_v26  ;;  %4522 = vmatpush3.bf16.msra.mxu0 %v4811_v49  ;;  %vm2237_vm13 = vcmp.gt.f32.partialorder %v2230_v26, 0.0  ;;  %v3938_v49 = vcombine.low %v5492_v37, %v5494_v38 }
 0x3f2   : > { %v2242_v34 = vmul.f32 0.2, %v2228_v29  ;;  %v2229_v35 = vadd.f32 %v3895_v57, %v2214_v7  ;;  %4523 = vmatprep.subr.bf16.mxu0 %v4812_v25  ;;  %vm2235_vm12 = vcmp.gt.f32.partialorder %v2228_v29, 0.0 }
 0x3f3   : > { %v2251_v27 = vsel %vm2237_vm13, %v2230_v26, %v2244_v33  ;;  %v2423_v53 = vrot.slane %v3938_v49, 2  ;;  %vm2636_vm13 = vmand (!%p3802_p7), %vm2634_vm9, %vm2635_vm11 }
 0x3f4   : > { %vm2236_vm7 = vcmp.gt.f32.partialorder %v2229_v35, 0.0  ;;  %v2243_v39 = vmul.f32 0.2, %v2229_v35  ;;  %v2249_v31 = vsel %vm2235_vm12, %v2228_v29, %v2242_v34  ;;  %v2255_v45 = vpack.c.bf16 %v2251_v27, %v2251_v27 }
 0x3f5   : > { %4524 = vmatpush3.bf16.msra.mxu0 %v4812_v25  ;;  %v2424_v58 = vsel %vm1711_vm1, %v2421_v43, %v2423_v53  ;;  %v2426_v40 = vsel %vm1711_vm1, %v2423_v53, %v2425_v54  ;;  %vm2624_vm12 = vcmask (!%p3802_p7), 1042434  }
 0x3f6   : > { %4525 = vmatprep.subr.bf16.mxu0 %v4813_v36  ;;  %v2250_v63 = vsel %vm2236_vm7, %v2229_v35, %v2243_v39  ;;  %vm2667_vm7 = vsmask.f32 (!%p3802_p7), 7950  ;;  %vm5677_vm11 = vmand (!%p3802_p7), %vm2624_vm12, %vm373_vm0 }
 0x3f7   : > { %v2254_v44 = vpack.c.bf16 %v2250_v63, %v2249_v31  ;;  %vm2668_vm10 = vmand (!%p3802_p7), %vm2666_vm15, %vm2667_vm7 }
 0x3f9   : > { %4526 = vmatpush3.bf16.msra.mxu0 %v4813_v36  ;;  %4517 = vmatprep.mubr.bf16.mxu0 %v2254_v44 }
 0x3fa   : > { %4518 = vmatmul.mubr.bf16.gmra.mrb[20].mxu0 %v2255_v45  ;;  %4527 = vmatprep.subr.bf16.mxu0 %v4814_v22 }
 0x3fb   : > { %4537 = vmatprep.mubr.bf16.mxu0 %v2422_v46 }
 0x3fd   : > { %4528 = vmatpush3.bf16.msra.mxu0 %v4814_v22 }
 0x3fe   : > { %4529 = vmatprep.subr.bf16.mxu0 %v4815_v47 }
 0x401   : > { %4530 = vmatpush3.bf16.msra.mxu0 %v4815_v47 }
 0x402   : > { %4531 = vmatprep.subr.bf16.mxu0 %v4816_v48 }
 0x405   : > { %4532 = vmatpush3.bf16.msra.mxu0 %v4816_v48 }
 0x406   : > { %4533 = vmatprep.subr.bf16.mxu0 %v4817_v42 }
 0x409   : > { %4534 = vmatpush3.bf16.msra.mxu0 %v4817_v42 }
 0x40a   : > { %4535 = vmatprep.subr.bf16.mxu0 %v4818_v50 }
 0x40d   : > { %4536 = vmatpush3.bf16.msra.mxu0 %v4818_v50 }
 0x410   : > { %4538 = vmatmul.mubr.bf16.vlgmr.msra.gmra.mrb[16].mxu0 %v2424_v58 }
 0x411   : > { %4541 = vmatprep.mubr.bf16.mxu0 %v2426_v40 }
 0x418   : > { %4542 = vmatmul.mubr.bf16.gmra.mrb[24].mxu0 %v2425_v54 }
 0x4cd   : > { %v4519_v37 = vpop.f32.mrb[20].mxu0 }
 0x4ce   : > { %v2388_v38 = vpop.f32.mrb[21].mxu0 }
 0x4cf   : > { %v4520_v55 = vpop.f32.mrb[22].mxu0 }
 0x4d0   : > { %v2391_v59 = vpop.f32.mrb[23].mxu0 }
 0x4e3   : > { %v4539_v61 = vpop.f32.mrb[16].mxu0 }
 0x4e4   : > { %v2553_v56 = vadd.f32 %v4539_v61, %v3948_v60  ;;  %v2513_v51 = vpop.f32.mrb[17].mxu0 }
 0x4e5   : > { %v2551_v57 = vadd.f32 %v3948_v60, %v2513_v51  ;;  %v4540_v62 = vpop.f32.mrb[18].mxu0 }
 0x4e6   : > { %v4115_v0 = vpack.c.bf16 %v2553_v56, %v2553_v56  ;;  %v2554_v1 = vadd.f32 %v4540_v62, %v3948_v60  ;;  %v2516_v2 = vpop.f32.mrb[19].mxu0 }
 0x4e7   : > { %v4113_v3 = vpack.c.bf16 %v2551_v57, %v2551_v57  ;;  %v2552_v4 = vadd.f32 %v3948_v60, %v2516_v2 }
 0x4e8   : > { %v2588_v5 = vrot.slane %v4115_v0, 6  ;;  %v4116_v6 = vpack.c.bf16 %v2554_v1, %v2554_v1 }
 0x4e9   : > { %v2583_v9 = vrot.slane %v4113_v3, 6  ;;  %v4114_v11 = vpack.c.bf16 %v2552_v4, %v2552_v4 }
 0x4ea   : > { %v2590_v12 = vrot.slane %v2588_v5, 4  ;;  %v2591_v13 = vrot.slane %v4116_v6, 6 }
 0x4eb   : > { %v2584_v14 = vrot.slane %v2583_v9, 4  ;;  %2609 = vst [vmem:[#allocation4] sm:$0xc] %v2583_v9  ;;  %v2585_v15 = vrot.slane %v4114_v11, 6  ;;  %v4543_v16 = vpop.f32.mrb[24].mxu0 }
 0x4ec   : > { %v2592_v17 = vsel %vm5651_vm3, %v2590_v12, %v2591_v13  ;;  %v2538_v18 = vadd.f32 %v4543_v16, %v4519_v37  ;;  %v2529_v19 = vpop.f32.mrb[25].mxu0  ;;  %v2593_v33 = vrot.slane %v2591_v13, 4 }
 0x4ed   : > { %2612 = vst [vmem:[#allocation4 + $0xc] sm:$0xf] %v2592_v17  ;;  %v2586_v20 = vsel %vm5651_vm3, %v2584_v14, %v2585_v15  ;;  %v2587_v21 = vrot.slane %v2585_v15, 4  ;;  %v2530_v23 = vadd.f32 %v2529_v19, %v2388_v38  ;;  %v4544_v24 = vpop.f32.mrb[26].mxu0 }
 0x4ee   : > { %2610 = vst [vmem:[#allocation4 + $0x4] sm:$0xf] %v2586_v20  ;;  %v2532_v25 = vpop.f32.mrb[27].mxu0  ;;  %v2557_v28 = vadd.f32 %v3948_v60, %v2538_v18 }
 0x4ef   : > { %v2589_v26 = vsel %vm5651_vm3, %v2587_v21, %v2588_v5  ;;  %v2555_v29 = vadd.f32 %v3948_v60, %v2530_v23  ;;  %v2533_v7 = vadd.f32 %v2532_v25, %v2391_v59 }
 0x4f0   : > { %2611 = vst [vmem:[#allocation4 + $0x8] sm:$0xf] %v2589_v26  ;;  %v4119_v34 = vpack.c.bf16 %v2557_v28, %v2557_v28 }
 0x4f1   : > { %v4117_v8 = vpack.c.bf16 %v2555_v29, %v2555_v29  ;;  %v2556_v32 = vadd.f32 %v3948_v60, %v2533_v7 }
 0x4f2   : > { %v2600_v27 = vrot.slane %v4119_v34, 6  ;;  %v2669_v52 = vld [vmem:[#allocation4] sm:$0x8] (!%p3802_p7)  ;;  %v2683_v58 = vld [vmem:[#allocation4] sm:$0x4] (!%p3802_p7) }
 0x4f3   : > { %v2594_v35 = vrot.slane %v4117_v8, 6  ;;  %v4118_v36 = vpack.c.bf16 %v2556_v32, %v2556_v32 }
 0x4f4   : > { %2618 = sbr.rel (%p3802_p7) target bundleno = 1286 (0x506), region = 64 }
 0x4f5   : > { %v2595_v39 = vsel %vm5651_vm3, %v2593_v33, %v2594_v35  ;;  %v2596_v41 = vrot.slane %v2594_v35, 4  ;;  %v2597_v43 = vrot.slane %v4118_v36, 6  ;;  %v2629_v44 = vld [vmem:[#allocation4 + $0x4] sm:$0x8] (!%p3802_p7)  ;;  %v2637_v46 = vld [vmem:[#allocation4 + $0x4] sm:$0x2] (!%p3802_p7) }
 0x4f6   : > { %2613 = vst [vmem:[#allocation4 + $0x10] sm:$0xf] %v2595_v39  ;;  %v3958_v45 = vrot.slane (!%p3802_p7), %v2629_v44, 10  ;;  %v2651_v48 = vld [vmem:[#allocation4 + $0x4] sm:$0x1] (!%p3802_p7) }
 0x4f7   : > { %v2598_v31 = vsel %vm5651_vm3, %v2596_v41, %v2597_v43  ;;  %v2599_v63 = vrot.slane %v2597_v43, 4  ;;  %v2649_v47 = vld [vmem:[#allocation4 + $0x8] sm:$0x1] (!%p3802_p7)  ;;  %v2662_v50 = vld [vmem:[#allocation4 + $0x8] sm:$0x2] (!%p3802_p7) }
 0x4f8   : > { %2614 = vst [vmem:[#allocation4 + $0x14] sm:$0xf] %v2598_v31  ;;  %v2638_v42 = vsel (!%p3802_p7), %vm2636_vm13, %v3958_v45, %v2637_v46  ;;  %v2652_v49 = vsel (!%p3802_p7), %vm2650_vm8, %v2649_v47, %v2651_v48  ;;  %v2664_v53 = vrot.slane (!%p3802_p7), %v2662_v50, 6  ;;  %v2681_v54 = vld [vmem:[#allocation4 + $0x8] sm:$0x4] (!%p3802_p7)  ;;  %vm2645_vm8 = vmand (!%p3802_p7), %vm2634_vm9, %vm2644_vm2 }
 0x4f9   : > { %v2601_v22 = vsel %vm5651_vm3, %v2599_v63, %v2600_v27  ;;  %2639 = vst [vmem:[#allocation4 + $0x4] sm:$0x2] (!%p3802_p7), %v2638_v42  ;;  %2653 = vst [vmem:[#allocation4 + $0x4] sm:$0x1] (!%p3802_p7), %v2652_v49  ;;  %v2619_v40 = vld [vmem:[#allocation4 + $0x4] sm:$0x8] (!%p3802_p7) }
 0x4fa   : > { %2615 = vst [vmem:[#allocation4 + $0x18] sm:$0x7] %v2601_v22  ;;  %vm2682_vm3 = vmand (!%p3802_p7), %vm2624_vm12, %vm429_vm4  ;;  %v2626_v37 = vld [vmem:[#allocation4 + $0x4] sm:$0x4] (!%p3802_p7)  ;;  %v2670_v38 = vsel (!%p3802_p7), %vm2668_vm10, %v2664_v53, %v2669_v52  ;;  %v3957_v59 = vrot.slane (!%p3802_p7), %v2619_v40, 9 }
 0x4fb   : > { %v2684_v55 = vsel %vm2682_vm3, %v2681_v54, %v2683_v58  ;;  %v2640_v61 = vld [vmem:[#allocation4 + $0x8] sm:$0x1]  ;;  %v2654_v56 = vld [vmem:[#allocation4 + $0x8] sm:$0x2]  ;;  %2671 = vst [vmem:[#allocation4] sm:$0x8] %v2670_v38 }
 0x4fc   : > { %2685 = vst [vmem:[#allocation4] sm:$0x4] %v2684_v55  ;;  %v2627_v51 = vsel %vm5677_vm11, %v3957_v59, %v2626_v37  ;;  %v2642_v57 = vrot.slane %v2640_v61, 7  ;;  %v3959_v62 = vrot.slane %v2654_v56, 9  ;;  %v2672_v0 = vld [vmem:[#allocation4 + $0x8] sm:$0x4] }
 0x4fd   : > { %v2686_v1 = vld [vmem:[#allocation4 + $0x8] sm:$0x8]  ;;  %vm2676_vm13 = vsmask.f32 3328  ;;  %2628 = vst [vmem:[#allocation4 + $0x4] sm:$0x4] %v2627_v51 }
 0x4fe   : > { %v2674_v4 = vrot.slane %v2672_v0, 7  ;;  %v3960_v5 = vrot.slane %v2686_v1, 9  ;;  %vm2677_vm12 = vmand %vm2666_vm15, %vm2676_vm13 }
 0x500   : > { %v2646_v2 = vld [vmem:[#allocation4 + $0x4] sm:$0x2]  ;;  %v2659_v3 = vld [vmem:[#allocation4 + $0x4] sm:$0x1] }
 0x501   : > { %v2647_v6 = vsel %vm2645_vm8, %v2642_v57, %v2646_v2  ;;  %v2660_v9 = vsel %vm5350_vm6, %v3959_v62, %v2659_v3 }
 0x502   : > { %2648 = vst [vmem:[#allocation4 + $0x4] sm:$0x2] %v2647_v6  ;;  %2661 = vst [vmem:[#allocation4 + $0x4] sm:$0x1] %v2660_v9  ;;  %v2678_v10 = vld [vmem:[#allocation4] sm:$0x8] }
 0x503   : > { %v2691_v11 = vld [vmem:[#allocation4] sm:$0x4]  ;;  %v2679_v12 = vsel %vm2677_vm12, %v2674_v4, %v2678_v10 }
 0x504   : > { %v2692_v13 = vsel %vm5677_vm11, %v3960_v5, %v2691_v11  ;;  %2680 = vst [vmem:[#allocation4] sm:$0x8] %v2679_v12 }
 0x505   : > { %2693 = vst [vmem:[#allocation4] sm:$0x4] %v2692_v13 }
 0x506 PF: > { %2696 = sbr.rel (%p3808_p11) target bundleno = 1305 (0x519), region = 68  ;;  %vm2710_vm9 = vcmask (!%p3808_p11), 1043459   ;;  %vm2711_vm15 = vsmask.f32 (!%p3808_p11), 3328  ;;  %vm2743_vm7 = vcmask (!%p3808_p11), 1041409   ;;  %vm2701_vm2 = vcmask (!%p3808_p11), 1042434  }
 0x507   : > { %vm2712_vm10 = vmand (!%p3808_p11), %vm2710_vm9, %vm2711_vm15  ;;  %vm2744_vm3 = vsmask.f32 (!%p3808_p11), 1280  ;;  %vm2720_vm8 = vsmask.f32 (!%p3808_p11), 7950  ;;  %vm2754_vm12 = vsmask.f32 (!%p3808_p11), 7942 }
 0x508   : > { %v2738_v21 = vld [vmem:[#allocation4 + $0x10] sm:$0x8] (!%p3808_p11)  ;;  %vm2745_vm11 = vmand (!%p3808_p11), %vm2743_vm7, %vm2744_vm3  ;;  %v2759_v25 = vld [vmem:[#allocation4 + $0x10] sm:$0x4] (!%p3808_p11) }
 0x509   : > { %v3963_v24 = vrot.slane (!%p3808_p11), %v2738_v21, 10  ;;  %vm2760_vm13 = vmand (!%p3808_p11), %vm2701_vm2, %vm373_vm0  ;;  %v2729_v34 = vld [vmem:[#allocation4 + $0x10] sm:$0x8] (!%p3808_p11)  ;;  %v2749_v41 = vld [vmem:[#allocation4 + $0x10] sm:$0x4] (!%p3808_p11) }
 0x50a   : > { %v2706_v14 = vld [vmem:[#allocation4 + $0x14] sm:$0x2] (!%p3808_p11)  ;;  %v2713_v16 = vld [vmem:[#allocation4 + $0x14] sm:$0x8] (!%p3808_p11)  ;;  %v2725_v17 = vld [vmem:[#allocation4 + $0x14] sm:$0x1] (!%p3808_p11) }
 0x50b   : > { %v2708_v15 = vrot.slane (!%p3808_p11), %v2706_v14, 6  ;;  %v2697_v28 = vld [vmem:[#allocation4 + $0x14] sm:$0x2] (!%p3808_p11)  ;;  %v2703_v29 = vld [vmem:[#allocation4 + $0x14] sm:$0x4] (!%p3808_p11)  ;;  %v3962_v39 = vrot.slane (!%p3808_p11), %v2729_v34, 11  ;;  %vm2734_vm0 = vmand (!%p3808_p11), %vm1424_vm5, %vm1413_vm14 }
 0x50c   : > { %v2726_v18 = vld [vmem:[#allocation4 + $0x18] sm:$0x1] (!%p3808_p11)  ;;  %v2746_v23 = vld [vmem:[#allocation4 + $0x18] sm:$0x2] (!%p3808_p11)  ;;  %v2761_v26 = vld [vmem:[#allocation4 + $0x18] sm:$0x4] (!%p3808_p11) }
 0x50d   : > { %v2714_v19 = vsel %vm2712_vm10, %v2708_v15, %v2713_v16  ;;  %v2727_v20 = vsel %vm5350_vm6, %v2725_v17, %v2726_v18  ;;  %v2747_v7 = vsel %vm2745_vm11, %v3963_v24, %v2746_v23  ;;  %v2762_v8 = vsel %vm2760_vm13, %v2759_v25, %v2761_v26  ;;  %vm5700_vm6 = vmand %vm2701_vm2, %vm429_vm4  ;;  %v2716_v33 = vld [vmem:[#allocation4 + $0x14] sm:$0x1]  ;;  %v2764_v43 = vld [vmem:[#allocation4 + $0x10] sm:$0x2] }
 0x50e   : > { %2715 = vst [vmem:[#allocation4 + $0x14] sm:$0x8] %v2714_v19  ;;  %2728 = vst [vmem:[#allocation4 + $0x18] sm:$0x1] %v2727_v20  ;;  %v2699_v32 = vrot.slane %v2697_v28, 7  ;;  %v2718_v36 = vrot.slane %v2716_v33, 5 }
 0x50f   : > { %2748 = vst [vmem:[#allocation4 + $0x18] sm:$0x2] %v2747_v7  ;;  %2763 = vst [vmem:[#allocation4 + $0x18] sm:$0x4] %v2762_v8  ;;  %v3964_v63 = vrot.slane %v2749_v41, 9  ;;  %v2766_v22 = vrot.slane %v2764_v43, 7 }
 0x510   : > { %v2704_v35 = vsel %vm5700_vm6, %v2699_v32, %v2703_v29  ;;  %vm2721_vm4 = vmand %vm2710_vm9, %vm2720_vm8 }
 0x511   : > { %2705 = vst [vmem:[#allocation4 + $0x14] sm:$0x4] %v2704_v35  ;;  %vm2755_vm15 = vmand %vm2743_vm7, %vm2754_vm12 }
 0x515   : > { %v2722_v27 = vld [vmem:[#allocation4 + $0x14] sm:$0x8]  ;;  %v2735_v31 = vld [vmem:[#allocation4 + $0x18] sm:$0x1] }
 0x516   : > { %v2723_v44 = vsel %vm2721_vm4, %v2718_v36, %v2722_v27  ;;  %v2736_v45 = vsel %vm2734_vm0, %v3962_v39, %v2735_v31  ;;  %v2756_v46 = vld [vmem:[#allocation4 + $0x18] sm:$0x2]  ;;  %v2768_v47 = vld [vmem:[#allocation4 + $0x18] sm:$0x4] }
 0x517   : > { %2724 = vst [vmem:[#allocation4 + $0x14] sm:$0x8] %v2723_v44  ;;  %2737 = vst [vmem:[#allocation4 + $0x18] sm:$0x1] %v2736_v45  ;;  %v2757_v48 = vsel %vm2755_vm15, %v3964_v63, %v2756_v46  ;;  %v2769_v42 = vsel %vm5700_vm6, %v2766_v22, %v2768_v47 }
 0x518   : > { %2758 = vst [vmem:[#allocation4 + $0x18] sm:$0x2] %v2757_v48  ;;  %2770 = vst [vmem:[#allocation4 + $0x18] sm:$0x4] %v2769_v42 }
 0x519 PF: > { %v4823_v49 = vld [vmem:[%s5899_s2 + $0x1c0] sm:$0xff]   ;;  %v4824_v50 = vld [vmem:[%s5899_s2 + $0x1c8] sm:$0xff]   ;;  %v4825_v52 = vld [vmem:[%s5899_s2 + $0x1d0] sm:$0xff]   ;;  %vm2850_vm2 = vsmask.f32 5376  ;;  %vm3139_vm12 = vcmask 1044480  }
 0x51a   : > { %4545 = vmatprep.subr.bf16.mxu0 %v4823_v49  ;;  %v4826_v53 = vld [vmem:[%s5899_s2 + $0x1d8] sm:$0xff]   ;;  %v5725_v54 = vld [vmem:[#allocation4 + $0x8] sm:$0xf]  ;;  %v5727_v58 = vld [vmem:[#allocation4 + $0xc] sm:$0xf] }
 0x51b   : > { %4546 = vmatpush3.bf16.msra.mxu0 %v4823_v49  ;;  %v5729_v40 = vld [vmem:[#allocation4 + $0x4] sm:$0xc]  ;;  %vm2778_vm14 = vcmp.gt.bf16.partialorder %v5725_v54, 0  ;;  %vm2779_vm5 = vcmp.gt.bf16.partialorder %v5727_v58, 0  ;;  %v2783_v37 = vmul.bf16 1045249613, %v5725_v54 }
 0x51c   : > { %4547 = vmatprep.subr.bf16.mxu0 %v4824_v50  ;;  %v2784_v38 = vmul.bf16 1045249613, %v5727_v58  ;;  %v5735_v55 = vld [vmem:[#allocation4 + $0x10] sm:$0xf]  ;;  %vm2811_vm9 = vcmp.gt.bf16.partialorder %v5729_v40, 0  ;;  %v4827_v51 = vld [vmem:[%s5899_s2 + $0x1e0] sm:$0xff]  }
 0x51d   : > { %v2814_v59 = vmul.bf16 1045249613, %v5729_v40  ;;  %v2788_v60 = vsel %vm2778_vm14, %v5725_v54, %v2783_v37  ;;  %vm2812_vm7 = vcmp.gt.bf16.partialorder %v5735_v55, 0  ;;  %v2815_v56 = vmul.bf16 1045249613, %v5735_v55  ;;  %v4828_v9 = vld [vmem:[%s5899_s2 + $0x1e8] sm:$0xff]  }
 0x51e   : > { %v2789_v61 = vsel %vm2779_vm5, %v5727_v58, %v2784_v38  ;;  %v5747_v62 = vld [vmem:[#allocation4 + $0x14] sm:$0x7]  ;;  %v2771_v23 = vld [vmem:[#allocation4] sm:$0xc]  ;;  %v2772_v24 = vld [vmem:[#allocation4 + $0x4] sm:$0xf] }
 0x51f   : > { %4548 = vmatpush3.bf16.msra.mxu0 %v4824_v50  ;;  %v2817_v57 = vsel %vm2811_vm9, %v5729_v40, %v2814_v59  ;;  %v2818_v0 = vsel %vm2812_vm7, %v5735_v55, %v2815_v56  ;;  %vm2813_vm10 = vcmp.gt.bf16.partialorder %v5747_v62, 0  ;;  %v2816_v2 = vmul.bf16 1045249613, %v5747_v62  ;;  %v4829_v20 = vld [vmem:[%s5899_s2 + $0x1f0] sm:$0xff]   ;;  %v4830_v8 = vld [vmem:[%s5899_s2 + $0x1f8] sm:$0xff]   ;;  %v4831_v35 = vld [vmem:[%s5899_s2 + $0x180] sm:$0xff]  }
 0x520   : > { %4549 = vmatprep.subr.bf16.mxu0 %v4825_v52  ;;  %v3997_v1 = vcombine.low %v2817_v57, %v2788_v60  ;;  %v3998_v3 = vcombine.low %v2789_v61, %v2818_v0  ;;  %vm2776_vm3 = vcmp.gt.bf16.partialorder %v2771_v23, 0  ;;  %vm2777_vm11 = vcmp.gt.bf16.partialorder %v2772_v24, 0  ;;  %v4832_v27 = vld [vmem:[%s5899_s2 + $0x188] sm:$0xff]   ;;  %v4833_v63 = vld [vmem:[%s5899_s2 + $0x190] sm:$0xff]   ;;  %v4847_v22 = vld [vmem:[%s5902_s5 + $0x80] sm:$0xff]  }
 0x521   : > { %v2819_v6 = vsel %vm2813_vm10, %v5747_v62, %v2816_v2  ;;  %v2781_v29 = vmul.bf16 1045249613, %v2771_v23  ;;  %v2782_v7 = vmul.bf16 1045249613, %v2772_v24  ;;  %v4009_v32 = vcombine.low %v2788_v60, %v2789_v61  ;;  %4605 = vmatprep.subr.bf16.mxu1 %v4847_v22  ;;  %v4848_v44 = vld [vmem:[%s5902_s5 + $0x88] sm:$0xff]   ;;  %v4849_v45 = vld [vmem:[%s5902_s5 + $0x90] sm:$0xff]  }
 0x522   : > { %v2852_v4 = vshrl.u32 %v3997_v1, 16  ;;  %v2855_v5 = vshll.u32 %v3997_v1, 16  ;;  %v2860_v10 = vshrl.u32 %v3998_v3, 16  ;;  %v2863_v11 = vshll.u32 %v3998_v3, 16  ;;  %4606 = vmatpush3.bf16.msra.mxu1 %v4847_v22  ;;  %v4834_v46 = vld [vmem:[%s5899_s2 + $0x198] sm:$0xff]   ;;  %v4835_v48 = vld [vmem:[%s5899_s2 + $0x1a0] sm:$0xff]  }
 0x523   : > { %4550 = vmatpush3.bf16.msra.mxu0 %v4825_v52  ;;  %v3999_v12 = vcombine.low %v2819_v6, %v2819_v6  ;;  %v2786_v30 = vsel %vm2776_vm3, %v2771_v23, %v2781_v29  ;;  %v2787_v33 = vsel %vm2777_vm11, %v2772_v24, %v2782_v7  ;;  %v5766_v41 = vrot.slane %v4009_v32, 2  ;;  %4607 = vmatprep.subr.bf16.mxu1 %v4848_v44  ;;  %v4850_v47 = vld [vmem:[%s5902_s5 + $0x98] sm:$0xff]   ;;  %v2775_v42 = vld [vmem:[#allocation4 + $0x10] sm:$0x3]  ;;  %v3089_v49 = vld [vmem:[#allocation4 + $0x8] sm:$0x8] }
 0x524   : > { %4551 = vmatprep.subr.bf16.mxu0 %v4826_v53  ;;  %v2854_v13 = vrot.slane %v2852_v4, 2  ;;  %v2857_v14 = vrot.slane %v2855_v5, 3  ;;  %v2862_v15 = vrot.slane %v2860_v10, 2  ;;  %v2865_v16 = vrot.slane %v2863_v11, 3  ;;  %v3090_v50 = vld [vmem:[#allocation4 + $0xc] sm:$0xf] }
 0x525   : > { %v2869_v18 = vshrl.u32 %v3999_v12, 16  ;;  %v2872_v19 = vshll.u32 %v3999_v12, 16  ;;  %v4008_v34 = vcombine.low %v2786_v30, %v2787_v33  ;;  %v3091_v52 = vld [vmem:[#allocation4 + $0x10] sm:$0xf]  ;;  %v4851_v37 = vld [vmem:[%s5902_s5 + $0xa0] sm:$0xff]   ;;  %v4836_v38 = vld [vmem:[%s5899_s2 + $0x1a8] sm:$0xff]  }
 0x526   : > { %v2858_v17 = vor.u32 %v2857_v14, %v2854_v13  ;;  %v2866_v21 = vor.u32 %v2865_v16, %v2862_v15  ;;  %4608 = vmatpush3.bf16.msra.mxu1 %v4848_v44  ;;  %vm2780_vm8 = vcmp.gt.bf16.partialorder %v2775_v42, 0  ;;  %v2785_v59 = vmul.bf16 1045249613, %v2775_v42  ;;  %v4852_v57 = vld [vmem:[%s5902_s5 + $0xa8] sm:$0xff]   ;;  %v4837_v0 = vld [vmem:[%s5899_s2 + $0x1b0] sm:$0xff]   ;;  %v4839_v13 = vld [vmem:[%s5899_s2 + $0x200] sm:$0xff]  }
 0x527   : > { %4552 = vmatpush3.bf16.msra.mxu0 %v4826_v53  ;;  %v2871_v26 = vrot.slane %v2869_v18, 2  ;;  %v2874_v28 = vrot.slane %v2872_v19, 3  ;;  %v2985_v39 = vrot.slane %v4008_v34, 2  ;;  %4609 = vmatprep.subr.bf16.mxu1 %v4849_v45  ;;  %v3092_v53 = vld [vmem:[#allocation4 + $0x14] sm:$0xf]  ;;  %vm3094_vm13 = vcmp.gt.bf16.partialorder %v3089_v49, 0 }
 0x528   : > { %4553 = vmatprep.subr.bf16.mxu0 %v4827_v51  ;;  %v2867_v25 = vsel %vm2850_vm2, %v2858_v17, %v2866_v21  ;;  %v3099_v60 = vmul.bf16 1045249613, %v3089_v49  ;;  %v3100_v61 = vmul.bf16 1045249613, %v3090_v50  ;;  %v3101_v56 = vmul.bf16 1045249613, %v3091_v52 }
 0x529   : > { %4561 = vmatprep.mubr.bf16.mxu0 %v2867_v25  ;;  %v2875_v36 = vor.u32 %v2874_v28, %v2871_v26  ;;  %v2987_v31 = vsel %vm1711_vm1, %v2985_v39, %v5766_v41  ;;  %vm3095_vm6 = vcmp.gt.bf16.partialorder %v3090_v50, 0  ;;  %vm3096_vm0 = vcmp.gt.bf16.partialorder %v3091_v52, 0  ;;  %v4840_v17 = vld [vmem:[%s5899_s2 + $0x208] sm:$0xff]   ;;  %v4841_v19 = vld [vmem:[%s5899_s2 + $0x210] sm:$0xff]   ;;  %v3093_v23 = vld [vmem:[#allocation4 + $0x18] sm:$0x7] }
 0x52a   : > { %4610 = vmatpush3.bf16.msra.mxu1 %v4849_v45  ;;  %vm3097_vm4 = vcmp.gt.bf16.partialorder %v3092_v53, 0  ;;  %v2790_v1 = vsel %vm2780_vm8, %v2775_v42, %v2785_v59  ;;  %v3104_v2 = vsel %vm3094_vm13, %v3089_v49, %v3099_v60  ;;  %v3105_v3 = vsel %vm3095_vm6, %v3090_v50, %v3100_v61  ;;  %v4844_v24 = vld [vmem:[%s5899_s2 + $0x228] sm:$0xff]   ;;  %v4845_v26 = vld [vmem:[%s5899_s2 + $0x230] sm:$0xff]   ;;  %v4846_v7 = vld [vmem:[%s5899_s2 + $0x238] sm:$0xff]  }
 0x52b   : > { %4554 = vmatpush3.bf16.msra.mxu0 %v4827_v51  ;;  %v2876_v43 = vsel %vm2850_vm2, %v2866_v21, %v2875_v36  ;;  %4611 = vmatprep.subr.bf16.mxu1 %v4850_v47  ;;  %v3102_v51 = vmul.bf16 1045249613, %v3092_v53  ;;  %v3106_v4 = vsel %vm3096_vm0, %v3091_v52, %v3101_v56  ;;  %v4010_v6 = vcombine.low %v2790_v1, %v2790_v1  ;;  %v4843_v21 = vld [vmem:[%s5899_s2 + $0x220] sm:$0xff]   ;;  %v4853_v30 = vld [vmem:[%s5902_s5 + $0xb0] sm:$0xff]   ;;  %v4854_v33 = vld [vmem:[%s5902_s5 + $0xb8] sm:$0xff]  }
 0x52c   : > { %4555 = vmatprep.subr.bf16.mxu0 %v4828_v9  ;;  %v4035_v10 = vcombine.low %v3104_v2, %v3105_v3  ;;  %v3103_v25 = vmul.bf16 1045249613, %v3093_v23  ;;  %v4855_v34 = vld [vmem:[%s5901_s4 + $0x80] sm:$0xff]   ;;  %v4089_v36 = vcombine.low %v5727_v58, %v5735_v55  ;;  %v4857_v2 = vld [vmem:[%s5901_s4 + $0x90] sm:$0xff]   ;;  %v4858_v3 = vld [vmem:[%s5901_s4 + $0x98] sm:$0xff]  }
 0x52d   : > { %v3107_v5 = vsel %vm3097_vm4, %v3092_v53, %v3102_v51  ;;  %v2988_v12 = vrot.slane %v4010_v6, 2  ;;  %v4860_v6 = vld [vmem:[%s5901_s4 + $0xa8] sm:$0xff]  }
 0x52e   : > { %4612 = vmatpush3.bf16.msra.mxu1 %v4850_v47  ;;  %v4036_v11 = vcombine.low %v3106_v4, %v3107_v5  ;;  %v3140_v14 = vrot.slane %v4035_v10, 3  ;;  %v4859_v4 = vld [vmem:[%s5901_s4 + $0xa0] sm:$0xff]   ;;  %v4090_v5 = vcombine.low %v5747_v62, %v5747_v62  ;;  %v4862_v62 = vld [vmem:[%s5901_s4 + $0xb8] sm:$0xff]  }
 0x52f   : > { %4556 = vmatpush3.bf16.msra.mxu0 %v4828_v9  ;;  %4613 = vmatprep.subr.bf16.mxu1 %v4851_v37  ;;  %v4838_v9 = vld [vmem:[%s5899_s2 + $0x1b8] sm:$0xff]   ;;  %v2989_v16 = vsel %vm1711_vm1, %v5766_v41, %v2988_v12  ;;  %vm3098_vm1 = vcmp.gt.bf16.partialorder %v3093_v23, 0  ;;  %v4047_v41 = vld [vmem:[%s5900_s3 + $0x2] ss:$0 sm:$0xff] }
 0x530   : > { %4557 = vmatprep.subr.bf16.mxu0 %v4829_v20  ;;  %v3141_v15 = vrot.slane %v4036_v11, 3  ;;  %v3108_v28 = vsel %vm3098_vm1, %v3093_v23, %v3103_v25  ;;  %v3439_v10 = vshll.u32 %v4090_v5, 16  ;;  %v4861_v11 = vld [vmem:[%s5901_s4 + $0xb0] sm:$0xff]  }
 0x531   : > { %v4037_v29 = vcombine.low %v3108_v28, %v3108_v28 }
 0x532   : > { %4614 = vmatpush3.bf16.msra.mxu1 %v4851_v37  ;;  %v3142_v18 = vsel %vm3139_vm12, %v3140_v14, %v3141_v15 }
 0x533   : > { %4558 = vmatpush3.bf16.msra.mxu0 %v4829_v20  ;;  %4615 = vmatprep.subr.bf16.mxu1 %v4852_v57  ;;  %v4842_v20 = vld [vmem:[%s5899_s2 + $0x218] sm:$0xff]  }
 0x534   : > { %4559 = vmatprep.subr.bf16.mxu0 %v4830_v8 }
 0x536   : > { %4616 = vmatpush3.bf16.msra.mxu1 %v4852_v57 }
 0x537   : > { %4560 = vmatpush3.bf16.msra.mxu0 %v4830_v8  ;;  %v3143_v8 = vrot.slane %v4037_v29, 3  ;;  %4617 = vmatprep.subr.bf16.mxu1 %v4853_v30 }
 0x538   : > { %4565 = vmatprep.subr.bf16.mxu0 %v4831_v35 }
 0x539   : > { %v3144_v32 = vsel %vm3139_vm12, %v3141_v15, %v3143_v8 }
 0x53a   : > { %4562 = vmatmul.mubr.bf16.vlgmr.msra.gmra.mrb[28].mxu0 %v2876_v43  ;;  %4618 = vmatpush3.bf16.msra.mxu1 %v4853_v30 }
 0x53b   : > { %4566 = vmatpush3.bf16.msra.mxu0 %v4831_v35  ;;  %4581 = vmatprep.mubr.bf16.mxu0 %v2987_v31  ;;  %v4088_v35 = vcombine.low %v5729_v40, %v5725_v54  ;;  %v3430_v31 = vshll.u32 %v4089_v36, 16 }
 0x53c   : > { %4567 = vmatprep.subr.bf16.mxu0 %v4832_v27  ;;  %4619 = vmatprep.subr.bf16.mxu1 %v4854_v33 }
 0x53d   : > { %v3419_v39 = vshrl.u32 %v4088_v35, 16  ;;  %v3422_v43 = vshll.u32 %v4088_v35, 16  ;;  %v3432_v54 = vrot.slane %v3430_v31, 3 }
 0x53e   : > { %4620 = vmatpush3.bf16.msra.mxu1 %v4854_v33 }
 0x53f   : > { %4568 = vmatpush3.bf16.msra.mxu0 %v4832_v27  ;;  %4625 = vmatprep.subr.bf16.mxu1 %v4855_v34  ;;  %v3427_v27 = vshrl.u32 %v4089_v36, 16  ;;  %v3421_v45 = vrot.slane %v3419_v39, 2 }
 0x540   : > { %4569 = vmatprep.subr.bf16.mxu0 %v4833_v63 }
 0x541   : > { %v3429_v42 = vrot.slane %v3427_v27, 2 }
 0x543   : > { %4570 = vmatpush3.bf16.msra.mxu0 %v4833_v63 }
 0x544   : > { %4571 = vmatprep.subr.bf16.mxu0 %v4834_v46 }
 0x547   : > { %4572 = vmatpush3.bf16.msra.mxu0 %v4834_v46 }
 0x548   : > { %4573 = vmatprep.subr.bf16.mxu0 %v4835_v48 }
 0x54b   : > { %4574 = vmatpush3.bf16.msra.mxu0 %v4835_v48  ;;  %v3424_v48 = vrot.slane %v3422_v43, 3 }
 0x54c   : > { %4575 = vmatprep.subr.bf16.mxu0 %v4836_v38 }
 0x54d   : > { %v3425_v37 = vor.u32 %v3424_v48, %v3421_v45 }
 0x54f   : > { %4576 = vmatpush3.bf16.msra.mxu0 %v4836_v38  ;;  %v3433_v38 = vor.u32 %v3432_v54, %v3429_v42 }
 0x550   : > { %4577 = vmatprep.subr.bf16.mxu0 %v4837_v0 }
 0x551   : > { %v3434_v1 = vsel %vm2850_vm2, %v3425_v37, %v3433_v38 }
 0x553   : > { %4578 = vmatpush3.bf16.msra.mxu0 %v4837_v0  ;;  %v4856_v0 = vld [vmem:[%s5901_s4 + $0x88] sm:$0xff]  }
 0x554   : > { %4579 = vmatprep.subr.bf16.mxu0 %v4838_v9 }
 0x557   : > { %4580 = vmatpush3.bf16.msra.mxu0 %v4838_v9  ;;  %v3436_v9 = vshrl.u32 %v4090_v5, 16 }
 0x558   : > { %4585 = vmatprep.subr.bf16.mxu0 %v4839_v13 }
 0x559   : > { %v3438_v12 = vrot.slane %v3436_v9, 2 }
 0x55a   : > { %4582 = vmatmul.mubr.bf16.vlgmr.msra.gmra.mrb[28].mxu0 %v2989_v16 }
 0x55b   : > { %4586 = vmatpush3.bf16.msra.mxu0 %v4839_v13  ;;  %4601 = vmatprep.mubr.bf16.mxu0 %v3142_v18  ;;  %v3441_v13 = vrot.slane %v3439_v10, 3 }
 0x55c   : > { %4587 = vmatprep.subr.bf16.mxu0 %v4840_v17 }
 0x55d   : > { %v3442_v14 = vor.u32 %v3441_v13, %v3438_v12 }
 0x55f   : > { %4588 = vmatpush3.bf16.msra.mxu0 %v4840_v17  ;;  %v3443_v15 = vsel %vm2850_vm2, %v3433_v38, %v3442_v14  ;;  %v4099_v17 = vld [vmem:[#allocation5 + $0x2] ss:$0 sm:$0xff] }
 0x560   : > { %4589 = vmatprep.subr.bf16.mxu0 %v4841_v19 }
 0x563   : > { %4590 = vmatpush3.bf16.msra.mxu0 %v4841_v19 }
 0x564   : > { %4591 = vmatprep.subr.bf16.mxu0 %v4842_v20 }
 0x567   : > { %4592 = vmatpush3.bf16.msra.mxu0 %v4842_v20 }
 0x568   : > { %4593 = vmatprep.subr.bf16.mxu0 %v4843_v21 }
 0x56b   : > { %4594 = vmatpush3.bf16.msra.mxu0 %v4843_v21 }
 0x56c   : > { %4595 = vmatprep.subr.bf16.mxu0 %v4844_v24 }
 0x56f   : > { %4596 = vmatpush3.bf16.msra.mxu0 %v4844_v24 }
 0x570   : > { %4597 = vmatprep.subr.bf16.mxu0 %v4845_v26 }
 0x573   : > { %4598 = vmatpush3.bf16.msra.mxu0 %v4845_v26 }
 0x574   : > { %4599 = vmatprep.subr.bf16.mxu0 %v4846_v7 }
 0x577   : > { %4600 = vmatpush3.bf16.msra.mxu0 %v4846_v7 }
 0x57a   : > { %4602 = vmatmul.mubr.bf16.vlgmr.msra.gmra.mrb[28].mxu0 %v3144_v32 }
 0x64d   : > { %v4603_v63 = vpop.f32.mrb[28].mxu0 }
 0x64e   : > { %v3258_v22 = vadd.f32 %v4603_v63, %v4047_v41  ;;  %v3229_v44 = vpop.f32.mrb[29].mxu0 }
 0x64f   : > { %v3256_v46 = vadd.f32 %v4047_v41, %v3229_v44  ;;  %v4604_v47 = vpop.f32.mrb[30].mxu0 }
 0x650   : > { %v3266_v40 = vmul.f32 0.2, %v3258_v22  ;;  %v3259_v49 = vadd.f32 %v4604_v47, %v4047_v41  ;;  %v3232_v58 = vpop.f32.mrb[31].mxu0  ;;  %vm3262_vm15 = vcmp.gt.f32.partialorder %v3258_v22, 0.0 }
 0x651   : > { %v3264_v55 = vmul.f32 0.2, %v3256_v46  ;;  %v3257_v50 = vadd.f32 %v4047_v41, %v3232_v58  ;;  %vm3260_vm5 = vcmp.gt.f32.partialorder %v3256_v46, 0.0 }
 0x652   : > { %vm3263_vm14 = vcmp.gt.f32.partialorder %v3259_v49, 0.0  ;;  %v3267_v52 = vmul.f32 0.2, %v3259_v49  ;;  %v3270_v59 = vsel %vm3262_vm15, %v3258_v22, %v3266_v40 }
 0x653   : > { %v3265_v53 = vmul.f32 0.2, %v3257_v50  ;;  %vm3261_vm9 = vcmp.gt.f32.partialorder %v3257_v50, 0.0  ;;  %v3268_v61 = vsel %vm3260_vm5, %v3256_v46, %v3264_v55 }
 0x654   : > { %v3271_v60 = vsel %vm3263_vm14, %v3259_v49, %v3267_v52 }
 0x655   : > { %v3269_v56 = vsel %vm3261_vm9, %v3257_v50, %v3265_v53  ;;  %v3273_v51 = vpack.c.bf16 %v3271_v60, %v3270_v59 }
 0x656   : > { %v3272_v57 = vpack.c.bf16 %v3269_v56, %v3268_v61 }
 0x658   : > { %4621 = vmatprep.mubr.bf16.mxu1 %v3272_v57 }
 0x659   : > { %4622 = vmatmul.mubr.bf16.vlgmr.msra.gmra.mrb[28].mxu1 %v3273_v51 }
 0x65a   : > { %4626 = vmatpush3.bf16.msra.mxu1 %v4855_v34  ;;  %4641 = vmatprep.mubr.bf16.mxu1 %v3434_v1 }
 0x65b   : > { %4627 = vmatprep.subr.bf16.mxu1 %v4856_v0 }
 0x65e   : > { %4628 = vmatpush3.bf16.msra.mxu1 %v4856_v0 }
 0x65f   : > { %4629 = vmatprep.subr.bf16.mxu1 %v4857_v2 }
 0x662   : > { %4630 = vmatpush3.bf16.msra.mxu1 %v4857_v2 }
 0x663   : > { %4631 = vmatprep.subr.bf16.mxu1 %v4858_v3 }
 0x666   : > { %4632 = vmatpush3.bf16.msra.mxu1 %v4858_v3 }
 0x667   : > { %4633 = vmatprep.subr.bf16.mxu1 %v4859_v4 }
 0x66a   : > { %4634 = vmatpush3.bf16.msra.mxu1 %v4859_v4 }
 0x66b   : > { %4635 = vmatprep.subr.bf16.mxu1 %v4860_v6 }
 0x66e   : > { %4636 = vmatpush3.bf16.msra.mxu1 %v4860_v6 }
 0x66f   : > { %4637 = vmatprep.subr.bf16.mxu1 %v4861_v11 }
 0x672   : > { %4638 = vmatpush3.bf16.msra.mxu1 %v4861_v11 }
 0x673   : > { %4639 = vmatprep.subr.bf16.mxu1 %v4862_v62 }
 0x676   : > { %4640 = vmatpush3.bf16.msra.mxu1 %v4862_v62 }
 0x679   : > { %4642 = vmatmul.mubr.bf16.vlgmr.msra.gmra.mrb[28].mxu1 %v3443_v15 }
 0x74c   : > { %v4643_v16 = vpop.f32.mrb[28].mxu1 }
 0x74d   : > { %v3528_v18 = vpop.f32.mrb[29].mxu1  ;;  %v3553_v20 = vadd.f32 %v4643_v16, %v4099_v17 }
 0x74e   : > { %v4644_v19 = vpop.f32.mrb[30].mxu1  ;;  %v3551_v24 = vadd.f32 %v4099_v17, %v3528_v18 }
 0x74f   : > { %v3554_v21 = vadd.f32 %v4644_v19, %v4099_v17  ;;  %v3531_v23 = vpop.f32.mrb[31].mxu1 }
 0x750   : > { %v3552_v25 = vadd.f32 %v4099_v17, %v3531_v23 }
 0x751   : > { %v4132_v26 = vpack.c.bf16 %v3554_v21, %v3553_v20 }
 0x752   : > { %v4127_v28 = vpack.c.bf16 %v3552_v25, %v3551_v24 }
 0x753   : > { %4134 = vst [vmem:[%s5068_s29 + $0x8] sm:$0xff] %v4132_v26  }
 0x754   : > { %4128 = vst [vmem:[%s5068_s29] sm:$0xff] %v4127_v28  }
 0x755 PF: > { %s18_s28 = sadd.s32 1, %s4936_s28   ;;  %s5947_s24 = smov %s4928_s26 }
 0x756   : > { %p15_p12 = scmp.ge.s32.totalorder %s18_s28, 8   ;;  %s5948_s25 = smov %s4932_s27 }
 0x757   : > { %s5949_s26 = smov %s5952_s30  ;;  %s5950_s27 = smov %s5956_s8 }
 0x758   :  { %17 = sbr.rel (!%p15_p12) target bundleno = 3 (0x3), region = 118 }
 0x75f   :  { %3605 = vsyncpa [#allocation6], 1 }
 0x760   :  { %3607 = vsyncpa [#allocation6 + $0x1], 1 }

</bundles_post_ra>
